<compile_context>
chip_gen: v5e
topology: v5e:2x2
jax: 0.10.0
libtpu: 0.0.40
codegen_flags: <defaults>
</compile_context>

<pallas_src>
import functools

import jax
import jax.numpy as jnp
from jax import lax
from jax.experimental import pallas as pl
from jax.experimental.pallas import tpu as pltpu

EPS = 1e-3      # ChannelNorm2D eps used in HiFiC
J = 8           # leading junk rows of the flattened window scratch (sublane aligned)


# ----------------------------- kernel helpers ------------------------------

def _channel_norm(v, gamma, beta, c_true):
    # v: (M, Cpad) with channels >= c_true identically zero (zero-padded
    # weights/bias/gamma/beta keep them zero).  Mean and unbiased variance over
    # the first c_true channels, derived from sum / sum-of-squares in one pass.
    s = jnp.sum(v, axis=-1, keepdims=True)
    ss = jnp.sum(v * v, axis=-1, keepdims=True)
    mu = s * (1.0 / c_true)
    var = (ss - c_true * mu * mu) * (1.0 / (c_true - 1))
    return (v - mu) * lax.rsqrt(var + EPS) * gamma + beta


def _conv3x3(src_ref, offsets, m_rows, w_ref, b_ref):
    # Single im2col matmul: the 9 taps are flat row-shifted slices of the
    # flattened padded slab; concatenated along lanes -> (M, 9*Cpad) patch,
    # one (M, 9*Cpad) @ (9*Cpad, Cpad) MXU contraction, bias folded in once.
    taps = [src_ref[o:o + m_rows, :] for o in offsets]
    patch = jnp.concatenate(taps, axis=1)
    return jnp.dot(patch, w_ref[...],
                   preferred_element_type=jnp.float32) + b_ref[...]


# --------------------------------- kernel ----------------------------------

def _residual_block_kernel(x_hbm, w1_ref, b1_ref, g1_ref, be1_ref,
                           w2_ref, b2_ref, g2_ref, be2_ref,
                           o_ref, xbuf, f2buf, sem, *, th, w, c):
    wp = w + 2                    # width of the pre-padded rows
    cpad = xbuf.shape[-1]
    win = (th + 4) * wp           # flattened rows of the DMA'd halo window
    m1 = (th + 2) * wp            # conv1 output rows (incl. halo rows)
    m2 = th * wp                  # conv2 / final output rows

    b = pl.program_id(0)
    t = pl.program_id(1)
    n_t = pl.num_programs(1)

    # Keep the (never consumed by valid outputs) junk rows deterministic.
    xbuf[0:J, :] = jnp.zeros((J, cpad), jnp.float32)
    xbuf[J + win:J + win + J, :] = jnp.zeros((J, cpad), jnp.float32)
    f2buf[m1:m1 + wp, :] = jnp.zeros((wp, cpad), jnp.float32)

    # ---- halo load: rows [t*TH, t*TH + TH + 4) of the pre-padded image -----
    row0 = t * (th * wp)
    cp = pltpu.make_async_copy(x_hbm.at[b, pl.ds(row0, win)],
                               xbuf.at[pl.ds(J, win)],
                               sem.at[0])
    cp.start()
    cp.wait()
    # TODO(synk): double-buffer this halo DMA across grid steps to overlap the
    # HBM load with compute.

    # ---- conv1 (one im2col matmul) -> channel-norm -> relu -----------------
    off1 = [J + dy * wp + dx - 1 for dy in range(3) for dx in range(3)]
    c1 = _conv3x3(xbuf, off1, m1, w1_ref, b1_ref)
    r1 = jnp.maximum(_channel_norm(c1, g1_ref[...], be1_ref[...], c), 0.0)

    # ---- build conv2's reflection-padded input in VMEM (4 tiny fixes) ------
    f2buf[0:m1, :] = r1
    # W reflection: padded col -1 := col 1, padded col W := col W-2.
    for m in range(th + 2):
        base = m * wp
        f2buf[base:base + 1, :] = f2buf[base + 2:base + 3, :]
        f2buf[base + wp - 1:base + wp, :] = f2buf[base + w - 1:base + w, :]

    # H reflection only at the true image boundaries.
    @pl.when(t == 0)
    def _():
        f2buf[0:wp, :] = f2buf[2 * wp:3 * wp, :]

    @pl.when(t == n_t - 1)
    def _():
        f2buf[(th + 1) * wp:(th + 2) * wp, :] = f2buf[(th - 1) * wp:th * wp, :]

    # ---- conv2 (one im2col matmul) -> channel-norm -> residual add ---------
    off2 = [dy * wp + dx for dy in range(3) for dx in range(3)]
    c2 = _conv3x3(f2buf, off2, m2, w2_ref, b2_ref)
    r2 = _channel_norm(c2, g2_ref[...], be2_ref[...], c)

    x_res = xbuf[J + 2 * wp + 1:J + 2 * wp + 1 + m2, :]   # the identity map
    o_ref[0, 0] = (r2 + x_res).astype(o_ref.dtype)


# -------------------------------- wrapper ----------------------------------

def _pick_tile_h(h, target=8):
    for th in range(min(h, target), 0, -1):
        if h % th == 0:
            return th
    return h


def residual_block(x_nchw, params, *, tile_h=8):
    """Forward pass of the HiFiC ResidualBlock. x_nchw: (B, C, H, W) float32."""
    B, C, H, W = x_nchw.shape
    assert C >= 2 and H >= 3 and W >= 3, "demo kernel assumes C>=2, H,W>=3"
    cpad = ((C + 127) // 128) * 128
    wp = W + 2
    th = _pick_tile_h(H, tile_h)
    n_t = H // th

    # Wrapper-side layout prep (fused by XLA into one pass over x):
    # NHWC transpose, reflect halo (2 rows = conv ring + halo ring, 1 col),
    # zero-pad channels so the lane axis is dense, flatten spatial dims.
    # TODO(synk): keep the surrounding model NHWC to drop this transpose.
    x = jnp.transpose(x_nchw, (0, 2, 3, 1)).astype(jnp.float32)
    xp = jnp.pad(x, ((0, 0), (2, 2), (1, 1), (0, 0)), mode="reflect")
    xp = jnp.pad(xp, ((0, 0), (0, 0), (0, 0), (0, cpad - C)))
    xp = xp.reshape(B, (H + 4) * wp, cpad)

    def prep_w(w_oihw):                         # OIHW -> (9*Cpad, Cpad), zero-padded
        wm = jnp.transpose(w_oihw, (2, 3, 1, 0)).astype(jnp.float32)
        wm = jnp.pad(wm, ((0, 0), (0, 0), (0, cpad - C), (0, cpad - C)))
        return wm.reshape(9 * cpad, cpad)

    def prep_v(v):                              # bias / gamma / beta -> (1, Cpad)
        return jnp.pad(v.astype(jnp.float32), (0, cpad - C)).reshape(1, cpad)

    w1m, w2m = prep_w(params["w1"]), prep_w(params["w2"])
    b1, b2 = prep_v(params["b1"]), prep_v(params["b2"])
    g1, g2 = prep_v(params["g1"]), prep_v(params["g2"])
    be1, be2 = prep_v(params["be1"]), prep_v(params["be2"])

    kernel = functools.partial(_residual_block_kernel, th=th, w=W, c=C)

    def full(shape):
        return pl.BlockSpec(shape, lambda b, t, n=len(shape): (0,) * n)

    xrows = J + (th + 4) * wp + J               # flattened halo-window scratch rows
    frows = (th + 3) * wp                       # conv2 padded-input scratch rows

    out = pl.pallas_call(
        kernel,
        out_shape=jax.ShapeDtypeStruct((B, n_t, th * wp, cpad), jnp.float32),
        grid_spec=pltpu.PrefetchScalarGridSpec(
            num_scalar_prefetch=0,
            grid=(B, n_t),
            in_specs=[
                pl.BlockSpec(memory_space=pl.ANY),     # pre-padded image (HBM)
                full(w1m.shape), full(b1.shape), full(g1.shape), full(be1.shape),
                full(w2m.shape), full(b2.shape), full(g2.shape), full(be2.shape),
            ],
            out_specs=pl.BlockSpec((1, 1, th * wp, cpad),
                                   lambda b, t: (b, t, 0, 0)),
            scratch_shapes=[
                pltpu.VMEM((xrows, cpad), jnp.float32),   # halo window (flat)
                pltpu.VMEM((frows, cpad), jnp.float32),   # conv2 padded input
                pltpu.SemaphoreType.DMA((1,)),
            ]),
        compiler_params=pltpu.CompilerParams(
            dimension_semantics=("parallel", "parallel")),
    )(xp, w1m, b1, g1, be1, w2m, b2, g2, be2)

    out = out.reshape(B, n_t, th, wp, cpad)[:, :, :, :W, :C]
    out = out.reshape(B, H, W, C).astype(x_nchw.dtype)
    return jnp.transpose(out, (0, 3, 1, 2))                 # -> NCHW


# ------------------------- pure-JAX reference (check) -----------------------

def residual_block_ref(x, p):
    def pad(v):
        return jnp.pad(v, ((0, 0), (0, 0), (1, 1), (1, 1)), mode="reflect")

    def conv(v, w, b):
        y = lax.conv_general_dilated(v, w, (1, 1), "VALID",
                                     dimension_numbers=("NCHW", "OIHW", "NCHW"))
        return y + b[None, :, None, None]

    def cnorm(v, g, be):
        mu = jnp.mean(v, axis=1, keepdims=True)
        var = jnp.sum((v - mu) ** 2, axis=1, keepdims=True) / (v.shape[1] - 1)
        return g[None, :, None, None] * (v - mu) * lax.rsqrt(var + EPS) \
            + be[None, :, None, None]

    res = cnorm(conv(pad(x), p["w1"], p["b1"]), p["g1"], p["be1"])
    res = jnp.maximum(res, 0.0)
    res = cnorm(conv(pad(res), p["w2"], p["b2"]), p["g2"], p["be2"])
    return res + x


# ---------------------------------- main ------------------------------------

if __name__ == "__main__":
    key = jax.random.PRNGKey(0)
    B, C, H, W = 2, 4, 16, 16
    k = jax.random.split(key, 6)

    x = jax.random.normal(k[0], (B, C, H, W), jnp.float32)

    # Deterministic synthetic parameters (shapes match nn.Conv2d(C, C, 3) and
    # ChannelNorm2D(C, affine=True)).
    fan_in = C * 3 * 3
    bound = 1.0 / jnp.sqrt(fan_in)
    params = {
        "w1": jax.random.uniform(k[1], (C, C, 3, 3), jnp.float32, -bound, bound),
        "b1": jax.random.uniform(k[2], (C,), jnp.float32, -bound, bound),
        "w2": jax.random.uniform(k[3], (C, C, 3, 3), jnp.float32, -bound, bound),
        "b2": jax.random.uniform(k[4], (C,), jnp.float32, -bound, bound),
        "g1": jnp.ones((C,), jnp.float32),
        "be1": jnp.zeros((C,), jnp.float32),
        "g2": jnp.ones((C,), jnp.float32),
        "be2": jnp.zeros((C,), jnp.float32),
    }

    out = jax.block_until_ready(residual_block(x, params))
    ref = jax.block_until_ready(residual_block_ref(x, params))

    assert out.shape == (B, C, H, W)
    err = float(jnp.max(jnp.abs(out - ref)))
    assert jnp.allclose(out, ref, atol=1e-4, rtol=1e-4), f"max abs err {err}"

    print("KERNEL_OK")
</pallas_src>

<mosaic_0001>
module attributes {stable_mosaic.version = 11 : i64} {
  func.func @_residual_block_kernel(%arg0: i32, %arg1: i32, %arg2: memref<2x360x128xf32, #tpu.memory_space<any>>, %arg3: memref<1152x128xf32, #tpu.memory_space<vmem>>, %arg4: memref<1x128xf32, #tpu.memory_space<vmem>>, %arg5: memref<1x128xf32, #tpu.memory_space<vmem>>, %arg6: memref<1x128xf32, #tpu.memory_space<vmem>>, %arg7: memref<1152x128xf32, #tpu.memory_space<vmem>>, %arg8: memref<1x128xf32, #tpu.memory_space<vmem>>, %arg9: memref<1x128xf32, #tpu.memory_space<vmem>>, %arg10: memref<1x128xf32, #tpu.memory_space<vmem>>, %arg11: memref<1x1x144x128xf32, #tpu.memory_space<vmem>>, %arg12: memref<232x128xf32, #tpu.memory_space<vmem>>, %arg13: memref<198x128xf32, #tpu.memory_space<vmem>>, %arg14: memref<1x!tpu.dma_semaphore, #tpu.memory_space<semaphore_mem>>) attributes {dimension_semantics = [#tpu.dimension_semantics<parallel>, #tpu.dimension_semantics<parallel>], iteration_bounds = array<i64: 2, 2>, scalar_prefetch = 0 : i64, scratch_operands = 3 : i64, tpu.core_type = #tpu.core_type<tc>, window_params = [{}, {pipeline_mode = #tpu.pipeline_mode<synchronous>, transform_indices = @transform_1, window_bounds = array<i64: 1152, 128>}, {pipeline_mode = #tpu.pipeline_mode<synchronous>, transform_indices = @transform_2, window_bounds = array<i64: 1, 128>}, {pipeline_mode = #tpu.pipeline_mode<synchronous>, transform_indices = @transform_3, window_bounds = array<i64: 1, 128>}, {pipeline_mode = #tpu.pipeline_mode<synchronous>, transform_indices = @transform_4, window_bounds = array<i64: 1, 128>}, {pipeline_mode = #tpu.pipeline_mode<synchronous>, transform_indices = @transform_5, window_bounds = array<i64: 1152, 128>}, {pipeline_mode = #tpu.pipeline_mode<synchronous>, transform_indices = @transform_6, window_bounds = array<i64: 1, 128>}, {pipeline_mode = #tpu.pipeline_mode<synchronous>, transform_indices = @transform_7, window_bounds = array<i64: 1, 128>}, {pipeline_mode = #tpu.pipeline_mode<synchronous>, transform_indices = @transform_8, window_bounds = array<i64: 1, 128>}, {transform_indices = @transform_9, window_bounds = array<i64: 1, 1, 144, 128>}]} {
    %cst = arith.constant 0.000000e+00 : f32
    %0 = vector.broadcast %cst : f32 to vector<8x128xf32>
    %c0 = arith.constant 0 : index
    %c0_0 = arith.constant 0 : index
    %1 = vector.load %arg12[%c0, %c0_0] : memref<232x128xf32, #tpu.memory_space<vmem>>, vector<8x128xf32>
    tpu.vector_store %arg12[%c0, %c0_0], %0 {strides = array<i32>} : memref<232x128xf32, #tpu.memory_space<vmem>>, vector<8x128xf32>,
    %cst_1 = arith.constant 0.000000e+00 : f32
    %2 = vector.broadcast %cst_1 : f32 to vector<8x128xf32>
    %c224 = arith.constant 224 : index
    %c0_2 = arith.constant 0 : index
    %3 = vector.load %arg12[%c224, %c0_2] : memref<232x128xf32, #tpu.memory_space<vmem>>, vector<8x128xf32>
    tpu.vector_store %arg12[%c224, %c0_2], %2 {strides = array<i32>} : memref<232x128xf32, #tpu.memory_space<vmem>>, vector<8x128xf32>,
    %cst_3 = arith.constant 0.000000e+00 : f32
    %4 = vector.broadcast %cst_3 : f32 to vector<18x128xf32>
    %c180 = arith.constant 180 : index
    %c0_4 = arith.constant 0 : index
    %5 = vector.load %arg13[%c180, %c0_4] : memref<198x128xf32, #tpu.memory_space<vmem>>, vector<18x128xf32>
    tpu.vector_store %arg13[%c180, %c0_4], %4 {strides = array<i32>} : memref<198x128xf32, #tpu.memory_space<vmem>>, vector<18x128xf32>,
    %c144_i32 = arith.constant 144 : i32
    %6 = arith.muli %arg1, %c144_i32 : i32
    %c0_i32 = arith.constant 0 : i32
    %c0_i32_5 = arith.constant 0 : i32
    %7 = tpu.memref_slice %arg2[%arg0, %6, %c0_i32_5] : memref<2x360x128xf32, #tpu.memory_space<any>> -> memref<1x216x128xf32, #tpu.memory_space<any>>
    %8 = tpu.memref_squeeze %7 : memref<1x216x128xf32, #tpu.memory_space<any>> -> memref<216x128xf32, #tpu.memory_space<any>>
    %c8_i32 = arith.constant 8 : i32
    %c0_i32_6 = arith.constant 0 : i32
    %9 = tpu.memref_slice %arg12[%c8_i32, %c0_i32_6] : memref<232x128xf32, #tpu.memory_space<vmem>> -> memref<216x128xf32, #tpu.memory_space<vmem>>
    %10 = tpu.memref_slice %arg14[%c0_i32] : memref<1x!tpu.dma_semaphore, #tpu.memory_space<semaphore_mem>> -> memref<1x!tpu.dma_semaphore, #tpu.memory_space<semaphore_mem>>
    %11 = tpu.memref_squeeze %10 : memref<1x!tpu.dma_semaphore, #tpu.memory_space<semaphore_mem>> -> memref<!tpu.dma_semaphore, #tpu.memory_space<semaphore_mem>>
    tpu.enqueue_dma source(%8 : memref<216x128xf32, #tpu.memory_space<any>>) target(%9 : memref<216x128xf32, #tpu.memory_space<vmem>>) target_semaphore(%11 : memref<!tpu.dma_semaphore, #tpu.memory_space<semaphore_mem>>)
    %c0_i32_7 = arith.constant 0 : i32
    %c0_i32_8 = arith.constant 0 : i32
    %12 = tpu.memref_slice %arg2[%arg0, %6, %c0_i32_8] : memref<2x360x128xf32, #tpu.memory_space<any>> -> memref<1x216x128xf32, #tpu.memory_space<any>>
    %13 = tpu.memref_squeeze %12 : memref<1x216x128xf32, #tpu.memory_space<any>> -> memref<216x128xf32, #tpu.memory_space<any>>
    %c8_i32_9 = arith.constant 8 : i32
    %c0_i32_10 = arith.constant 0 : i32
    %14 = tpu.memref_slice %arg12[%c8_i32_9, %c0_i32_10] : memref<232x128xf32, #tpu.memory_space<vmem>> -> memref<216x128xf32, #tpu.memory_space<vmem>>
    %15 = tpu.memref_slice %arg14[%c0_i32_7] : memref<1x!tpu.dma_semaphore, #tpu.memory_space<semaphore_mem>> -> memref<1x!tpu.dma_semaphore, #tpu.memory_space<semaphore_mem>>
    %16 = tpu.memref_squeeze %15 : memref<1x!tpu.dma_semaphore, #tpu.memory_space<semaphore_mem>> -> memref<!tpu.dma_semaphore, #tpu.memory_space<semaphore_mem>>
    tpu.wait_dma2 semaphore(%16 : memref<!tpu.dma_semaphore, #tpu.memory_space<semaphore_mem>>) src(%13 : memref<216x128xf32, #tpu.memory_space<any>>) dst(%14 : memref<216x128xf32, #tpu.memory_space<vmem>>)
    %c7 = arith.constant 7 : index
    %c0_11 = arith.constant 0 : index
    %17 = vector.load %arg12[%c7, %c0_11] : memref<232x128xf32, #tpu.memory_space<vmem>>, vector<180x128xf32>
    %c8 = arith.constant 8 : index
    %c0_12 = arith.constant 0 : index
    %18 = vector.load %arg12[%c8, %c0_12] : memref<232x128xf32, #tpu.memory_space<vmem>>, vector<180x128xf32>
    %c9 = arith.constant 9 : index
    %c0_13 = arith.constant 0 : index
    %19 = vector.load %arg12[%c9, %c0_13] : memref<232x128xf32, #tpu.memory_space<vmem>>, vector<180x128xf32>
    %c25 = arith.constant 25 : index
    %c0_14 = arith.constant 0 : index
    %20 = vector.load %arg12[%c25, %c0_14] : memref<232x128xf32, #tpu.memory_space<vmem>>, vector<180x128xf32>
    %c26 = arith.constant 26 : index
    %c0_15 = arith.constant 0 : index
    %21 = vector.load %arg12[%c26, %c0_15] : memref<232x128xf32, #tpu.memory_space<vmem>>, vector<180x128xf32>
    %c27 = arith.constant 27 : index
    %c0_16 = arith.constant 0 : index
    %22 = vector.load %arg12[%c27, %c0_16] : memref<232x128xf32, #tpu.memory_space<vmem>>, vector<180x128xf32>
    %c43 = arith.constant 43 : index
    %c0_17 = arith.constant 0 : index
    %23 = vector.load %arg12[%c43, %c0_17] : memref<232x128xf32, #tpu.memory_space<vmem>>, vector<180x128xf32>
    %c44 = arith.constant 44 : index
    %c0_18 = arith.constant 0 : index
    %24 = vector.load %arg12[%c44, %c0_18] : memref<232x128xf32, #tpu.memory_space<vmem>>, vector<180x128xf32>
    %c45 = arith.constant 45 : index
    %c0_19 = arith.constant 0 : index
    %25 = vector.load %arg12[%c45, %c0_19] : memref<232x128xf32, #tpu.memory_space<vmem>>, vector<180x128xf32>
    %26 = tpu.concatenate %17, %18, %19, %20, %21, %22, %23, %24, %25 in 1 : vector<180x128xf32>, vector<180x128xf32>, vector<180x128xf32>, vector<180x128xf32>, vector<180x128xf32>, vector<180x128xf32>, vector<180x128xf32>, vector<180x128xf32>, vector<180x128xf32> -> vector<180x1152xf32>
    %c0_20 = arith.constant 0 : index
    %c0_21 = arith.constant 0 : index
    %27 = vector.load %arg3[%c0_20, %c0_21] : memref<1152x128xf32, #tpu.memory_space<vmem>>, vector<1152x128xf32>
    %cst_22 = arith.constant dense<0.000000e+00> : vector<180x128xf32>
    %28 = tpu.matmul %26, %27, %cst_22 {dimension_numbers = #tpu.dot_dimension_numbers<[1], [0], [0], [1], [0, 0, 1, 1], [], []>} : vector<180x1152xf32>, vector<1152x128xf32>, vector<180x128xf32> -> vector<180x128xf32>
    %c0_23 = arith.constant 0 : index
    %c0_24 = arith.constant 0 : index
    %29 = vector.load %arg4[%c0_23, %c0_24] : memref<1x128xf32, #tpu.memory_space<vmem>>, vector<1x128xf32>
    %30 = vector.broadcast %29 : vector<1x128xf32> to vector<180x128xf32>
    %31 = arith.addf %28, %30 : vector<180x128xf32>
    %c0_25 = arith.constant 0 : index
    %c0_26 = arith.constant 0 : index
    %32 = vector.load %arg5[%c0_25, %c0_26] : memref<1x128xf32, #tpu.memory_space<vmem>>, vector<1x128xf32>
    %c0_27 = arith.constant 0 : index
    %c0_28 = arith.constant 0 : index
    %33 = vector.load %arg6[%c0_27, %c0_28] : memref<1x128xf32, #tpu.memory_space<vmem>>, vector<1x128xf32>
    %cst_29 = arith.constant dense<0.000000e+00> : vector<180xf32>
    %34 = vector.multi_reduction <add>, %31, %cst_29 [1] : vector<180x128xf32> to vector<180xf32>
    %35 = vector.shape_cast %34 : vector<180xf32> to vector<180x1xf32>
    %36 = arith.mulf %31, %31 : vector<180x128xf32>
    %cst_30 = arith.constant dense<0.000000e+00> : vector<180xf32>
    %37 = vector.multi_reduction <add>, %36, %cst_30 [1] : vector<180x128xf32> to vector<180xf32>
    %38 = vector.shape_cast %37 : vector<180xf32> to vector<180x1xf32>
    %cst_31 = arith.constant 2.500000e-01 : f32
    %39 = vector.broadcast %cst_31 : f32 to vector<180x1xf32>
    %40 = arith.mulf %35, %39 : vector<180x1xf32>
    %cst_32 = arith.constant 4.000000e+00 : f32
    %41 = vector.broadcast %cst_32 : f32 to vector<180x1xf32>
    %42 = arith.mulf %41, %40 : vector<180x1xf32>
    %43 = arith.mulf %42, %40 : vector<180x1xf32>
    %44 = arith.subf %38, %43 : vector<180x1xf32>
    %cst_33 = arith.constant 0.333333343 : f32
    %45 = vector.broadcast %cst_33 : f32 to vector<180x1xf32>
    %46 = arith.mulf %44, %45 : vector<180x1xf32>
    %47 = vector.broadcast %40 : vector<180x1xf32> to vector<180x128xf32>
    %48 = arith.subf %31, %47 : vector<180x128xf32>
    %cst_34 = arith.constant 1.000000e-03 : f32
    %49 = vector.broadcast %cst_34 : f32 to vector<180x1xf32>
    %50 = arith.addf %46, %49 : vector<180x1xf32>
    %51 = math.rsqrt %50 : vector<180x1xf32>
    %52 = vector.broadcast %51 : vector<180x1xf32> to vector<180x128xf32>
    %53 = arith.mulf %48, %52 : vector<180x128xf32>
    %54 = vector.broadcast %32 : vector<1x128xf32> to vector<180x128xf32>
    %55 = arith.mulf %53, %54 : vector<180x128xf32>
    %56 = vector.broadcast %33 : vector<1x128xf32> to vector<180x128xf32>
    %57 = arith.addf %55, %56 : vector<180x128xf32>
    %cst_35 = arith.constant 0.000000e+00 : f32
    %58 = vector.broadcast %cst_35 : f32 to vector<180x128xf32>
    %59 = arith.maximumf %57, %58 : vector<180x128xf32>
    %c0_36 = arith.constant 0 : index
    %c0_37 = arith.constant 0 : index
    %60 = vector.load %arg13[%c0_36, %c0_37] : memref<198x128xf32, #tpu.memory_space<vmem>>, vector<180x128xf32>
    tpu.vector_store %arg13[%c0_36, %c0_37], %59 {strides = array<i32>} : memref<198x128xf32, #tpu.memory_space<vmem>>, vector<180x128xf32>,
    %c2 = arith.constant 2 : index
    %c0_38 = arith.constant 0 : index
    %61 = vector.load %arg13[%c2, %c0_38] : memref<198x128xf32, #tpu.memory_space<vmem>>, vector<1x128xf32>
    %c0_39 = arith.constant 0 : index
    %c0_40 = arith.constant 0 : index
    %62 = vector.load %arg13[%c0_39, %c0_40] : memref<198x128xf32, #tpu.memory_space<vmem>>, vector<1x128xf32>
    tpu.vector_store %arg13[%c0_39, %c0_40], %61 {strides = array<i32>} : memref<198x128xf32, #tpu.memory_space<vmem>>, vector<1x128xf32>,
    %c15 = arith.constant 15 : index
    %c0_41 = arith.constant 0 : index
    %63 = vector.load %arg13[%c15, %c0_41] : memref<198x128xf32, #tpu.memory_space<vmem>>, vector<1x128xf32>
    %c17 = arith.constant 17 : index
    %c0_42 = arith.constant 0 : index
    %64 = vector.load %arg13[%c17, %c0_42] : memref<198x128xf32, #tpu.memory_space<vmem>>, vector<1x128xf32>
    tpu.vector_store %arg13[%c17, %c0_42], %63 {strides = array<i32>} : memref<198x128xf32, #tpu.memory_space<vmem>>, vector<1x128xf32>,
    %c20 = arith.constant 20 : index
    %c0_43 = arith.constant 0 : index
    %65 = vector.load %arg13[%c20, %c0_43] : memref<198x128xf32, #tpu.memory_space<vmem>>, vector<1x128xf32>
    %c18 = arith.constant 18 : index
    %c0_44 = arith.constant 0 : index
    %66 = vector.load %arg13[%c18, %c0_44] : memref<198x128xf32, #tpu.memory_space<vmem>>, vector<1x128xf32>
    tpu.vector_store %arg13[%c18, %c0_44], %65 {strides = array<i32>} : memref<198x128xf32, #tpu.memory_space<vmem>>, vector<1x128xf32>,
    %c33 = arith.constant 33 : index
    %c0_45 = arith.constant 0 : index
    %67 = vector.load %arg13[%c33, %c0_45] : memref<198x128xf32, #tpu.memory_space<vmem>>, vector<1x128xf32>
    %c35 = arith.constant 35 : index
    %c0_46 = arith.constant 0 : index
    %68 = vector.load %arg13[%c35, %c0_46] : memref<198x128xf32, #tpu.memory_space<vmem>>, vector<1x128xf32>
    tpu.vector_store %arg13[%c35, %c0_46], %67 {strides = array<i32>} : memref<198x128xf32, #tpu.memory_space<vmem>>, vector<1x128xf32>,
    %c38 = arith.constant 38 : index
    %c0_47 = arith.constant 0 : index
    %69 = vector.load %arg13[%c38, %c0_47] : memref<198x128xf32, #tpu.memory_space<vmem>>, vector<1x128xf32>
    %c36 = arith.constant 36 : index
    %c0_48 = arith.constant 0 : index
    %70 = vector.load %arg13[%c36, %c0_48] : memref<198x128xf32, #tpu.memory_space<vmem>>, vector<1x128xf32>
    tpu.vector_store %arg13[%c36, %c0_48], %69 {strides = array<i32>} : memref<198x128xf32, #tpu.memory_space<vmem>>, vector<1x128xf32>,
    %c51 = arith.constant 51 : index
    %c0_49 = arith.constant 0 : index
    %71 = vector.load %arg13[%c51, %c0_49] : memref<198x128xf32, #tpu.memory_space<vmem>>, vector<1x128xf32>
    %c53 = arith.constant 53 : index
    %c0_50 = arith.constant 0 : index
    %72 = vector.load %arg13[%c53, %c0_50] : memref<198x128xf32, #tpu.memory_space<vmem>>, vector<1x128xf32>
    tpu.vector_store %arg13[%c53, %c0_50], %71 {strides = array<i32>} : memref<198x128xf32, #tpu.memory_space<vmem>>, vector<1x128xf32>,
    %c56 = arith.constant 56 : index
    %c0_51 = arith.constant 0 : index
    %73 = vector.load %arg13[%c56, %c0_51] : memref<198x128xf32, #tpu.memory_space<vmem>>, vector<1x128xf32>
    %c54 = arith.constant 54 : index
    %c0_52 = arith.constant 0 : index
    %74 = vector.load %arg13[%c54, %c0_52] : memref<198x128xf32, #tpu.memory_space<vmem>>, vector<1x128xf32>
    tpu.vector_store %arg13[%c54, %c0_52], %73 {strides = array<i32>} : memref<198x128xf32, #tpu.memory_space<vmem>>, vector<1x128xf32>,
    %c69 = arith.constant 69 : index
    %c0_53 = arith.constant 0 : index
    %75 = vector.load %arg13[%c69, %c0_53] : memref<198x128xf32, #tpu.memory_space<vmem>>, vector<1x128xf32>
    %c71 = arith.constant 71 : index
    %c0_54 = arith.constant 0 : index
    %76 = vector.load %arg13[%c71, %c0_54] : memref<198x128xf32, #tpu.memory_space<vmem>>, vector<1x128xf32>
    tpu.vector_store %arg13[%c71, %c0_54], %75 {strides = array<i32>} : memref<198x128xf32, #tpu.memory_space<vmem>>, vector<1x128xf32>,
    %c74 = arith.constant 74 : index
    %c0_55 = arith.constant 0 : index
    %77 = vector.load %arg13[%c74, %c0_55] : memref<198x128xf32, #tpu.memory_space<vmem>>, vector<1x128xf32>
    %c72 = arith.constant 72 : index
    %c0_56 = arith.constant 0 : index
    %78 = vector.load %arg13[%c72, %c0_56] : memref<198x128xf32, #tpu.memory_space<vmem>>, vector<1x128xf32>
    tpu.vector_store %arg13[%c72, %c0_56], %77 {strides = array<i32>} : memref<198x128xf32, #tpu.memory_space<vmem>>, vector<1x128xf32>,
    %c87 = arith.constant 87 : index
    %c0_57 = arith.constant 0 : index
    %79 = vector.load %arg13[%c87, %c0_57] : memref<198x128xf32, #tpu.memory_space<vmem>>, vector<1x128xf32>
    %c89 = arith.constant 89 : index
    %c0_58 = arith.constant 0 : index
    %80 = vector.load %arg13[%c89, %c0_58] : memref<198x128xf32, #tpu.memory_space<vmem>>, vector<1x128xf32>
    tpu.vector_store %arg13[%c89, %c0_58], %79 {strides = array<i32>} : memref<198x128xf32, #tpu.memory_space<vmem>>, vector<1x128xf32>,
    %c92 = arith.constant 92 : index
    %c0_59 = arith.constant 0 : index
    %81 = vector.load %arg13[%c92, %c0_59] : memref<198x128xf32, #tpu.memory_space<vmem>>, vector<1x128xf32>
    %c90 = arith.constant 90 : index
    %c0_60 = arith.constant 0 : index
    %82 = vector.load %arg13[%c90, %c0_60] : memref<198x128xf32, #tpu.memory_space<vmem>>, vector<1x128xf32>
    tpu.vector_store %arg13[%c90, %c0_60], %81 {strides = array<i32>} : memref<198x128xf32, #tpu.memory_space<vmem>>, vector<1x128xf32>,
    %c105 = arith.constant 105 : index
    %c0_61 = arith.constant 0 : index
    %83 = vector.load %arg13[%c105, %c0_61] : memref<198x128xf32, #tpu.memory_space<vmem>>, vector<1x128xf32>
    %c107 = arith.constant 107 : index
    %c0_62 = arith.constant 0 : index
    %84 = vector.load %arg13[%c107, %c0_62] : memref<198x128xf32, #tpu.memory_space<vmem>>, vector<1x128xf32>
    tpu.vector_store %arg13[%c107, %c0_62], %83 {strides = array<i32>} : memref<198x128xf32, #tpu.memory_space<vmem>>, vector<1x128xf32>,
    %c110 = arith.constant 110 : index
    %c0_63 = arith.constant 0 : index
    %85 = vector.load %arg13[%c110, %c0_63] : memref<198x128xf32, #tpu.memory_space<vmem>>, vector<1x128xf32>
    %c108 = arith.constant 108 : index
    %c0_64 = arith.constant 0 : index
    %86 = vector.load %arg13[%c108, %c0_64] : memref<198x128xf32, #tpu.memory_space<vmem>>, vector<1x128xf32>
    tpu.vector_store %arg13[%c108, %c0_64], %85 {strides = array<i32>} : memref<198x128xf32, #tpu.memory_space<vmem>>, vector<1x128xf32>,
    %c123 = arith.constant 123 : index
    %c0_65 = arith.constant 0 : index
    %87 = vector.load %arg13[%c123, %c0_65] : memref<198x128xf32, #tpu.memory_space<vmem>>, vector<1x128xf32>
    %c125 = arith.constant 125 : index
    %c0_66 = arith.constant 0 : index
    %88 = vector.load %arg13[%c125, %c0_66] : memref<198x128xf32, #tpu.memory_space<vmem>>, vector<1x128xf32>
    tpu.vector_store %arg13[%c125, %c0_66], %87 {strides = array<i32>} : memref<198x128xf32, #tpu.memory_space<vmem>>, vector<1x128xf32>,
    %c128 = arith.constant 128 : index
    %c0_67 = arith.constant 0 : index
    %89 = vector.load %arg13[%c128, %c0_67] : memref<198x128xf32, #tpu.memory_space<vmem>>, vector<1x128xf32>
    %c126 = arith.constant 126 : index
    %c0_68 = arith.constant 0 : index
    %90 = vector.load %arg13[%c126, %c0_68] : memref<198x128xf32, #tpu.memory_space<vmem>>, vector<1x128xf32>
    tpu.vector_store %arg13[%c126, %c0_68], %89 {strides = array<i32>} : memref<198x128xf32, #tpu.memory_space<vmem>>, vector<1x128xf32>,
    %c141 = arith.constant 141 : index
    %c0_69 = arith.constant 0 : index
    %91 = vector.load %arg13[%c141, %c0_69] : memref<198x128xf32, #tpu.memory_space<vmem>>, vector<1x128xf32>
    %c143 = arith.constant 143 : index
    %c0_70 = arith.constant 0 : index
    %92 = vector.load %arg13[%c143, %c0_70] : memref<198x128xf32, #tpu.memory_space<vmem>>, vector<1x128xf32>
    tpu.vector_store %arg13[%c143, %c0_70], %91 {strides = array<i32>} : memref<198x128xf32, #tpu.memory_space<vmem>>, vector<1x128xf32>,
    %c146 = arith.constant 146 : index
    %c0_71 = arith.constant 0 : index
    %93 = vector.load %arg13[%c146, %c0_71] : memref<198x128xf32, #tpu.memory_space<vmem>>, vector<1x128xf32>
    %c144 = arith.constant 144 : index
    %c0_72 = arith.constant 0 : index
    %94 = vector.load %arg13[%c144, %c0_72] : memref<198x128xf32, #tpu.memory_space<vmem>>, vector<1x128xf32>
    tpu.vector_store %arg13[%c144, %c0_72], %93 {strides = array<i32>} : memref<198x128xf32, #tpu.memory_space<vmem>>, vector<1x128xf32>,
    %c159 = arith.constant 159 : index
    %c0_73 = arith.constant 0 : index
    %95 = vector.load %arg13[%c159, %c0_73] : memref<198x128xf32, #tpu.memory_space<vmem>>, vector<1x128xf32>
    %c161 = arith.constant 161 : index
    %c0_74 = arith.constant 0 : index
    %96 = vector.load %arg13[%c161, %c0_74] : memref<198x128xf32, #tpu.memory_space<vmem>>, vector<1x128xf32>
    tpu.vector_store %arg13[%c161, %c0_74], %95 {strides = array<i32>} : memref<198x128xf32, #tpu.memory_space<vmem>>, vector<1x128xf32>,
    %c164 = arith.constant 164 : index
    %c0_75 = arith.constant 0 : index
    %97 = vector.load %arg13[%c164, %c0_75] : memref<198x128xf32, #tpu.memory_space<vmem>>, vector<1x128xf32>
    %c162 = arith.constant 162 : index
    %c0_76 = arith.constant 0 : index
    %98 = vector.load %arg13[%c162, %c0_76] : memref<198x128xf32, #tpu.memory_space<vmem>>, vector<1x128xf32>
    tpu.vector_store %arg13[%c162, %c0_76], %97 {strides = array<i32>} : memref<198x128xf32, #tpu.memory_space<vmem>>, vector<1x128xf32>,
    %c177 = arith.constant 177 : index
    %c0_77 = arith.constant 0 : index
    %99 = vector.load %arg13[%c177, %c0_77] : memref<198x128xf32, #tpu.memory_space<vmem>>, vector<1x128xf32>
    %c179 = arith.constant 179 : index
    %c0_78 = arith.constant 0 : index
    %100 = vector.load %arg13[%c179, %c0_78] : memref<198x128xf32, #tpu.memory_space<vmem>>, vector<1x128xf32>
    tpu.vector_store %arg13[%c179, %c0_78], %99 {strides = array<i32>} : memref<198x128xf32, #tpu.memory_space<vmem>>, vector<1x128xf32>,
    %c0_i32_79 = arith.constant 0 : i32
    %101 = arith.cmpi eq, %arg1, %c0_i32_79 : i32
    %102 = arith.extui %101 : i1 to i32
    %c0_i32_80 = arith.constant 0 : i32
    %103 = arith.cmpi ne, %102, %c0_i32_80 : i32
    scf.if %103 {
      %c36_118 = arith.constant 36 : index
      %c0_119 = arith.constant 0 : index
      %153 = vector.load %arg13[%c36_118, %c0_119] : memref<198x128xf32, #tpu.memory_space<vmem>>, vector<18x128xf32>
      %c0_120 = arith.constant 0 : index
      %c0_121 = arith.constant 0 : index
      %154 = vector.load %arg13[%c0_120, %c0_121] : memref<198x128xf32, #tpu.memory_space<vmem>>, vector<18x128xf32>
      tpu.vector_store %arg13[%c0_120, %c0_121], %153 {strides = array<i32>} : memref<198x128xf32, #tpu.memory_space<vmem>>, vector<18x128xf32>,
    } else {
    }
    %c1_i32 = arith.constant 1 : i32
    %104 = arith.cmpi eq, %arg1, %c1_i32 : i32
    %105 = arith.extui %104 : i1 to i32
    %c0_i32_81 = arith.constant 0 : i32
    %106 = arith.cmpi ne, %105, %c0_i32_81 : i32
    scf.if %106 {
      %c126_118 = arith.constant 126 : index
      %c0_119 = arith.constant 0 : index
      %153 = vector.load %arg13[%c126_118, %c0_119] : memref<198x128xf32, #tpu.memory_space<vmem>>, vector<18x128xf32>
      %c162_120 = arith.constant 162 : index
      %c0_121 = arith.constant 0 : index
      %154 = vector.load %arg13[%c162_120, %c0_121] : memref<198x128xf32, #tpu.memory_space<vmem>>, vector<18x128xf32>
      tpu.vector_store %arg13[%c162_120, %c0_121], %153 {strides = array<i32>} : memref<198x128xf32, #tpu.memory_space<vmem>>, vector<18x128xf32>,
    } else {
    }
    %c0_82 = arith.constant 0 : index
    %c0_83 = arith.constant 0 : index
    %107 = vector.load %arg13[%c0_82, %c0_83] : memref<198x128xf32, #tpu.memory_space<vmem>>, vector<144x128xf32>
    %c1 = arith.constant 1 : index
    %c0_84 = arith.constant 0 : index
    %108 = vector.load %arg13[%c1, %c0_84] : memref<198x128xf32, #tpu.memory_space<vmem>>, vector<144x128xf32>
    %c2_85 = arith.constant 2 : index
    %c0_86 = arith.constant 0 : index
    %109 = vector.load %arg13[%c2_85, %c0_86] : memref<198x128xf32, #tpu.memory_space<vmem>>, vector<144x128xf32>
    %c18_87 = arith.constant 18 : index
    %c0_88 = arith.constant 0 : index
    %110 = vector.load %arg13[%c18_87, %c0_88] : memref<198x128xf32, #tpu.memory_space<vmem>>, vector<144x128xf32>
    %c19 = arith.constant 19 : index
    %c0_89 = arith.constant 0 : index
    %111 = vector.load %arg13[%c19, %c0_89] : memref<198x128xf32, #tpu.memory_space<vmem>>, vector<144x128xf32>
    %c20_90 = arith.constant 20 : index
    %c0_91 = arith.constant 0 : index
    %112 = vector.load %arg13[%c20_90, %c0_91] : memref<198x128xf32, #tpu.memory_space<vmem>>, vector<144x128xf32>
    %c36_92 = arith.constant 36 : index
    %c0_93 = arith.constant 0 : index
    %113 = vector.load %arg13[%c36_92, %c0_93] : memref<198x128xf32, #tpu.memory_space<vmem>>, vector<144x128xf32>
    %c37 = arith.constant 37 : index
    %c0_94 = arith.constant 0 : index
    %114 = vector.load %arg13[%c37, %c0_94] : memref<198x128xf32, #tpu.memory_space<vmem>>, vector<144x128xf32>
    %c38_95 = arith.constant 38 : index
    %c0_96 = arith.constant 0 : index
    %115 = vector.load %arg13[%c38_95, %c0_96] : memref<198x128xf32, #tpu.memory_space<vmem>>, vector<144x128xf32>
    %116 = tpu.concatenate %107, %108, %109, %110, %111, %112, %113, %114, %115 in 1 : vector<144x128xf32>, vector<144x128xf32>, vector<144x128xf32>, vector<144x128xf32>, vector<144x128xf32>, vector<144x128xf32>, vector<144x128xf32>, vector<144x128xf32>, vector<144x128xf32> -> vector<144x1152xf32>
    %c0_97 = arith.constant 0 : index
    %c0_98 = arith.constant 0 : index
    %117 = vector.load %arg7[%c0_97, %c0_98] : memref<1152x128xf32, #tpu.memory_space<vmem>>, vector<1152x128xf32>
    %cst_99 = arith.constant dense<0.000000e+00> : vector<144x128xf32>
    %118 = tpu.matmul %116, %117, %cst_99 {dimension_numbers = #tpu.dot_dimension_numbers<[1], [0], [0], [1], [0, 0, 1, 1], [], []>} : vector<144x1152xf32>, vector<1152x128xf32>, vector<144x128xf32> -> vector<144x128xf32>
    %c0_100 = arith.constant 0 : index
    %c0_101 = arith.constant 0 : index
    %119 = vector.load %arg8[%c0_100, %c0_101] : memref<1x128xf32, #tpu.memory_space<vmem>>, vector<1x128xf32>
    %120 = vector.broadcast %119 : vector<1x128xf32> to vector<144x128xf32>
    %121 = arith.addf %118, %120 : vector<144x128xf32>
    %c0_102 = arith.constant 0 : index
    %c0_103 = arith.constant 0 : index
    %122 = vector.load %arg9[%c0_102, %c0_103] : memref<1x128xf32, #tpu.memory_space<vmem>>, vector<1x128xf32>
    %c0_104 = arith.constant 0 : index
    %c0_105 = arith.constant 0 : index
    %123 = vector.load %arg10[%c0_104, %c0_105] : memref<1x128xf32, #tpu.memory_space<vmem>>, vector<1x128xf32>
    %cst_106 = arith.constant dense<0.000000e+00> : vector<144xf32>
    %124 = vector.multi_reduction <add>, %121, %cst_106 [1] : vector<144x128xf32> to vector<144xf32>
    %125 = vector.shape_cast %124 : vector<144xf32> to vector<144x1xf32>
    %126 = arith.mulf %121, %121 : vector<144x128xf32>
    %cst_107 = arith.constant dense<0.000000e+00> : vector<144xf32>
    %127 = vector.multi_reduction <add>, %126, %cst_107 [1] : vector<144x128xf32> to vector<144xf32>
    %128 = vector.shape_cast %127 : vector<144xf32> to vector<144x1xf32>
    %cst_108 = arith.constant 2.500000e-01 : f32
    %129 = vector.broadcast %cst_108 : f32 to vector<144x1xf32>
    %130 = arith.mulf %125, %129 : vector<144x1xf32>
    %cst_109 = arith.constant 4.000000e+00 : f32
    %131 = vector.broadcast %cst_109 : f32 to vector<144x1xf32>
    %132 = arith.mulf %131, %130 : vector<144x1xf32>
    %133 = arith.mulf %132, %130 : vector<144x1xf32>
    %134 = arith.subf %128, %133 : vector<144x1xf32>
    %cst_110 = arith.constant 0.333333343 : f32
    %135 = vector.broadcast %cst_110 : f32 to vector<144x1xf32>
    %136 = arith.mulf %134, %135 : vector<144x1xf32>
    %137 = vector.broadcast %130 : vector<144x1xf32> to vector<144x128xf32>
    %138 = arith.subf %121, %137 : vector<144x128xf32>
    %cst_111 = arith.constant 1.000000e-03 : f32
    %139 = vector.broadcast %cst_111 : f32 to vector<144x1xf32>
    %140 = arith.addf %136, %139 : vector<144x1xf32>
    %141 = math.rsqrt %140 : vector<144x1xf32>
    %142 = vector.broadcast %141 : vector<144x1xf32> to vector<144x128xf32>
    %143 = arith.mulf %138, %142 : vector<144x128xf32>
    %144 = vector.broadcast %122 : vector<1x128xf32> to vector<144x128xf32>
    %145 = arith.mulf %143, %144 : vector<144x128xf32>
    %146 = vector.broadcast %123 : vector<1x128xf32> to vector<144x128xf32>
    %147 = arith.addf %145, %146 : vector<144x128xf32>
    %c45_112 = arith.constant 45 : index
    %c0_113 = arith.constant 0 : index
    %148 = vector.load %arg12[%c45_112, %c0_113] : memref<232x128xf32, #tpu.memory_space<vmem>>, vector<144x128xf32>
    %149 = arith.addf %147, %148 : vector<144x128xf32>
    %c0_114 = arith.constant 0 : index
    %c0_115 = arith.constant 0 : index
    %c0_116 = arith.constant 0 : index
    %c0_117 = arith.constant 0 : index
    %150 = vector.load %arg11[%c0_114, %c0_115, %c0_116, %c0_117] : memref<1x1x144x128xf32, #tpu.memory_space<vmem>>, vector<1x1x144x128xf32>
    %151 = vector.shape_cast %150 : vector<1x1x144x128xf32> to vector<144x128xf32>
    %152 = vector.shape_cast %149 : vector<144x128xf32> to vector<1x1x144x128xf32>
    tpu.vector_store %arg11[%c0_114, %c0_115, %c0_116, %c0_117], %152 {strides = array<i32>} : memref<1x1x144x128xf32, #tpu.memory_space<vmem>>, vector<1x1x144x128xf32>,
    return
  }
  func.func @transform_1(%arg0: i32, %arg1: i32) -> (i32, i32) {
    %c0_i32 = arith.constant 0 : i32
    %c0_i32_0 = arith.constant 0 : i32
    %c0_i32_1 = arith.constant 0 : i32
    return %c0_i32, %c0_i32_0 : i32, i32
  }
  func.func @transform_2(%arg0: i32, %arg1: i32) -> (i32, i32) {
    %c0_i32 = arith.constant 0 : i32
    %c0_i32_0 = arith.constant 0 : i32
    %c0_i32_1 = arith.constant 0 : i32
    return %c0_i32, %c0_i32_0 : i32, i32
  }
  func.func @transform_3(%arg0: i32, %arg1: i32) -> (i32, i32) {
    %c0_i32 = arith.constant 0 : i32
    %c0_i32_0 = arith.constant 0 : i32
    %c0_i32_1 = arith.constant 0 : i32
    return %c0_i32, %c0_i32_0 : i32, i32
  }
  func.func @transform_4(%arg0: i32, %arg1: i32) -> (i32, i32) {
    %c0_i32 = arith.constant 0 : i32
    %c0_i32_0 = arith.constant 0 : i32
    %c0_i32_1 = arith.constant 0 : i32
    return %c0_i32, %c0_i32_0 : i32, i32
  }
  func.func @transform_5(%arg0: i32, %arg1: i32) -> (i32, i32) {
    %c0_i32 = arith.constant 0 : i32
    %c0_i32_0 = arith.constant 0 : i32
    %c0_i32_1 = arith.constant 0 : i32
    return %c0_i32, %c0_i32_0 : i32, i32
  }
  func.func @transform_6(%arg0: i32, %arg1: i32) -> (i32, i32) {
    %c0_i32 = arith.constant 0 : i32
    %c0_i32_0 = arith.constant 0 : i32
    %c0_i32_1 = arith.constant 0 : i32
    return %c0_i32, %c0_i32_0 : i32, i32
  }
  func.func @transform_7(%arg0: i32, %arg1: i32) -> (i32, i32) {
    %c0_i32 = arith.constant 0 : i32
    %c0_i32_0 = arith.constant 0 : i32
    %c0_i32_1 = arith.constant 0 : i32
    return %c0_i32, %c0_i32_0 : i32, i32
  }
  func.func @transform_8(%arg0: i32, %arg1: i32) -> (i32, i32) {
    %c0_i32 = arith.constant 0 : i32
    %c0_i32_0 = arith.constant 0 : i32
    %c0_i32_1 = arith.constant 0 : i32
    return %c0_i32, %c0_i32_0 : i32, i32
  }
  func.func @transform_9(%arg0: i32, %arg1: i32) -> (i32, i32, i32, i32) {
    %c0_i32 = arith.constant 0 : i32
    %c0_i32_0 = arith.constant 0 : i32
    %c0_i32_1 = arith.constant 0 : i32
    return %arg0, %arg1, %c0_i32, %c0_i32_0 : i32, i32, i32, i32
  }
}

</mosaic_0001>

<bundles_post_ra>
// kernel: tpu_custom_call.1
= control target key start
LH: loop header
LB: loop body
LE: loop exit
PB: predicated region body
PF: predicated region fallthrough
CT: control target
= control target key end

     0   :  { %s5834_s0 = inlined_call_operand.hbm [shape: f32[2,360,128], index: 0, kind: input, shape index: {}]   ;;  %s5835_s1 = inlined_call_operand.hbm [shape: f32[1152,128], index: 1, kind: input, shape index: {}]   ;;  %s5836_s2 = inlined_call_operand.vmem [shape: f32[1,128], index: 2, kind: input, shape index: {}]   ;;  %s5837_s3 = inlined_call_operand.vmem [shape: f32[1,128], index: 3, kind: input, shape index: {}]   ;;  %s5838_s4 = inlined_call_operand.vmem [shape: f32[1,128], index: 4, kind: input, shape index: {}]   ;;  %s5839_s5 = inlined_call_operand.hbm [shape: f32[1152,128], index: 5, kind: input, shape index: {}]   ;;  %s5840_s6 = inlined_call_operand.vmem [shape: f32[1,128], index: 6, kind: input, shape index: {}]   ;;  %s5841_s7 = inlined_call_operand.vmem [shape: f32[1,128], index: 7, kind: input, shape index: {}]   ;;  %s5842_s8 = inlined_call_operand.vmem [shape: f32[1,128], index: 8, kind: input, shape index: {}]   ;;  %s5843_s9 = inlined_call_operand.hbm [shape: f32[2,2,144,128], index: 9, kind: output, shape index: {}]  }
   0x1   :  { %5853 = sst [smem:[#allocation96_spill]] %s5835_s1 }
   0x2   :  { %5854 = sst [smem:[#allocation97_spill]] %s5839_s5 }
   0x3   :  { %14 = vsyncpa [#allocation6], 0 }
   0x4   :  { %15 = vsyncpa [#allocation9], 0 }
   0x5   :  { %16 = vsyncpa [#allocation7], 0 }
   0x6   :  { %18 = vsyncpa [#allocation7 + $0x1], 0  ;;  %s4184_s30 = smov 0   ;;  %s4186_s10 = smov 0  }
   0x7   :  { %s4188_s11 = smov 0   ;;  %s4190_s12 = smov 0  }
   0x8   :  { %s4192_s13 = smov 0   ;;  %s4194_s14 = smov 0  }
   0x9   :  { %s4196_s15 = smov 0   ;;  %s4198_s16 = smov 0  }
   0xa LB: > { %5855 = sst [smem:[#allocation19_spill]] %s4096_s30  ;;  %s3683_s17 = sadd.s32 4294967295, %s4124_s16   ;;  %s4124_s16 = sphi %s4198_s16, %s24_s16   ;;  %s4120_s15 = sphi %s4196_s15, %s6015_s15   ;;  %s4116_s14 = sphi %s4194_s14, %s6019_s14   ;;  %s4112_s13 = sphi %s4192_s13, %s6013_s13   ;;  %s4108_s12 = sphi %s4190_s12, %s6012_s12   ;;  %s4104_s11 = sphi %s4188_s11, %s6018_s11   ;;  %s4100_s10 = sphi %s4186_s10, %s6017_s10   ;;  %s4096_s30 = sphi %s4184_s30, %s6016_s30  }
   0xb   : > { %5856 = sst [smem:[#allocation20_spill]] %s4116_s14  ;;  %s3684_s18 = sadd.s32 4294967294, %s4124_s16  }
   0xc   : > { %5857 = sst [smem:[#allocation21_spill]] %s4120_s15  ;;  %s33_s19 = sadd.s32 1, %s4116_s14 }
   0xd   : > { %5858 = sst [smem:[#allocation22_spill]] %s4124_s16  ;;  %s36_s20 = sadd.s32 1, %s4120_s15 }
   0xe   : > { %p34_p0 = scmp.ge.s32.totalorder %s33_s19, 2  ;;  %s213_s21 = sadd.s32 1, %s4104_s11 }
   0xf   : > { %p223_p1 = scmp.ne.s32.totalorder %s4104_s11, %s4100_s10  ;;  %p224_p2 = scmp.eq.s32.totalorder %s3683_s17, 3 }
  0x10   : > { %s6021_s19 = smov (%p34_p0, %s33_s19), 0  ;;  %s6023_s20 = smov (!%p34_p0, %s36_s20), %s4120_s15 }
  0x11   : > { %5859 = sst [smem:[#allocation23_spill]] %s6021_s19  ;;  %s209_s22 = ssub.s32 %s4116_s14, %s6021_s19 }
  0x12   : > { %p4236_p3 = por %p224_p2, %p223_p1  ;;  %p38_p4 = scmp.ge.s32.totalorder %s6023_s20, 2 }
  0x13   : > { %p229_p5 = scmp.ne.s32.totalorder %s4100_s10, %s4096_s30  ;;  %p230_p6 = scmp.eq.s32.totalorder %s3684_s18, 3 }
  0x14   : > { %p3685_p7 = scmp.ge.s32.totalorder %s4124_s16, 1  ;;  %s6025_s20 = smov (%p38_p4, %s6023_s20), 0 }
  0x15   : > { %5861 = sst [smem:[#allocation24_spill]] %s6025_s20  ;;  %p4245_p8 = por %p230_p6, %p229_p5 }
  0x16   : > { %p237_p9 = scmp.lt.s32.totalorder %s4124_s16, 5  ;;  %s208_s25 = ssub.s32 %s4120_s15, %s6025_s20 }
  0x17   : > { %s5862_s24 = scalar_select %p4245_p8, 1, 0 }
  0x18   : > { %s210_s26 = sor.u32 %s209_s22, %s208_s25  ;;  %p4252_p10 = pnand %p3685_p7, %p237_p9 }
  0x19   : > { %5863 = sst [smem:[#allocation25_spill]] %s5862_s24  ;;  %p211_p11 = scmp.eq.s32.totalorder %s210_s26, 0 }
  0x1a   : > { %p4256_p12 = scmp.eq.s32.totalorder %s3683_s17, 0  ;;  %p3758_p13 = pneg %p4252_p10 }
  0x1b   : > { %s5866_s1 = sld [smem:[#allocation96_spill]]  ;;  %s4126_s22 = smov [#allocation5]  }
  0x1c   : > { %s4266_s14 = scalar_select %p211_p11, %s4104_s11, %s213_s21  }
  0x1d   : > { %s250_s25 = sshll.u32 %s4126_s22, 4  ;;  %p3759_p0 = pnand %p4256_p12, %p3758_p13  ;;  %s251_s25 = int_to_ptr.vmem [resolvable:$true] %s250_s25 }
  0x1e   : > { %s4127_s26 = smov 128   ;;  %s4128_s17 = smov 8  }
  0x1f   : > { %s5867_s5 = sld [smem:[#allocation97_spill]]  ;;  %s4129_s30 = smov [#allocation8]  }
  0x20   : > { %s273_s16 = sshll.u32 %s4129_s30, 4  ;;  %s274_s16 = int_to_ptr.vmem [resolvable:$true] %s273_s16 }
  0x21   : > { %s248_s19 = sshll.u32 %s5866_s1, 4  ;;  %s249_s19 = int_to_ptr.hbm [resolvable:$true] %s248_s19 }
  0x22   : > { %3761 = dma.hbm_to_vmem [thread:$0]  (!%p3759_p0), %s249_s19, 18432, %s251_s25, [#allocation6], %s4127_s26, %s4127_s26, %s4128_s17  }
  0x23   : > { %298 = sbr.rel (%p4252_p10) target bundleno = 1731 (0x6c3), region = 52 }
  0x25   : > { %s271_s24 = sshll.u32 %s5867_s5, 4  ;;  %s272_s24 = int_to_ptr.hbm [resolvable:$true] %s271_s24 }
  0x26   : > { %3764 = dma.hbm_to_vmem [thread:$0]  (!%p3759_p0), %s272_s24, 18432, %s274_s16, [#allocation9], %s4127_s26, %s4127_s26, %s4128_s17  }
  0x28   : > { %4081 = dma.done.wait (%p4256_p12), [#allocation6], 18432  }
  0x29   : > { %4083 = vsyncadd (%p4256_p12), [#allocation6], 4294948864 }
  0x2a   : > { %4085 = dma.done.wait (%p4256_p12), [#allocation9], 18432  }
  0x2b   : > { %4087 = vsyncadd (%p4256_p12), [#allocation9], 4294948864  ;;  %s5852_s30 = sand.u32 1, %s4100_s10   ;;  %s338_s15 = smul.u32 144, %s4108_s12  ;;  %v4130_v0 = vmov 0.0  }
  0x2c   : > { %s3745_s16 = smul.u32 144, %s5852_s30  ;;  %333 = vst [vmem:[#allocation2] sm:$0xff] %v4130_v0  ;;  %s4131_s20 = smov [#allocation2 + $0x8]  }
  0x2d   : > { %334 = vst [vmem:[#allocation2 + $0xe0] sm:$0xff] %v4130_v0  ;;  %s339_s19 = smul.u32 360, %s4112_s13  ;;  %s352_s21 = sshll.u32 %s4131_s20, 4  ;;  %s353_s21 = int_to_ptr.vmem [resolvable:$true] %s352_s21 }
  0x2e   : > { %335 = vst [vmem:[#allocation3 + $0xb4] sm:$0xff] %v4130_v0  ;;  %s4000_s30 = scalar_lea.hbm %s5834_s0, 720 }
  0x2f   : > { %s340_s24 = sadd.s32 %s339_s19, %s338_s15 }
  0x30   : > { %s341_s28 = scalar_lea.hbm %s5834_s0, %s340_s24 }
  0x31   : > { %s350_s18 = sshll.u32 %s341_s28, 4  ;;  %s351_s18 = int_to_ptr.hbm [resolvable:$true] %s350_s18 }
  0x32   : > { %s3996_s22 = sshra.s32 %s351_s18, 4  ;;  %s3997_s22 = int_to_ptr.hbm [resolvable:$true] %s3996_s22 }
  0x33   : > { %s3998_s25 = scalar_lea.hbm %s3997_s22, 216  ;;  %p4001_p2 = scmp.lt.s32.totalorder %s3997_s22, %s5834_s0 }
  0x34   : > { %p3999_p1 = scmp.ne.s32.totalorder %s3997_s22, %s3998_s25  ;;  %p4002_p4 = scmp.lt.s32.totalorder %s4000_s30, %s3998_s25 }
  0x36   : > { %p4003_p5 = por %p4002_p4, %p4001_p2 }
  0x38   : > { %p4004_p6 = pnand %p4003_p5, %p3999_p1 }
  0x3a   : > { %4007 = shalt.err (!%p4004_p6)  }
  0x3b   : > { %355 = dma.hbm_to_vmem [thread:$0]  %s351_s18, 3456, %s353_s21, [#allocation4] }
  0x3c   : > { %s4297_s15 = scalar_lea.vmem [#allocation10], %s3745_s16 }
  0x3d   : > { %4088 = dma.done.wait [#allocation4], 3456 }
  0x3e   : > { %4089 = vsyncadd [#allocation4], 4294963840  ;;  %v541_v1 = vld [vmem:[#allocation5 + $0x78] sm:$0xff]  ;;  %v540_v3 = vld [vmem:[#allocation5 + $0x70] sm:$0xff]  ;;  %vm1494_vm12 = vcmask 1043456   ;;  %p3691_p7 = scmp.ne.s32.totalorder %s4108_s12, 0 }
  0x3f   : > { %v557_v2 = vld [vmem:[#allocation5 + $0xf8] sm:$0xff]  ;;  %674 = vmatpush.msra.mxu0 %v541_v1  ;;  %v556_v4 = vld [vmem:[#allocation5 + $0xf0] sm:$0xff]  ;;  %v539_v5 = vld [vmem:[#allocation5 + $0x68] sm:$0xff] }
  0x40   : > { %3697 = vmatpush.msra.mxu3 %v557_v2  ;;  %760 = vmatpush.msra.mxu1 %v557_v2  ;;  %v555_v6 = vld [vmem:[#allocation5 + $0xe8] sm:$0xff]  ;;  %v538_v7 = vld [vmem:[#allocation5 + $0x60] sm:$0xff]  ;;  %v537_v9 = vld [vmem:[#allocation5 + $0x58] sm:$0xff] }
  0x41   : > { %675 = vmatpush.msra.mxu0 %v540_v3  ;;  %v554_v8 = vld [vmem:[#allocation5 + $0xe0] sm:$0xff]  ;;  %v553_v10 = vld [vmem:[#allocation5 + $0xd8] sm:$0xff]  ;;  %v536_v11 = vld [vmem:[#allocation5 + $0x50] sm:$0xff] }
  0x42   : > { %3698 = vmatpush.msra.mxu3 %v556_v4  ;;  %761 = vmatpush.msra.mxu1 %v556_v4  ;;  %v552_v12 = vld [vmem:[#allocation5 + $0xd0] sm:$0xff]  ;;  %v535_v13 = vld [vmem:[#allocation5 + $0x48] sm:$0xff]  ;;  %v4299_v15 = vld [vmem:[#allocation5 + $0x178] sm:$0xff] }
  0x43   : > { %676 = vmatpush.msra.mxu0 %v539_v5  ;;  %v551_v14 = vld [vmem:[#allocation5 + $0xc8] sm:$0xff]  ;;  %v4301_v16 = vld [vmem:[#allocation5 + $0x170] sm:$0xff]  ;;  %v534_v17 = vld [vmem:[#allocation5 + $0x40] sm:$0xff]  ;;  %3713 = vmatpush.msra.mxu2 %v4299_v15 }
  0x44   : > { %3699 = vmatpush.msra.mxu3 %v555_v6  ;;  %762 = vmatpush.msra.mxu1 %v555_v6  ;;  %v550_v18 = vld [vmem:[#allocation5 + $0xc0] sm:$0xff]  ;;  %v4304_v19 = vld [vmem:[#allocation5 + $0x168] sm:$0xff]  ;;  %v533_v20 = vld [vmem:[#allocation5 + $0x38] sm:$0xff] }
  0x45   : > { %677 = vmatpush.msra.mxu0 %v538_v7  ;;  %v549_v21 = vld [vmem:[#allocation5 + $0xb8] sm:$0xff]  ;;  %3715 = vmatpush.msra.mxu2 %v4301_v16  ;;  %v4307_v22 = vld [vmem:[#allocation5 + $0x160] sm:$0xff]  ;;  %v532_v23 = vld [vmem:[#allocation5 + $0x30] sm:$0xff] }
  0x46   : > { %3700 = vmatpush.msra.mxu3 %v554_v8  ;;  %763 = vmatpush.msra.mxu1 %v554_v8  ;;  %v548_v24 = vld [vmem:[#allocation5 + $0xb0] sm:$0xff]  ;;  %v4310_v25 = vld [vmem:[#allocation5 + $0x158] sm:$0xff]  ;;  %v531_v26 = vld [vmem:[#allocation5 + $0x28] sm:$0xff] }
  0x47   : > { %678 = vmatpush.msra.mxu0 %v537_v9  ;;  %3717 = vmatpush.msra.mxu2 %v4304_v19  ;;  %v547_v27 = vld [vmem:[#allocation5 + $0xa8] sm:$0xff]  ;;  %v4313_v28 = vld [vmem:[#allocation5 + $0x150] sm:$0xff]  ;;  %v530_v29 = vld [vmem:[#allocation5 + $0x20] sm:$0xff] }
  0x48   : > { %3701 = vmatpush.msra.mxu3 %v553_v10  ;;  %764 = vmatpush.msra.mxu1 %v553_v10  ;;  %v546_v30 = vld [vmem:[#allocation5 + $0xa0] sm:$0xff]  ;;  %v4316_v31 = vld [vmem:[#allocation5 + $0x148] sm:$0xff]  ;;  %v529_v32 = vld [vmem:[#allocation5 + $0x18] sm:$0xff] }
  0x49   : > { %679 = vmatpush.msra.mxu0 %v536_v11  ;;  %3719 = vmatpush.msra.mxu2 %v4307_v22  ;;  %v545_v33 = vld [vmem:[#allocation5 + $0x98] sm:$0xff]  ;;  %v4319_v34 = vld [vmem:[#allocation5 + $0x140] sm:$0xff]  ;;  %v528_v35 = vld [vmem:[#allocation5 + $0x10] sm:$0xff] }
  0x4a   : > { %3702 = vmatpush.msra.mxu3 %v552_v12  ;;  %765 = vmatpush.msra.mxu1 %v552_v12  ;;  %v544_v36 = vld [vmem:[#allocation5 + $0x90] sm:$0xff]  ;;  %v4322_v37 = vld [vmem:[#allocation5 + $0x138] sm:$0xff]  ;;  %v527_v38 = vld [vmem:[#allocation5 + $0x8] sm:$0xff] }
  0x4b   : > { %680 = vmatpush.msra.mxu0 %v535_v13  ;;  %3721 = vmatpush.msra.mxu2 %v4310_v25  ;;  %v543_v39 = vld [vmem:[#allocation5 + $0x88] sm:$0xff]  ;;  %v4325_v40 = vld [vmem:[#allocation5 + $0x130] sm:$0xff]  ;;  %v526_v41 = vld [vmem:[#allocation5] sm:$0xff] }
  0x4c   : > { %3703 = vmatpush.msra.mxu3 %v551_v14  ;;  %766 = vmatpush.msra.mxu1 %v551_v14  ;;  %v542_v42 = vld [vmem:[#allocation5 + $0x80] sm:$0xff]  ;;  %v359_v43 = vld [vmem:[#allocation2 + $0x7] sm:$0xff]  ;;  %v563_v46 = vld [vmem:[#allocation5 + $0x128] sm:$0xff] }
  0x4d   : > { %681 = vmatpush.msra.mxu0 %v534_v17  ;;  %3723 = vmatpush.msra.mxu2 %v4313_v28  ;;  %v398_v44 = vld [vmem:[#allocation2 + $0x88] sm:$0xff]  ;;  %v562_v47 = vld [vmem:[#allocation5 + $0x120] sm:$0xff]  ;;  %v560_v51 = vld [vmem:[#allocation5 + $0x110] sm:$0xff] }
  0x4e   : > { %3704 = vmatpush.msra.mxu3 %v550_v18  ;;  %767 = vmatpush.msra.mxu1 %v550_v18  ;;  %v382_v45 = vld [vmem:[#allocation2 + $0x8] sm:$0xff]  ;;  %v399_v50 = vld [vmem:[#allocation2 + $0x90] sm:$0xff]  ;;  %v559_v53 = vld [vmem:[#allocation5 + $0x108] sm:$0xff] }
  0x4f   : > { %682 = vmatpush.msra.mxu0 %v533_v20  ;;  %3725 = vmatpush.msra.mxu2 %v4316_v31  ;;  %v561_v48 = vld [vmem:[#allocation5 + $0x118] sm:$0xff]  ;;  %v383_v52 = vld [vmem:[#allocation2 + $0x10] sm:$0xff]  ;;  %v400_v57 = vld [vmem:[#allocation2 + $0x98] sm:$0xff] }
  0x50   : > { %3705 = vmatpush.msra.mxu3 %v549_v21  ;;  %768 = vmatpush.msra.mxu1 %v549_v21  ;;  %v360_v49 = vld [vmem:[#allocation2 + $0xf] sm:$0xff]  ;;  %v361_v56 = vld [vmem:[#allocation2 + $0x17] sm:$0xff]  ;;  %v362_v60 = vld [vmem:[#allocation2 + $0x1f] sm:$0xff] }
  0x51   : > { %683 = vmatpush.msra.mxu0 %v532_v23  ;;  %3727 = vmatpush.msra.mxu2 %v4319_v34  ;;  %v558_v54 = vld [vmem:[#allocation5 + $0x100] sm:$0xff]  ;;  %v384_v58 = vld [vmem:[#allocation2 + $0x18] sm:$0xff]  ;;  %v401_v61 = vld [vmem:[#allocation2 + $0xa0] sm:$0xff] }
  0x52   : > { %3706 = vmatpush.msra.mxu3 %v548_v24  ;;  %769 = vmatpush.msra.mxu1 %v548_v24  ;;  %v4339_v55 = vld [vmem:[#allocation2 + $0x29] sm:$0xff]  ;;  %v4349_v59 = vld [vmem:[#allocation2 + $0x31] sm:$0xff]  ;;  %v385_v62 = vld [vmem:[#allocation2 + $0x20] sm:$0xff] }
  0x53   : > { %684 = vmatpush.msra.mxu0 %v531_v26  ;;  %3729 = vmatpush.msra.mxu2 %v4322_v37  ;;  %v4355_v63 = vld [vmem:[#allocation2 + $0x39] sm:$0xff]  ;;  %v363_v0 = vld [vmem:[#allocation2 + $0x27] sm:$0xff]  ;;  %v364_v7 = vld [vmem:[#allocation2 + $0x2f] sm:$0xff] }
  0x54   : > { %3707 = vmatpush.msra.mxu3 %v547_v27  ;;  %770 = vmatpush.msra.mxu1 %v547_v27  ;;  %v402_v1 = vld [vmem:[#allocation2 + $0xa8] sm:$0xff]  ;;  %v588_v4 = vld [vmem:[#allocation5 + $0x1f0] sm:$0xff]  ;;  %v587_v5 = vld [vmem:[#allocation5 + $0x1e8] sm:$0xff] }
  0x55   : > { %685 = vmatpush.msra.mxu0 %v530_v29  ;;  %3731 = vmatpush.msra.mxu2 %v4325_v40  ;;  %v386_v2 = vld [vmem:[#allocation2 + $0x28] sm:$0xff]  ;;  %v403_v8 = vld [vmem:[#allocation2 + $0xb0] sm:$0xff]  ;;  %v584_v12 = vld [vmem:[#allocation5 + $0x1d0] sm:$0xff] }
  0x56   : > { %3708 = vmatpush.msra.mxu3 %v546_v30  ;;  %771 = vmatpush.msra.mxu1 %v546_v30  ;;  %v589_v3 = vld [vmem:[#allocation5 + $0x1f8] sm:$0xff]  ;;  %v586_v9 = vld [vmem:[#allocation5 + $0x1e0] sm:$0xff]  ;;  %v583_v14 = vld [vmem:[#allocation5 + $0x1c8] sm:$0xff] }
  0x57   : > { %686 = vmatpush.msra.mxu0 %v529_v32  ;;  %3733 = vmatpush.msra.mxu2 %v563_v46  ;;  %v4358_v6 = vld [vmem:[#allocation2 + $0x41] sm:$0xff]  ;;  %v387_v10 = vld [vmem:[#allocation2 + $0x30] sm:$0xff]  ;;  %v388_v18 = vld [vmem:[#allocation2 + $0x38] sm:$0xff] }
  0x58   : > { %3709 = vmatpush.msra.mxu3 %v545_v33  ;;  %772 = vmatpush.msra.mxu1 %v545_v33  ;;  %v585_v11 = vld [vmem:[#allocation5 + $0x1d8] sm:$0xff]  ;;  %v582_v17 = vld [vmem:[#allocation5 + $0x1c0] sm:$0xff]  ;;  %v580_v20 = vld [vmem:[#allocation5 + $0x1b0] sm:$0xff] }
  0x59   : > { %687 = vmatpush.msra.mxu0 %v528_v35  ;;  %3735 = vmatpush.msra.mxu2 %v562_v47  ;;  %v4361_v13 = vld [vmem:[#allocation2 + $0x49] sm:$0xff]  ;;  %v4364_v21 = vld [vmem:[#allocation2 + $0x51] sm:$0xff]  ;;  %v366_v23 = vld [vmem:[#allocation2 + $0x3f] sm:$0xff] }
  0x5a   : > { %3710 = vmatpush.msra.mxu3 %v544_v36  ;;  %773 = vmatpush.msra.mxu1 %v544_v36  ;;  %v4366_v24 = vld [vmem:[#allocation2 + $0xa9] sm:$0xff]  ;;  %v389_v26 = vld [vmem:[#allocation2 + $0x40] sm:$0xff]  ;;  %v575_v30 = vld [vmem:[#allocation5 + $0x188] sm:$0xff] }
  0x5b   : > { %688 = vmatpush.msra.mxu0 %v527_v38  ;;  %3737 = vmatpush.msra.mxu2 %v561_v48  ;;  %v577_v27 = vld [vmem:[#allocation5 + $0x198] sm:$0xff]  ;;  %v4370_v29 = vld [vmem:[#allocation2 + $0x59] sm:$0xff]  ;;  %v4372_v32 = vld [vmem:[#allocation2 + $0xb1] sm:$0xff] }
  0x5c   : > { %3711 = vmatpush.msra.mxu3 %v543_v39  ;;  %774 = vmatpush.msra.mxu1 %v543_v39  ;;  %v574_v33 = vld [vmem:[#allocation5 + $0x180] sm:$0xff]  ;;  %v4376_v35 = vld [vmem:[#allocation2 + $0x61] sm:$0xff] }
  0x5d   : > { %689 = vmatpush.msra.mxu0 %v526_v41  ;;  %3739 = vmatpush.msra.mxu2 %v560_v51  ;;  %v368_v36 = vld [vmem:[#allocation2 + $0x4f] sm:$0xff]  ;;  %v4381_v41 = vld [vmem:[#allocation2 + $0x19] sm:$0xff] }
  0x5e   : > { %3712 = vmatpush.msra.mxu3 %v542_v42  ;;  %690 = vmatmul.f32.vlgmr.msra.gmra.mxu0 %v359_v43  ;;  %v391_v38 = vld [vmem:[#allocation2 + $0x50] sm:$0xff] }
  0x5f   : > { %824 = vmatmul.f32.vlgmr.msra.gmra.mxu3 %v398_v44  ;;  %846 = vmatpush.msrb.mxu0 %v4299_v15  ;;  %v4379_v39 = vld [vmem:[#allocation2 + $0x69] sm:$0xff]  ;;  %v4385_v43 = vld [vmem:[#allocation2 + $0x71] sm:$0xff]  ;;  %v370_v44 = vld [vmem:[#allocation2 + $0x5f] sm:$0xff] }
  0x60   : > { %775 = vmatpush.msra.mxu1 %v542_v42  ;;  %3714 = vmatpush.msrb.mxu3 %v4299_v15  ;;  %v365_v15 = vld [vmem:[#allocation2 + $0x37] sm:$0xff] }
  0x61   : > { %776 = vmatmul.f32.vlgmr.msra.gmra.mxu1 %v382_v45  ;;  %847 = vmatpush.msrb.mxu0 %v4301_v16  ;;  %v392_v42 = vld [vmem:[#allocation2 + $0x58] sm:$0xff]  ;;  %v4387_v45 = vld [vmem:[#allocation2 + $0x21] sm:$0xff] }
  0x62   : > { %3716 = vmatpush.msrb.mxu3 %v4301_v16  ;;  %3741 = vmatpush.msra.mxu2 %v559_v53  ;;  %v404_v16 = vld [vmem:[#allocation2 + $0xb8] sm:$0xf] }
  0x63   : > { %848 = vmatpush.msrb.mxu0 %v4304_v19 }
  0x64   : > { %3718 = vmatpush.msrb.mxu3 %v4304_v19  ;;  %3743 = vmatpush.msra.mxu2 %v558_v54  ;;  %v581_v19 = vld [vmem:[#allocation5 + $0x1b8] sm:$0xff] }
  0x65   : > { %849 = vmatpush.msrb.mxu0 %v4307_v22  ;;  %874 = vmatmul.f32.vlgmr.msra.gmra.mxu2 %v4339_v55 }
  0x66   : > { %693 = vmatmul.f32.gmra.mxu0 %v360_v49  ;;  %3720 = vmatpush.msrb.mxu3 %v4307_v22  ;;  %v579_v22 = vld [vmem:[#allocation5 + $0x1a8] sm:$0xff]  ;;  %v394_v49 = vld [vmem:[#allocation2 + $0x68] sm:$0xff] }
  0x67   : > { %827 = vmatmul.f32.gmra.mxu3 %v399_v50  ;;  %850 = vmatpush.msrb.mxu0 %v4310_v25  ;;  %v4395_v50 = vld [vmem:[#allocation2 + $0x81] sm:$0xff] }
  0x68   : > { %3722 = vmatpush.msrb.mxu3 %v4310_v25  ;;  %v578_v25 = vld [vmem:[#allocation5 + $0x1a0] sm:$0xff] }
  0x69   : > { %779 = vmatmul.f32.gmra.mxu1 %v383_v52  ;;  %851 = vmatpush.msrb.mxu0 %v4313_v28  ;;  %v395_v52 = vld [vmem:[#allocation2 + $0x70] sm:$0xff] }
  0x6a   : > { %3724 = vmatpush.msrb.mxu3 %v4313_v28  ;;  %v576_v28 = vld [vmem:[#allocation5 + $0x190] sm:$0xff] }
  0x6b   : > { %852 = vmatpush.msrb.mxu0 %v4316_v31 }
  0x6c   : > { %3726 = vmatpush.msrb.mxu3 %v4316_v31  ;;  %v367_v31 = vld [vmem:[#allocation2 + $0x47] sm:$0xff] }
  0x6d   : > { %853 = vmatpush.msrb.mxu0 %v4319_v34  ;;  %877 = vmatmul.f32.gmra.mxu2 %v4349_v59 }
  0x6e   : > { %696 = vmatmul.f32.gmra.mxu0 %v361_v56  ;;  %3728 = vmatpush.msrb.mxu3 %v4319_v34  ;;  %v390_v34 = vld [vmem:[#allocation2 + $0x48] sm:$0xff]  ;;  %v396_v56 = vld [vmem:[#allocation2 + $0x78] sm:$0xff] }
  0x6f   : > { %830 = vmatmul.f32.gmra.mxu3 %v400_v57  ;;  %854 = vmatpush.msrb.mxu0 %v4322_v37  ;;  %v374_v57 = vld [vmem:[#allocation2 + $0x7f] sm:$0xff] }
  0x70   : > { %3730 = vmatpush.msrb.mxu3 %v4322_v37  ;;  %v427_v37 = vld [vmem:[#allocation2 + $0xb9] sm:$0xf] }
  0x71   : > { %782 = vmatmul.f32.gmra.mxu1 %v384_v58  ;;  %855 = vmatpush.msrb.mxu0 %v4325_v40  ;;  %v397_v58 = vld [vmem:[#allocation2 + $0x80] sm:$0xff] }
  0x72   : > { %3732 = vmatpush.msrb.mxu3 %v4325_v40  ;;  %v369_v40 = vld [vmem:[#allocation2 + $0x57] sm:$0xff] }
  0x73   : > { %856 = vmatpush.msrb.mxu0 %v563_v46 }
  0x74   : > { %3734 = vmatpush.msrb.mxu3 %v563_v46  ;;  %v393_v46 = vld [vmem:[#allocation2 + $0x60] sm:$0xff] }
  0x75   : > { %857 = vmatpush.msrb.mxu0 %v562_v47  ;;  %880 = vmatmul.f32.gmra.mxu2 %v4355_v63 }
  0x76   : > { %699 = vmatmul.f32.gmra.mxu0 %v362_v60  ;;  %3736 = vmatpush.msrb.mxu3 %v562_v47  ;;  %v4391_v47 = vld [vmem:[#allocation2 + $0x79] sm:$0xff] }
  0x77   : > { %833 = vmatmul.f32.gmra.mxu3 %v401_v61  ;;  %858 = vmatpush.msrb.mxu0 %v561_v48  ;;  %v375_v61 = vld [vmem:[#allocation2 + $0x87] sm:$0xff] }
  0x78   : > { %3738 = vmatpush.msrb.mxu3 %v561_v48  ;;  %v371_v48 = vld [vmem:[#allocation2 + $0x67] sm:$0xff] }
  0x79   : > { %785 = vmatmul.f32.gmra.mxu1 %v385_v62  ;;  %859 = vmatpush.msrb.mxu0 %v560_v51 }
  0x7a   : > { %3740 = vmatpush.msrb.mxu3 %v560_v51  ;;  %v372_v51 = vld [vmem:[#allocation2 + $0x6f] sm:$0xff] }
  0x7b   : > { %860 = vmatpush.msrb.mxu0 %v559_v53 }
  0x7c   : > { %3742 = vmatpush.msrb.mxu3 %v559_v53  ;;  %v4399_v53 = vld [vmem:[#allocation2 + $0x89] sm:$0xff] }
  0x7d   : > { %861 = vmatpush.msrb.mxu0 %v558_v54  ;;  %883 = vmatmul.f32.gmra.mxu2 %v4358_v6 }
  0x7e   : > { %702 = vmatmul.f32.gmra.mxu0 %v363_v0  ;;  %3744 = vmatpush.msrb.mxu3 %v558_v54  ;;  %v373_v54 = vld [vmem:[#allocation2 + $0x77] sm:$0xff] }
  0x7f   : > { %836 = vmatmul.f32.gmra.mxu3 %v402_v1  ;;  %v376_v1 = vld [vmem:[#allocation2 + $0x8f] sm:$0xff] }
  0x80   : > { %932 = vmatpush.msra.mxu3 %v589_v3 }
  0x81   : > { %788 = vmatmul.f32.gmra.mxu1 %v386_v2 }
  0x82   : > { %933 = vmatpush.msra.mxu3 %v588_v4  ;;  %v377_v4 = vld [vmem:[#allocation2 + $0x97] sm:$0xff] }
  0x84   : > { %934 = vmatpush.msra.mxu3 %v587_v5 }
  0x85   : > { %886 = vmatmul.f32.gmra.mxu2 %v4361_v13 }
  0x86   : > { %705 = vmatmul.f32.gmra.mxu0 %v364_v7  ;;  %935 = vmatpush.msra.mxu3 %v586_v9  ;;  %v378_v7 = vld [vmem:[#allocation2 + $0x9f] sm:$0xff]  ;;  %v605_v9 = vld [vmem:[#allocation5 + $0x278] sm:$0xff] }
  0x87   : > { %839 = vmatmul.f32.gmra.mxu3 %v403_v8  ;;  %v637_v8 = vld [vmem:[#allocation5 + $0x378] sm:$0xff]  ;;  %1018 = vmatpush.msra.mxu0 %v605_v9  ;;  %v624_v9 = vld [vmem:[#allocation5 + $0x310] sm:$0xff] }
  0x88   : > { %936 = vmatpush.msra.mxu3 %v585_v11  ;;  %1190 = vmatpush.msrb.mxu2 %v637_v8  ;;  %v604_v11 = vld [vmem:[#allocation5 + $0x270] sm:$0xff]  ;;  %v610_v8 = vld [vmem:[#allocation5 + $0x2a0] sm:$0xff] }
  0x89   : > { %791 = vmatmul.f32.gmra.mxu1 %v387_v10  ;;  %v636_v10 = vld [vmem:[#allocation5 + $0x370] sm:$0xff]  ;;  %1019 = vmatpush.msra.mxu0 %v604_v11  ;;  %v609_v11 = vld [vmem:[#allocation5 + $0x298] sm:$0xff] }
  0x8a   : > { %937 = vmatpush.msra.mxu3 %v584_v12  ;;  %1191 = vmatpush.msrb.mxu2 %v636_v10  ;;  %v621_v12 = vld [vmem:[#allocation5 + $0x2f8] sm:$0xff]  ;;  %v592_v10 = vld [vmem:[#allocation5 + $0x210] sm:$0xff] }
  0x8b   : > { %1104 = vmatpush.msrb.mxu1 %v621_v12 }
  0x8c   : > { %938 = vmatpush.msra.mxu3 %v583_v14 }
  0x8d   : > { %889 = vmatmul.f32.gmra.mxu2 %v4364_v21 }
  0x8e   : > { %708 = vmatmul.f32.gmra.mxu0 %v365_v15  ;;  %939 = vmatpush.msra.mxu3 %v582_v17  ;;  %v603_v15 = vld [vmem:[#allocation5 + $0x268] sm:$0xff]  ;;  %v634_v17 = vld [vmem:[#allocation5 + $0x360] sm:$0xff] }
  0x8f   : > { %842 = vmatmul.f32.gmra.mxu3 %v404_v16  ;;  %v620_v16 = vld [vmem:[#allocation5 + $0x2f0] sm:$0xff]  ;;  %1020 = vmatpush.msra.mxu0 %v603_v15  ;;  %v591_v15 = vld [vmem:[#allocation5 + $0x208] sm:$0xff] }
  0x90   : > { %940 = vmatpush.msra.mxu3 %v581_v19  ;;  %v379_v19 = vld [vmem:[#allocation2 + $0xa7] sm:$0xff]  ;;  %1105 = vmatpush.msrb.mxu1 %v620_v16 }
  0x91   : > { %794 = vmatmul.f32.gmra.mxu1 %v388_v18  ;;  %v608_v16 = vld [vmem:[#allocation5 + $0x290] sm:$0xff] }
  0x92   : > { %941 = vmatpush.msra.mxu3 %v580_v20  ;;  %v602_v20 = vld [vmem:[#allocation5 + $0x260] sm:$0xff] }
  0x93   : > { %1021 = vmatpush.msra.mxu0 %v602_v20  ;;  %v590_v20 = vld [vmem:[#allocation5 + $0x200] sm:$0xff] }
  0x94   : > { %942 = vmatpush.msra.mxu3 %v579_v22  ;;  %v633_v22 = vld [vmem:[#allocation5 + $0x358] sm:$0xff] }
  0x95   : > { %892 = vmatmul.f32.gmra.mxu2 %v4370_v29 }
  0x96   : > { %711 = vmatmul.f32.gmra.mxu0 %v366_v23  ;;  %943 = vmatpush.msra.mxu3 %v578_v25  ;;  %v601_v23 = vld [vmem:[#allocation5 + $0x258] sm:$0xff]  ;;  %v618_v25 = vld [vmem:[#allocation5 + $0x2e0] sm:$0xff] }
  0x97   : > { %922 = vmatmul.f32.vlgmr.msrb.gmra.mxu3 %v4366_v24  ;;  %1022 = vmatpush.msra.mxu0 %v601_v23  ;;  %v669_v23 = vld [vmem:[#allocation5 + $0x478] sm:$0xff] }
  0x98   : > { %944 = vmatpush.msra.mxu3 %v577_v27  ;;  %v600_v27 = vld [vmem:[#allocation5 + $0x250] sm:$0xff] }
  0x99   : > { %797 = vmatmul.f32.gmra.mxu1 %v389_v26  ;;  %v632_v26 = vld [vmem:[#allocation5 + $0x350] sm:$0xff]  ;;  %1023 = vmatpush.msra.mxu0 %v600_v27 }
  0x9a   : > { %945 = vmatpush.msra.mxu3 %v576_v28  ;;  %v617_v28 = vld [vmem:[#allocation5 + $0x2d8] sm:$0xff] }
  0x9c   : > { %946 = vmatpush.msra.mxu3 %v575_v30 }
  0x9d   : > { %895 = vmatmul.f32.gmra.mxu2 %v4376_v35 }
  0x9e   : > { %714 = vmatmul.f32.gmra.mxu0 %v367_v31  ;;  %947 = vmatpush.msra.mxu3 %v574_v33  ;;  %v599_v31 = vld [vmem:[#allocation5 + $0x248] sm:$0xff]  ;;  %v616_v33 = vld [vmem:[#allocation5 + $0x2d0] sm:$0xff] }
  0x9f   : > { %925 = vmatmul.f32.gmra.mxu3 %v4372_v32  ;;  %1024 = vmatpush.msra.mxu0 %v599_v31  ;;  %v406_v31 = vld [vmem:[#allocation2 + $0x11] sm:$0xff] }
  0xa1   : > { %800 = vmatmul.f32.gmra.mxu1 %v390_v34  ;;  %v630_v34 = vld [vmem:[#allocation5 + $0x340] sm:$0xff] }
  0xa5   : > { %898 = vmatmul.f32.gmra.mxu2 %v4379_v39 }
  0xa6   : > { %717 = vmatmul.f32.gmra.mxu0 %v368_v36  ;;  %v380_v36 = vld [vmem:[#allocation2 + $0xaf] sm:$0xff] }
  0xa7   : > { %928 = vmatmul.f32.gmra.mxu3 %v427_v37  ;;  %v598_v37 = vld [vmem:[#allocation5 + $0x240] sm:$0xff] }
  0xa8   : > { %1025 = vmatpush.msra.mxu0 %v598_v37 }
  0xa9   : > { %803 = vmatmul.f32.gmra.mxu1 %v391_v38  ;;  %v615_v38 = vld [vmem:[#allocation5 + $0x2c8] sm:$0xff] }
  0xad   : > { %901 = vmatmul.f32.gmra.mxu2 %v4385_v43 }
  0xae   : > { %720 = vmatmul.f32.gmra.mxu0 %v369_v40  ;;  %v597_v40 = vld [vmem:[#allocation5 + $0x238] sm:$0xff] }
  0xaf   : > { %948 = vmatmul.f32.vlgmr.msra.gmra.mxu3 %v4381_v41  ;;  %1026 = vmatpush.msra.mxu0 %v597_v40 }
  0xb1   : > { %806 = vmatmul.f32.gmra.mxu1 %v392_v42  ;;  %v614_v42 = vld [vmem:[#allocation5 + $0x2c0] sm:$0xff] }
  0xb5   : > { %904 = vmatmul.f32.gmra.mxu2 %v4391_v47 }
  0xb6   : > { %723 = vmatmul.f32.gmra.mxu0 %v370_v44  ;;  %v628_v44 = vld [vmem:[#allocation5 + $0x330] sm:$0xff] }
  0xb7   : > { %951 = vmatmul.f32.gmra.mxu3 %v4387_v45 }
  0xb9   : > { %809 = vmatmul.f32.gmra.mxu1 %v393_v46  ;;  %v596_v46 = vld [vmem:[#allocation5 + $0x230] sm:$0xff] }
  0xba   : > { %1027 = vmatpush.msra.mxu0 %v596_v46  ;;  %v667_v46 = vld [vmem:[#allocation5 + $0x468] sm:$0xff] }
  0xbd   : > { %907 = vmatmul.f32.gmra.mxu2 %v4395_v50 }
  0xbe   : > { %726 = vmatmul.f32.gmra.mxu0 %v371_v48  ;;  %v613_v48 = vld [vmem:[#allocation5 + $0x2b8] sm:$0xff] }
  0xbf   : > { %954 = vmatmul.f32.gmra.mxu3 %v4339_v55  ;;  %v4403_v55 = vld [vmem:[#allocation2 + $0x91] sm:$0xff] }
  0xc1   : > { %812 = vmatmul.f32.gmra.mxu1 %v394_v49  ;;  %v627_v49 = vld [vmem:[#allocation5 + $0x328] sm:$0xff] }
  0xc5   : > { %910 = vmatmul.f32.gmra.mxu2 %v4399_v53 }
  0xc6   : > { %729 = vmatmul.f32.gmra.mxu0 %v372_v51 }
  0xc7   : > { %957 = vmatmul.f32.gmra.mxu3 %v4349_v59  ;;  %v4407_v59 = vld [vmem:[#allocation2 + $0x99] sm:$0xff] }
  0xc9   : > { %815 = vmatmul.f32.gmra.mxu1 %v395_v52  ;;  %v595_v52 = vld [vmem:[#allocation5 + $0x228] sm:$0xff] }
  0xca   : > { %1028 = vmatpush.msra.mxu0 %v595_v52  ;;  %v647_v52 = vld [vmem:[#allocation5 + $0x3c8] sm:$0xff] }
  0xcd   : > { %913 = vmatmul.f32.gmra.mxu2 %v4403_v55 }
  0xce   : > { %732 = vmatmul.f32.gmra.mxu0 %v373_v54  ;;  %v612_v54 = vld [vmem:[#allocation5 + $0x2b0] sm:$0xff] }
  0xcf   : > { %960 = vmatmul.f32.gmra.mxu3 %v4355_v63  ;;  %v4415_v63 = vld [vmem:[#allocation2 + $0xa1] sm:$0xff] }
  0xd1   : > { %818 = vmatmul.f32.gmra.mxu1 %v396_v56  ;;  %v626_v56 = vld [vmem:[#allocation5 + $0x320] sm:$0xff] }
  0xd5   : > { %916 = vmatmul.f32.gmra.mxu2 %v4407_v59 }
  0xd6   : > { %735 = vmatmul.f32.gmra.mxu0 %v374_v57 }
  0xd7   : > { %963 = vmatmul.f32.gmra.mxu3 %v4358_v6 }
  0xd9   : > { %821 = vmatmul.f32.gmra.mxu1 %v397_v58  ;;  %v594_v58 = vld [vmem:[#allocation5 + $0x220] sm:$0xff] }
  0xda   : > { %1029 = vmatpush.msra.mxu0 %v594_v58  ;;  %v644_v58 = vld [vmem:[#allocation5 + $0x3b0] sm:$0xff] }
  0xdb   : > { %v4409_v60 = vpop.f32.mrf.mxu0 }
  0xdd   : > { %919 = vmatmul.f32.gmra.mxu2 %v4415_v63 }
  0xde   : > { %738 = vmatmul.f32.gmra.mxu0 %v375_v61  ;;  %v611_v61 = vld [vmem:[#allocation5 + $0x2a8] sm:$0xff] }
  0xdf   : > { %966 = vmatmul.f32.gmra.mxu3 %v4361_v13  ;;  %v635_v13 = vld [vmem:[#allocation5 + $0x368] sm:$0xff] }
  0xe0   : > { %1192 = vmatpush.msrb.mxu2 %v635_v13  ;;  %v623_v13 = vld [vmem:[#allocation5 + $0x308] sm:$0xff] }
  0xe2   : > { %v4413_v62 = vpop.f32.mrf.mxu3  ;;  %1193 = vmatpush.msrb.mxu2 %v634_v17 }
  0xe3   : > { %5868 = vst [vmem:[#allocation26_spill] sm:$0xff] %v4413_v62  ;;  %v4417_v0 = vpop.f32.mrf.mxu0  ;;  %v443_v62 = vld [vmem:[#allocation2 + $0x7a] sm:$0xff] }
  0xe4   : > { %1194 = vmatpush.msrb.mxu2 %v633_v22  ;;  %v607_v22 = vld [vmem:[#allocation5 + $0x288] sm:$0xff] }
  0xe6   : > { %741 = vmatmul.f32.gmra.mxu0 %v376_v1  ;;  %1195 = vmatpush.msrb.mxu2 %v632_v26  ;;  %v625_v1 = vld [vmem:[#allocation5 + $0x318] sm:$0xff]  ;;  %v454_v26 = vld [vmem:[#allocation2 + $0x1b] sm:$0xff] }
  0xe7   : > { %969 = vmatmul.f32.gmra.mxu3 %v4364_v21  ;;  %v619_v21 = vld [vmem:[#allocation5 + $0x2e8] sm:$0xff] }
  0xe8   : > { %1106 = vmatpush.msrb.mxu1 %v619_v21  ;;  %v456_v21 = vld [vmem:[#allocation2 + $0x2b] sm:$0xff] }
  0xea   : > { %v4421_v2 = vpop.f32.mrf.mxu3  ;;  %1107 = vmatpush.msrb.mxu1 %v618_v25  ;;  %v606_v25 = vld [vmem:[#allocation5 + $0x280] sm:$0xff] }
  0xeb   : > { %5869 = vst [vmem:[#allocation27_spill] sm:$0xff] %v4421_v2  ;;  %v4423_v3 = vpop.f32.mrf.mxu0  ;;  %v485_v2 = vld [vmem:[#allocation2 + $0x54] sm:$0xff] }
  0xec   : > { %1108 = vmatpush.msrb.mxu1 %v617_v28  ;;  %v652_v28 = vld [vmem:[#allocation5 + $0x3f0] sm:$0xff] }
  0xee   : > { %744 = vmatmul.f32.gmra.mxu0 %v377_v4  ;;  %1109 = vmatpush.msrb.mxu1 %v616_v33  ;;  %v593_v4 = vld [vmem:[#allocation5 + $0x218] sm:$0xff]  ;;  %v457_v33 = vld [vmem:[#allocation2 + $0x33] sm:$0xff] }
  0xef   : > { %972 = vmatmul.f32.gmra.mxu3 %v4370_v29  ;;  %v631_v29 = vld [vmem:[#allocation5 + $0x348] sm:$0xff]  ;;  %1030 = vmatpush.msra.mxu0 %v593_v4  ;;  %v666_v4 = vld [vmem:[#allocation5 + $0x460] sm:$0xff] }
  0xf0   : > { %1196 = vmatpush.msrb.mxu2 %v631_v29  ;;  %1110 = vmatpush.msrb.mxu1 %v615_v38  ;;  %v458_v38 = vld [vmem:[#allocation2 + $0x3b] sm:$0xff] }
  0xf1   : > { %1031 = vmatpush.msra.mxu0 %v592_v10  ;;  %v642_v10 = vld [vmem:[#allocation5 + $0x3a0] sm:$0xff] }
  0xf2   : > { %v4426_v5 = vpop.f32.mrf.mxu3  ;;  %1197 = vmatpush.msrb.mxu2 %v630_v34  ;;  %1111 = vmatpush.msrb.mxu1 %v614_v42  ;;  %v650_v42 = vld [vmem:[#allocation5 + $0x3e0] sm:$0xff] }
  0xf3   : > { %5870 = vst [vmem:[#allocation28_spill] sm:$0xff] %v4426_v5  ;;  %v4428_v6 = vpop.f32.mrf.mxu0  ;;  %1032 = vmatpush.msra.mxu0 %v591_v15  ;;  %v640_v15 = vld [vmem:[#allocation5 + $0x390] sm:$0xff] }
  0xf4   : > { %1112 = vmatpush.msrb.mxu1 %v613_v48  ;;  %v649_v48 = vld [vmem:[#allocation5 + $0x3d8] sm:$0xff] }
  0xf5   : > { %1033 = vmatpush.msra.mxu0 %v590_v20 }
  0xf6   : > { %747 = vmatmul.f32.gmra.mxu0 %v378_v7  ;;  %1113 = vmatpush.msrb.mxu1 %v612_v54  ;;  %v653_v7 = vld [vmem:[#allocation5 + $0x3f8] sm:$0xff] }
  0xf7   : > { %975 = vmatmul.f32.gmra.mxu3 %v4376_v35 }
  0xf8   : > { %1114 = vmatpush.msrb.mxu1 %v611_v61  ;;  %1276 = vmatpush.msrb.mxu3 %v653_v7  ;;  %v643_v7 = vld [vmem:[#allocation5 + $0x3a8] sm:$0xff] }
  0xfa   : > { %v4431_v14 = vpop.f32.mrf.mxu3  ;;  %1115 = vmatpush.msrb.mxu1 %v610_v8  ;;  %1277 = vmatpush.msrb.mxu3 %v652_v28 }
  0xfb   : > { %v4433_v18 = vpop.f32.mrf.mxu0 }
  0xfc   : > { %1116 = vmatpush.msrb.mxu1 %v609_v11  ;;  %v641_v11 = vld [vmem:[#allocation5 + $0x398] sm:$0xff] }
  0xfe   : > { %750 = vmatmul.f32.gmra.mxu0 %v379_v19  ;;  %v622_v19 = vld [vmem:[#allocation5 + $0x300] sm:$0xff]  ;;  %1117 = vmatpush.msrb.mxu1 %v608_v16 }
  0xff   : > { %978 = vmatmul.f32.gmra.mxu3 %v4379_v39  ;;  %v629_v39 = vld [vmem:[#allocation5 + $0x338] sm:$0xff] }
 0x100   : > { %1198 = vmatpush.msrb.mxu2 %v629_v39  ;;  %1118 = vmatpush.msrb.mxu1 %v607_v22  ;;  %v651_v39 = vld [vmem:[#allocation5 + $0x3e8] sm:$0xff]  ;;  %v665_v22 = vld [vmem:[#allocation5 + $0x458] sm:$0xff] }
 0x101   : > { %1278 = vmatpush.msrb.mxu3 %v651_v39 }
 0x102   : > { %v4436_v30 = vpop.f32.mrf.mxu3  ;;  %1199 = vmatpush.msrb.mxu2 %v628_v44  ;;  %1119 = vmatpush.msrb.mxu1 %v606_v25  ;;  %v459_v44 = vld [vmem:[#allocation2 + $0x43] sm:$0xff] }
 0x103   : > { %5871 = vst [vmem:[#allocation29_spill] sm:$0xff] %v4436_v30  ;;  %v4438_v35 = vpop.f32.mrf.mxu0  ;;  %1120 = vmatmul.f32.vlgmr.msrb.gmra.mxu1 %v454_v26  ;;  %1279 = vmatpush.msrb.mxu3 %v650_v42  ;;  %v484_v30 = vld [vmem:[#allocation2 + $0x4c] sm:$0xff] }
 0x104   : > { %1200 = vmatpush.msrb.mxu2 %v627_v49 }
 0x105   : > { %1280 = vmatpush.msrb.mxu3 %v649_v48  ;;  %v464_v48 = vld [vmem:[#allocation2 + $0x6b] sm:$0xff] }
 0x106   : > { %753 = vmatmul.f32.gmra.mxu0 %v380_v36  ;;  %1201 = vmatpush.msrb.mxu2 %v626_v56  ;;  %v668_v36 = vld [vmem:[#allocation5 + $0x470] sm:$0xff] }
 0x107   : > { %981 = vmatmul.f32.gmra.mxu3 %v4385_v43  ;;  %v381_v43 = vld [vmem:[#allocation2 + $0xb7] sm:$0xf] }
 0x108   : > { %1202 = vmatpush.msrb.mxu2 %v625_v1  ;;  %v431_v56 = vld [vmem:[#allocation2 + $0x1a] sm:$0xff] }
 0x10a   : > { %v4441_v51 = vpop.f32.mrf.mxu3  ;;  %1203 = vmatpush.msrb.mxu2 %v624_v9  ;;  %v432_v9 = vld [vmem:[#allocation2 + $0x22] sm:$0xff] }
 0x10b   : > { %5872 = vst [vmem:[#allocation30_spill] sm:$0xff] %v4441_v51  ;;  %v4443_v57 = vpop.f32.mrf.mxu0  ;;  %v469_v51 = vld [vmem:[#allocation2 + $0x93] sm:$0xff] }
 0x10c   : > { %1204 = vmatpush.msrb.mxu2 %v623_v13  ;;  %v4482_v13 = vpop.f32.mrf.mxu1 }
 0x10e   : > { %756 = vmatmul.f32.gmra.mxu0 %v381_v43  ;;  %1205 = vmatpush.msrb.mxu2 %v622_v19  ;;  %v460_v43 = vld [vmem:[#allocation2 + $0x4b] sm:$0xff] }
 0x10f   : > { %984 = vmatmul.f32.gmra.mxu3 %v4391_v47  ;;  %v405_v47 = vld [vmem:[#allocation2 + $0x9] sm:$0xff]  ;;  %1206 = vmatmul.f32.vlgmr.msrb.gmra.mxu2 %v456_v21 }
 0x112   : > { %v4446_v12 = vpop.f32.mrf.mxu3 }
 0x113   : > { %v4448_v17 = vpop.f32.mrf.mxu0 }
 0x114   : > { %v4491_v25 = vpop.f32.mrf.mxu1 }
 0x116   : > { %862 = vmatmul.f32.vlgmr.msrb.gmra.mxu0 %v405_v47  ;;  %v639_v47 = vld [vmem:[#allocation5 + $0x388] sm:$0xff] }
 0x117   : > { %987 = vmatmul.f32.gmra.mxu3 %v4395_v50  ;;  %1362 = vmatpush.msrb.mxu0 %v669_v23  ;;  %v455_v50 = vld [vmem:[#allocation2 + $0x23] sm:$0xff]  ;;  %v462_v23 = vld [vmem:[#allocation2 + $0x5b] sm:$0xff] }
 0x118   : > { %1209 = vmatmul.f32.gmra.mxu2 %v457_v33  ;;  %1123 = vmatmul.f32.gmra.mxu1 %v455_v50 }
 0x119   : > { %1363 = vmatpush.msrb.mxu0 %v668_v36  ;;  %v463_v36 = vld [vmem:[#allocation2 + $0x63] sm:$0xff] }
 0x11a   : > { %v4451_v27 = vpop.f32.mrf.mxu3 }
 0x11b   : > { %5873 = vst [vmem:[#allocation31_spill] sm:$0xff] %v4451_v27  ;;  %v4453_v29 = vpop.f32.mrf.mxu0  ;;  %1364 = vmatpush.msrb.mxu0 %v667_v46  ;;  %v435_v46 = vld [vmem:[#allocation2 + $0x3a] sm:$0xff]  ;;  %v441_v27 = vld [vmem:[#allocation2 + $0x6a] sm:$0xff] }
 0x11c   : > { %5874 = vst [vmem:[#allocation32_spill] sm:$0xff] %v4453_v29  ;;  %v4501_v39 = vpop.f32.mrf.mxu1 }
 0x11d   : > { %1365 = vmatpush.msrb.mxu0 %v666_v4  ;;  %v663_v4 = vld [vmem:[#allocation5 + $0x448] sm:$0xff] }
 0x11e   : > { %865 = vmatmul.f32.gmra.mxu0 %v406_v31  ;;  %v428_v31 = vld [vmem:[#allocation2 + $0xb9] sm:$0xff] }
 0x11f   : > { %990 = vmatmul.f32.gmra.mxu3 %v4399_v53  ;;  %1366 = vmatpush.msrb.mxu0 %v665_v22 }
 0x120   : > { %1212 = vmatmul.f32.gmra.mxu2 %v458_v38  ;;  %1126 = vmatmul.f32.gmra.mxu1 %v456_v21  ;;  %v433_v21 = vld [vmem:[#allocation2 + $0x2a] sm:$0xff] }
 0x122   : > { %v4456_v34 = vpop.f32.mrf.mxu3 }
 0x123   : > { %5875 = vst [vmem:[#allocation33_spill] sm:$0xff] %v4456_v34  ;;  %v4458_v37 = vpop.f32.mrf.mxu0  ;;  %v483_v34 = vld [vmem:[#allocation2 + $0x44] sm:$0xff] }
 0x124   : > { %5876 = vst [vmem:[#allocation34_spill] sm:$0xff] %v4458_v37 }
 0x126   : > { %868 = vmatmul.f32.gmra.mxu0 %v4381_v41  ;;  %v4468_v41 = vpop.f32.mrf.mxu2 }
 0x127   : > { %993 = vmatmul.f32.gmra.mxu3 %v4403_v55  ;;  %v648_v55 = vld [vmem:[#allocation5 + $0x3d0] sm:$0xff] }
 0x128   : > { %1215 = vmatmul.f32.gmra.mxu2 %v459_v44  ;;  %1281 = vmatpush.msrb.mxu3 %v648_v55 }
 0x129   : > { %1129 = vmatmul.f32.gmra.mxu1 %v457_v33  ;;  %v434_v33 = vld [vmem:[#allocation2 + $0x32] sm:$0xff] }
 0x12a   : > { %v4462_v40 = vpop.f32.mrf.mxu3  ;;  %1282 = vmatpush.msrb.mxu3 %v647_v52 }
 0x12b   : > { %v4464_v53 = vpop.f32.mrf.mxu0 }
 0x12c   : > { %5877 = vst [vmem:[#allocation35_spill] sm:$0xff] %v4464_v53 }
 0x12e   : > { %871 = vmatmul.f32.gmra.mxu0 %v4387_v45  ;;  %v646_v45 = vld [vmem:[#allocation5 + $0x3c0] sm:$0xff]  ;;  %v4475_v61 = vpop.f32.mrf.mxu2 }
 0x12f   : > { %996 = vmatmul.f32.gmra.mxu3 %v4407_v59  ;;  %v645_v59 = vld [vmem:[#allocation5 + $0x3b8] sm:$0xff] }
 0x130   : > { %1283 = vmatpush.msrb.mxu3 %v646_v45  ;;  %1218 = vmatmul.f32.gmra.mxu2 %v460_v43  ;;  %v430_v45 = vld [vmem:[#allocation2 + $0xc9] sm:$0xf] }
 0x131   : > { %1132 = vmatmul.f32.gmra.mxu1 %v458_v38  ;;  %v664_v38 = vld [vmem:[#allocation5 + $0x450] sm:$0xff] }
 0x132   : > { %v4470_v49 = vpop.f32.mrf.mxu3  ;;  %1284 = vmatpush.msrb.mxu3 %v645_v59  ;;  %1367 = vmatpush.msrb.mxu0 %v664_v38  ;;  %v4511_v59 = vpop.f32.mrf.mxu1  ;;  %v467_v38 = vld [vmem:[#allocation2 + $0x83] sm:$0xff] }
 0x133   : > { %v4472_v54 = vpop.f32.mrf.mxu0 }
 0x134   : > { %5878 = vst [vmem:[#allocation36_spill] sm:$0xff] %v4472_v54  ;;  %1285 = vmatpush.msrb.mxu3 %v644_v58  ;;  %v465_v58 = vld [vmem:[#allocation2 + $0x73] sm:$0xff]  ;;  %1368 = vmatpush.msrb.mxu0 %v663_v4  ;;  %v482_v4 = vld [vmem:[#allocation2 + $0x3c] sm:$0xff] }
 0x136   : > { %1034 = vmatmul.f32.vlgmr.msra.gmra.mxu0 %v431_v56  ;;  %1286 = vmatpush.msrb.mxu3 %v643_v7  ;;  %v4486_v19 = vpop.f32.mrf.mxu2 }
 0x137   : > { %999 = vmatmul.f32.gmra.mxu3 %v4415_v63  ;;  %v461_v63 = vld [vmem:[#allocation2 + $0x53] sm:$0xff] }
 0x138   : > { %1287 = vmatpush.msrb.mxu3 %v642_v10  ;;  %1221 = vmatmul.f32.gmra.mxu2 %v461_v63 }
 0x139   : > { %1135 = vmatmul.f32.gmra.mxu1 %v459_v44  ;;  %v429_v44 = vld [vmem:[#allocation2 + $0xc1] sm:$0xff] }
 0x13a   : > { %v4477_v1 = vpop.f32.mrf.mxu3  ;;  %1288 = vmatpush.msrb.mxu3 %v641_v11  ;;  %v480_v11 = vld [vmem:[#allocation2 + $0x2c] sm:$0xff] }
 0x13b   : > { %v4479_v8 = vpop.f32.mrf.mxu0 }
 0x13c   : > { %5879 = vst [vmem:[#allocation37_spill] sm:$0xff] %v4479_v8  ;;  %1289 = vmatpush.msrb.mxu3 %v640_v15  ;;  %v466_v15 = vld [vmem:[#allocation2 + $0x7b] sm:$0xff]  ;;  %v475_v8 = vld [vmem:[#allocation2 + $0xc3] sm:$0xff] }
 0x13e   : > { %1037 = vmatmul.f32.gmra.mxu0 %v432_v9  ;;  %1290 = vmatpush.msrb.mxu3 %v639_v47  ;;  %v4497_v50 = vpop.f32.mrf.mxu2  ;;  %v662_v47 = vld [vmem:[#allocation5 + $0x440] sm:$0xff] }
 0x13f   : > { %1002 = vmatmul.f32.gmra.mxu3 %v4366_v24  ;;  %v638_v24 = vld [vmem:[#allocation5 + $0x380] sm:$0xff]  ;;  %5882 = vst [vmem:[#allocation40_spill] sm:$0xff] %v4497_v50  ;;  %1369 = vmatpush.msrb.mxu0 %v662_v47 }
 0x140   : > { %1291 = vmatpush.msrb.mxu3 %v638_v24  ;;  %1224 = vmatmul.f32.gmra.mxu2 %v462_v23 }
 0x141   : > { %1138 = vmatmul.f32.gmra.mxu1 %v460_v43  ;;  %v436_v43 = vld [vmem:[#allocation2 + $0x42] sm:$0xff] }
 0x142   : > { %v4484_v16 = vpop.f32.mrf.mxu3 }
 0x143   : > { %v4488_v20 = vpop.f32.mrf.mxu0 }
 0x144   : > { %5880 = vst [vmem:[#allocation38_spill] sm:$0xff] %v4488_v20  ;;  %v488_v20 = vld [vmem:[#allocation2 + $0x6c] sm:$0xff] }
 0x146   : > { %1040 = vmatmul.f32.gmra.mxu0 %v433_v21  ;;  %v4505_v55 = vpop.f32.mrf.mxu2  ;;  %v4519_v21 = vpop.f32.mrf.mxu1 }
 0x147   : > { %1005 = vmatmul.f32.gmra.mxu3 %v4372_v32  ;;  %5884 = vst [vmem:[#allocation42_spill] sm:$0xff] %v4505_v55 }
 0x148   : > { %1227 = vmatmul.f32.gmra.mxu2 %v463_v36 }
 0x149   : > { %1141 = vmatmul.f32.gmra.mxu1 %v461_v63  ;;  %v437_v63 = vld [vmem:[#allocation2 + $0x4a] sm:$0xff] }
 0x14a   : > { %v4493_v26 = vpop.f32.mrf.mxu3 }
 0x14b   : > { %v4495_v28 = vpop.f32.mrf.mxu0 }
 0x14c   : > { %5881 = vst [vmem:[#allocation39_spill] sm:$0xff] %v4495_v28  ;;  %v444_v28 = vld [vmem:[#allocation2 + $0x82] sm:$0xff] }
 0x14e   : > { %1043 = vmatmul.f32.gmra.mxu0 %v434_v33  ;;  %v4513_v7 = vpop.f32.mrf.mxu2  ;;  %v481_v33 = vld [vmem:[#allocation2 + $0x34] sm:$0xff] }
 0x14f   : > { %1008 = vmatmul.f32.gmra.mxu3 %v428_v31  ;;  %5886 = vst [vmem:[#allocation44_spill] sm:$0xff] %v4513_v7  ;;  %v438_v31 = vld [vmem:[#allocation2 + $0x52] sm:$0xff] }
 0x150   : > { %1230 = vmatmul.f32.gmra.mxu2 %v464_v48 }
 0x151   : > { %1144 = vmatmul.f32.gmra.mxu1 %v462_v23 }
 0x152   : > { %v4499_v32 = vpop.f32.mrf.mxu3 }
 0x153   : > { %v4503_v42 = vpop.f32.mrf.mxu0 }
 0x154   : > { %5883 = vst [vmem:[#allocation41_spill] sm:$0xff] %v4503_v42  ;;  %v472_v42 = vld [vmem:[#allocation2 + $0xab] sm:$0xff] }
 0x156   : > { %1046 = vmatmul.f32.gmra.mxu0 %v435_v46  ;;  %v4523_v24 = vpop.f32.mrf.mxu2  ;;  %v661_v46 = vld [vmem:[#allocation5 + $0x438] sm:$0xff] }
 0x157   : > { %1011 = vmatmul.f32.gmra.mxu3 %v429_v44  ;;  %5889 = vst [vmem:[#allocation47_spill] sm:$0xff] %v4523_v24  ;;  %1370 = vmatpush.msrb.mxu0 %v661_v46 }
 0x158   : > { %1233 = vmatmul.f32.gmra.mxu2 %v465_v58 }
 0x159   : > { %1147 = vmatmul.f32.gmra.mxu1 %v463_v36  ;;  %v4527_v36 = vpop.f32.mrf.mxu1 }
 0x15a   : > { %v4507_v52 = vpop.f32.mrf.mxu3 }
 0x15b   : > { %v4509_v56 = vpop.f32.mrf.mxu0 }
 0x15c   : > { %5885 = vst [vmem:[#allocation43_spill] sm:$0xff] %v4509_v56  ;;  %v486_v56 = vld [vmem:[#allocation2 + $0x5c] sm:$0xff] }
 0x15e   : > { %1049 = vmatmul.f32.gmra.mxu0 %v436_v43  ;;  %v439_v43 = vld [vmem:[#allocation2 + $0x5a] sm:$0xff] }
 0x15f   : > { %1014 = vmatmul.f32.gmra.mxu3 %v430_v45 }
 0x160   : > { %1236 = vmatmul.f32.gmra.mxu2 %v466_v15 }
 0x161   : > { %1150 = vmatmul.f32.gmra.mxu1 %v464_v48  ;;  %v4537_v47 = vpop.f32.mrf.mxu1 }
 0x162   : > { %v4515_v9 = vpop.f32.mrf.mxu3 }
 0x163   : > { %v4517_v10 = vpop.f32.mrf.mxu0 }
 0x164   : > { %5887 = vst [vmem:[#allocation45_spill] sm:$0xff] %v4517_v10 }
 0x166   : > { %1052 = vmatmul.f32.gmra.mxu0 %v437_v63  ;;  %v4533_v63 = vpop.f32.mrf.mxu2 }
 0x167   : > { %1292 = vmatmul.f32.vlgmr.msrb.gmra.mxu3 %v480_v11  ;;  %5892 = vst [vmem:[#allocation50_spill] sm:$0xff] %v4533_v63  ;;  %v468_v11 = vld [vmem:[#allocation2 + $0x8b] sm:$0xff] }
 0x168   : > { %1239 = vmatmul.f32.gmra.mxu2 %v467_v38  ;;  %v477_v63 = vld [vmem:[#allocation2 + $0xcb] sm:$0xff] }
 0x169   : > { %1153 = vmatmul.f32.gmra.mxu1 %v465_v58  ;;  %v660_v58 = vld [vmem:[#allocation5 + $0x430] sm:$0xff]  ;;  %v4547_v5 = vpop.f32.mrf.mxu1 }
 0x16a   : > { %v4521_v22 = vpop.f32.mrf.mxu3  ;;  %1371 = vmatpush.msrb.mxu0 %v660_v58 }
 0x16b   : > { %5888 = vst [vmem:[#allocation46_spill] sm:$0xff] %v4521_v22  ;;  %v4525_v23 = vpop.f32.mrf.mxu0  ;;  %v517_v22 = vld [vmem:[#allocation2 + $0x9d] sm:$0xff] }
 0x16c   : > { %5890 = vst [vmem:[#allocation48_spill] sm:$0xff] %v4525_v23  ;;  %v442_v23 = vld [vmem:[#allocation2 + $0x72] sm:$0xff] }
 0x16e   : > { %1055 = vmatmul.f32.gmra.mxu0 %v438_v31  ;;  %v4541_v46 = vpop.f32.mrf.mxu2 }
 0x16f   : > { %1295 = vmatmul.f32.gmra.mxu3 %v481_v33  ;;  %v440_v33 = vld [vmem:[#allocation2 + $0x62] sm:$0xff]  ;;  %5895 = vst [vmem:[#allocation53_spill] sm:$0xff] %v4541_v46 }
 0x170   : > { %1242 = vmatmul.f32.gmra.mxu2 %v468_v11  ;;  %v474_v46 = vld [vmem:[#allocation2 + $0xbb] sm:$0xff] }
 0x171   : > { %1156 = vmatmul.f32.gmra.mxu1 %v466_v15 }
 0x172   : > { %v4529_v44 = vpop.f32.mrf.mxu3 }
 0x173   : > { %5891 = vst [vmem:[#allocation49_spill] sm:$0xff] %v4529_v44  ;;  %v4531_v45 = vpop.f32.mrf.mxu0 }
 0x176   : > { %1058 = vmatmul.f32.gmra.mxu0 %v439_v43  ;;  %v4549_v15 = vpop.f32.mrf.mxu2 }
 0x177   : > { %1298 = vmatmul.f32.gmra.mxu3 %v482_v4  ;;  %5898 = vst [vmem:[#allocation56_spill] sm:$0xff] %v4549_v15  ;;  %v487_v15 = vld [vmem:[#allocation2 + $0x64] sm:$0xff] }
 0x178   : > { %1245 = vmatmul.f32.gmra.mxu2 %v469_v51 }
 0x179   : > { %1159 = vmatmul.f32.gmra.mxu1 %v467_v38  ;;  %v4555_v38 = vpop.f32.mrf.mxu1 }
 0x17a   : > { %v4535_v48 = vpop.f32.mrf.mxu3  ;;  %5900 = vst [vmem:[#allocation58_spill] sm:$0xff] %v4555_v38 }
 0x17b   : > { %5893 = vst [vmem:[#allocation51_spill] sm:$0xff] %v4535_v48  ;;  %v4539_v31 = vpop.f32.mrf.mxu0  ;;  %v507_v48 = vld [vmem:[#allocation2 + $0x4d] sm:$0xff] }
 0x17c   : > { %5894 = vst [vmem:[#allocation52_spill] sm:$0xff] %v4539_v31  ;;  %v470_v31 = vld [vmem:[#allocation2 + $0x9b] sm:$0xff] }
 0x17e   : > { %1061 = vmatmul.f32.gmra.mxu0 %v440_v33  ;;  %v659_v33 = vld [vmem:[#allocation5 + $0x428] sm:$0xff] }
 0x17f   : > { %1301 = vmatmul.f32.gmra.mxu3 %v483_v34  ;;  %1372 = vmatpush.msrb.mxu0 %v659_v33 }
 0x180   : > { %1248 = vmatmul.f32.gmra.mxu2 %v470_v31 }
 0x181   : > { %1162 = vmatmul.f32.gmra.mxu1 %v468_v11  ;;  %v658_v11 = vld [vmem:[#allocation5 + $0x420] sm:$0xff] }
 0x182   : > { %v4543_v43 = vpop.f32.mrf.mxu3  ;;  %1373 = vmatpush.msrb.mxu0 %v658_v11 }
 0x183   : > { %5896 = vst [vmem:[#allocation54_spill] sm:$0xff] %v4543_v43  ;;  %v4545_v4 = vpop.f32.mrf.mxu0  ;;  %v478_v43 = vld [vmem:[#allocation2 + $0xd3] sm:$0xff] }
 0x184   : > { %5897 = vst [vmem:[#allocation55_spill] sm:$0xff] %v4545_v4  ;;  %v471_v4 = vld [vmem:[#allocation2 + $0xa3] sm:$0xff] }
 0x186   : > { %1064 = vmatmul.f32.gmra.mxu0 %v441_v27 }
 0x187   : > { %1304 = vmatmul.f32.gmra.mxu3 %v484_v30  ;;  %v4559_v30 = vpop.f32.mrf.mxu2 }
 0x188   : > { %1251 = vmatmul.f32.gmra.mxu2 %v471_v4  ;;  %5902 = vst [vmem:[#allocation60_spill] sm:$0xff] %v4559_v30 }
 0x189   : > { %1165 = vmatmul.f32.gmra.mxu1 %v469_v51 }
 0x18a   : > { %v4551_v34 = vpop.f32.mrf.mxu3 }
 0x18b   : > { %5899 = vst [vmem:[#allocation57_spill] sm:$0xff] %v4551_v34  ;;  %v4553_v58 = vpop.f32.mrf.mxu0 }
 0x18e   : > { %1067 = vmatmul.f32.gmra.mxu0 %v442_v23  ;;  %v4563_v23 = vpop.f32.mrf.mxu1 }
 0x18f   : > { %1307 = vmatmul.f32.gmra.mxu3 %v485_v2  ;;  %5903 = vst [vmem:[#allocation61_spill] sm:$0xff] %v4563_v23  ;;  %v4569_v30 = vpop.f32.mrf.mxu2 }
 0x190   : > { %1254 = vmatmul.f32.gmra.mxu2 %v472_v42  ;;  %5905 = vst [vmem:[#allocation63_spill] sm:$0xff] %v4569_v30  ;;  %v446_v30 = vld [vmem:[#allocation2 + $0x92] sm:$0xff] }
 0x191   : > { %1168 = vmatmul.f32.gmra.mxu1 %v470_v31 }
 0x192   : > { %v4557_v27 = vpop.f32.mrf.mxu3 }
 0x193   : > { %5901 = vst [vmem:[#allocation59_spill] sm:$0xff] %v4557_v27  ;;  %v4561_v10 = vpop.f32.mrf.mxu0  ;;  %v473_v27 = vld [vmem:[#allocation2 + $0xb3] sm:$0xff] }
 0x196   : > { %1070 = vmatmul.f32.gmra.mxu0 %v443_v62  ;;  %v657_v62 = vld [vmem:[#allocation5 + $0x418] sm:$0xff] }
 0x197   : > { %1310 = vmatmul.f32.gmra.mxu3 %v486_v56  ;;  %1374 = vmatpush.msrb.mxu0 %v657_v62  ;;  %v4573_v56 = vpop.f32.mrf.mxu1  ;;  %v4577_v31 = vpop.f32.mrf.mxu2  ;;  %v656_v62 = vld [vmem:[#allocation5 + $0x410] sm:$0xff] }
 0x198   : > { %1257 = vmatmul.f32.gmra.mxu2 %v473_v27  ;;  %5907 = vst [vmem:[#allocation65_spill] sm:$0xff] %v4573_v56  ;;  %v450_v56 = vld [vmem:[#allocation2 + $0xb2] sm:$0xff] }
 0x199   : > { %1171 = vmatmul.f32.gmra.mxu1 %v471_v4  ;;  %5908 = vst [vmem:[#allocation66_spill] sm:$0xff] %v4577_v31  ;;  %1375 = vmatpush.msrb.mxu0 %v656_v62  ;;  %v447_v31 = vld [vmem:[#allocation2 + $0x9a] sm:$0xff] }
 0x19a   : > { %v4565_v2 = vpop.f32.mrf.mxu3 }
 0x19b   : > { %5904 = vst [vmem:[#allocation62_spill] sm:$0xff] %v4565_v2  ;;  %v4567_v33 = vpop.f32.mrf.mxu0  ;;  %v445_v2 = vld [vmem:[#allocation2 + $0x8a] sm:$0xff] }
 0x19e   : > { %1073 = vmatmul.f32.gmra.mxu0 %v444_v28 }
 0x19f   : > { %1313 = vmatmul.f32.gmra.mxu3 %v487_v15  ;;  %v4583_v34 = vpop.f32.mrf.mxu1  ;;  %v4585_v4 = vpop.f32.mrf.mxu2 }
 0x1a0   : > { %1260 = vmatmul.f32.gmra.mxu2 %v474_v46  ;;  %5910 = vst [vmem:[#allocation68_spill] sm:$0xff] %v4583_v34  ;;  %v655_v34 = vld [vmem:[#allocation5 + $0x408] sm:$0xff] }
 0x1a1   : > { %1174 = vmatmul.f32.gmra.mxu1 %v472_v42  ;;  %5911 = vst [vmem:[#allocation69_spill] sm:$0xff] %v4585_v4  ;;  %1376 = vmatpush.msrb.mxu0 %v655_v34  ;;  %v448_v4 = vld [vmem:[#allocation2 + $0xa2] sm:$0xff] }
 0x1a2   : > { %v4571_v51 = vpop.f32.mrf.mxu3 }
 0x1a3   : > { %5906 = vst [vmem:[#allocation64_spill] sm:$0xff] %v4571_v51  ;;  %v4575_v11 = vpop.f32.mrf.mxu0  ;;  %v489_v51 = vld [vmem:[#allocation2 + $0x74] sm:$0xff] }
 0x1a6   : > { %1076 = vmatmul.f32.gmra.mxu0 %v445_v2 }
 0x1a7   : > { %1316 = vmatmul.f32.gmra.mxu3 %v488_v20  ;;  %v4591_v42 = vpop.f32.mrf.mxu1 }
 0x1a8   : > { %1263 = vmatmul.f32.gmra.mxu2 %v475_v8  ;;  %5913 = vst [vmem:[#allocation71_spill] sm:$0xff] %v4591_v42  ;;  %v654_v42 = vld [vmem:[#allocation5 + $0x400] sm:$0xff] }
 0x1a9   : > { %1177 = vmatmul.f32.gmra.mxu1 %v473_v27  ;;  %v4602_v27 = vld [vmem:[%s5836_s2] ss:$0 sm:$0xff]  ;;  %1377 = vmatpush.msrb.mxu0 %v654_v42 }
 0x1aa   : > { %v4579_v28 = vpop.f32.mrf.mxu3  ;;  %v451_v42 = vld [vmem:[#allocation2 + $0xba] sm:$0xff] }
 0x1ab   : > { %5909 = vst [vmem:[#allocation67_spill] sm:$0xff] %v4579_v28  ;;  %v4581_v15 = vpop.f32.mrf.mxu0  ;;  %v490_v28 = vld [vmem:[#allocation2 + $0x7c] sm:$0xff] }
 0x1ae   : > { %1079 = vmatmul.f32.gmra.mxu0 %v446_v30  ;;  %v4595_v30 = vpop.f32.mrf.mxu2 }
 0x1af   : > { %1319 = vmatmul.f32.gmra.mxu3 %v489_v51  ;;  %5915 = vst [vmem:[#allocation73_spill] sm:$0xff] %v4595_v30  ;;  %v4606_v34 = vpop.f32.mrf.mxu1  ;;  %v449_v30 = vld [vmem:[#allocation2 + $0xaa] sm:$0xff] }
 0x1b0   : > { %1266 = vmatmul.f32.gmra.mxu2 %v477_v63  ;;  %v749_v63 = vadd.f32 %v4602_v27, %v4531_v45  ;;  %5916 = vst [vmem:[#allocation74_spill] sm:$0xff] %v4606_v34  ;;  %v476_v45 = vld [vmem:[#allocation2 + $0xcb] sm:$0xf] }
 0x1b1   : > { %1180 = vmatmul.f32.gmra.mxu1 %v474_v46  ;;  %v492_v46 = vld [vmem:[#allocation2 + $0x8c] sm:$0xff] }
 0x1b2   : > { %v4587_v20 = vpop.f32.mrf.mxu3 }
 0x1b3   : > { %5912 = vst [vmem:[#allocation70_spill] sm:$0xff] %v4587_v20  ;;  %v4589_v2 = vpop.f32.mrf.mxu0  ;;  %v491_v20 = vld [vmem:[#allocation2 + $0x84] sm:$0xff] }
 0x1b6   : > { %1082 = vmatmul.f32.gmra.mxu0 %v447_v31  ;;  %v920_v54 = vpop.f32.mrf.mxu2 }
 0x1b7   : > { %1322 = vmatmul.f32.gmra.mxu3 %v490_v28 }
 0x1b8   : > { %1269 = vmatmul.f32.gmra.mxu2 %v478_v43 }
 0x1b9   : > { %1183 = vmatmul.f32.gmra.mxu1 %v475_v8  ;;  %v493_v8 = vld [vmem:[#allocation2 + $0x94] sm:$0xff] }
 0x1ba   : > { %v4593_v62 = vpop.f32.mrf.mxu3 }
 0x1bb   : > { %5914 = vst [vmem:[#allocation72_spill] sm:$0xff] %v4593_v62  ;;  %v4597_v51 = vpop.f32.mrf.mxu0  ;;  %v835_v62 = vadd.f32 %v4431_v14, %v749_v63  ;;  %v495_v63 = vld [vmem:[#allocation2 + $0xa4] sm:$0xff] }
 0x1be   : > { %1085 = vmatmul.f32.gmra.mxu0 %v448_v4  ;;  %v479_v4 = vld [vmem:[#allocation2 + $0xdb] sm:$0xf] }
 0x1bf   : > { %1325 = vmatmul.f32.gmra.mxu3 %v491_v20  ;;  %v921_v20 = vadd.f32 %v920_v54, %v835_v62  ;;  %v452_v62 = vld [vmem:[#allocation2 + $0xc2] sm:$0xff] }
 0x1c0   : > { %1272 = vmatmul.f32.gmra.mxu2 %v479_v4  ;;  %v453_v4 = vld [vmem:[#allocation2 + $0xca] sm:$0xf] }
 0x1c2   : > { %v4608_v31 = vpop.f32.mrf.mxu3 }
 0x1c3   : > { %5917 = vst [vmem:[#allocation75_spill] sm:$0xff] %v4608_v31  ;;  %v4610_v28 = vpop.f32.mrf.mxu0  ;;  %v4615_v31 = vpop.f32.mrf.mxu1  ;;  %1186 = vmatmul.f32.gmra.mxu1 %v476_v45  ;;  %v497_v45 = vld [vmem:[#allocation2 + $0xb4] sm:$0xff] }
 0x1c4   : > { %5919 = vst [vmem:[#allocation77_spill] sm:$0xff] %v4615_v31  ;;  %v506_v31 = vld [vmem:[#allocation2 + $0x45] sm:$0xff] }
 0x1c6   : > { %1088 = vmatmul.f32.gmra.mxu0 %v449_v30  ;;  %v494_v30 = vld [vmem:[#allocation2 + $0x9c] sm:$0xff] }
 0x1c7   : > { %1328 = vmatmul.f32.gmra.mxu3 %v492_v46 }
 0x1ca   : > { %v1006_v43 = vpop.f32.mrf.mxu3 }
 0x1cb   : > { %v4613_v34 = vadd.f32 %v1006_v43, %v921_v20  ;;  %v4617_v24 = vpop.f32.mrf.mxu0  ;;  %v496_v20 = vld [vmem:[#allocation2 + $0xac] sm:$0xff] }
 0x1cc   : > { %v503_v43 = vld [vmem:[#allocation2 + $0x2d] sm:$0xff] }
 0x1cd   : > { %5918 = vst [vmem:[#allocation76_spill] sm:$0xff] %v4613_v34  ;;  %v505_v34 = vld [vmem:[#allocation2 + $0x3d] sm:$0xff] }
 0x1ce   : > { %1091 = vmatmul.f32.gmra.mxu0 %v450_v56 }
 0x1cf   : > { %1331 = vmatmul.f32.gmra.mxu3 %v493_v8 }
 0x1d2   : > { %v4635_v53 = vpop.f32.mrf.mxu3 }
 0x1d3   : > { %v4619_v14 = vpop.f32.mrf.mxu0  ;;  %5925 = vst [vmem:[#allocation83_spill] sm:$0xff] %v4635_v53 }
 0x1d6   : > { %1094 = vmatmul.f32.gmra.mxu0 %v451_v42  ;;  %v498_v42 = vld [vmem:[#allocation2 + $0xbc] sm:$0xff] }
 0x1d7   : > { %1334 = vmatmul.f32.gmra.mxu3 %v494_v30  ;;  %v504_v30 = vld [vmem:[#allocation2 + $0x35] sm:$0xff] }
 0x1db   : > { %v4621_v54 = vpop.f32.mrf.mxu0 }
 0x1de   : > { %1097 = vmatmul.f32.gmra.mxu0 %v452_v62 }
 0x1df   : > { %1337 = vmatmul.f32.gmra.mxu3 %v495_v63  ;;  %v499_v63 = vld [vmem:[#allocation2 + $0xc4] sm:$0xff] }
 0x1e3   : > { %v4623_v46 = vpop.f32.mrf.mxu0 }
 0x1e6   : > { %1100 = vmatmul.f32.gmra.mxu0 %v453_v4 }
 0x1e7   : > { %1340 = vmatmul.f32.gmra.mxu3 %v496_v20  ;;  %v500_v20 = vld [vmem:[#allocation2 + $0xcc] sm:$0xff] }
 0x1eb   : > { %v4625_v56 = vpop.f32.mrf.mxu0 }
 0x1ec   : > { %5920 = vst [vmem:[#allocation78_spill] sm:$0xff] %v4625_v56 }
 0x1ee   : > { %1378 = vmatmul.f32.vlgmr.msrb.gmra.mxu0 %v503_v43  ;;  %v501_v43 = vld [vmem:[#allocation2 + $0xd4] sm:$0xff] }
 0x1ef   : > { %1343 = vmatmul.f32.gmra.mxu3 %v497_v45 }
 0x1f3   : > { %v4627_v8 = vpop.f32.mrf.mxu0 }
 0x1f4   : > { %5921 = vst [vmem:[#allocation79_spill] sm:$0xff] %v4627_v8 }
 0x1f6   : > { %1381 = vmatmul.f32.gmra.mxu0 %v504_v30  ;;  %v502_v30 = vld [vmem:[#allocation2 + $0xdc] sm:$0xf] }
 0x1f7   : > { %1346 = vmatmul.f32.gmra.mxu3 %v498_v42 }
 0x1fb   : > { %v4629_v62 = vpop.f32.mrf.mxu0 }
 0x1fc   : > { %5922 = vst [vmem:[#allocation80_spill] sm:$0xff] %v4629_v62  ;;  %v508_v62 = vld [vmem:[#allocation2 + $0x55] sm:$0xff] }
 0x1fe   : > { %1384 = vmatmul.f32.gmra.mxu0 %v505_v34 }
 0x1ff   : > { %1349 = vmatmul.f32.gmra.mxu3 %v499_v63  ;;  %v4639_v63 = vpop.f32.mrf.mxu3 }
 0x200   : > { %5927 = vst [vmem:[#allocation85_spill] sm:$0xff] %v4639_v63  ;;  %v512_v63 = vld [vmem:[#allocation2 + $0x75] sm:$0xff] }
 0x203   : > { %v4631_v4 = vpop.f32.mrf.mxu0 }
 0x204   : > { %5923 = vst [vmem:[#allocation81_spill] sm:$0xff] %v4631_v4 }
 0x206   : > { %1387 = vmatmul.f32.gmra.mxu0 %v506_v31 }
 0x207   : > { %1352 = vmatmul.f32.gmra.mxu3 %v500_v20  ;;  %v509_v20 = vld [vmem:[#allocation2 + $0x5d] sm:$0xff]  ;;  %v1015_v53 = vpop.f32.mrf.mxu3 }
 0x20b   : > { %v4633_v45 = vpop.f32.mrf.mxu0 }
 0x20c   : > { %5924 = vst [vmem:[#allocation82_spill] sm:$0xff] %v4633_v45  ;;  %v510_v45 = vld [vmem:[#allocation2 + $0x65] sm:$0xff] }
 0x20e   : > { %1390 = vmatmul.f32.gmra.mxu0 %v507_v48  ;;  %v4647_v48 = vpop.f32.mrf.mxu1 }
 0x20f   : > { %1355 = vmatmul.f32.gmra.mxu3 %v501_v43  ;;  %v511_v43 = vld [vmem:[#allocation2 + $0x6d] sm:$0xff]  ;;  %5931 = vst [vmem:[#allocation89_spill] sm:$0xff] %v4647_v48 }
 0x213   : > { %v4637_v42 = vpop.f32.mrf.mxu0 }
 0x214   : > { %5926 = vst [vmem:[#allocation84_spill] sm:$0xff] %v4637_v42 }
 0x216   : > { %1393 = vmatmul.f32.gmra.mxu0 %v508_v62  ;;  %v1207_v62 = vpop.f32.mrf.mxu2 }
 0x217   : > { %1358 = vmatmul.f32.gmra.mxu3 %v502_v30  ;;  %v1121_v30 = vpop.f32.mrf.mxu1 }
 0x21b   : > { %v4641_v34 = vpop.f32.mrf.mxu0 }
 0x21c   : > { %5928 = vst [vmem:[#allocation86_spill] sm:$0xff] %v4641_v34  ;;  %v1293_v34 = vpop.f32.mrf.mxu3 }
 0x21e   : > { %1396 = vmatmul.f32.gmra.mxu0 %v509_v20  ;;  %v513_v20 = vld [vmem:[#allocation2 + $0x7d] sm:$0xff] }
 0x223   : > { %v4643_v31 = vpop.f32.mrf.mxu0 }
 0x224   : > { %5929 = vst [vmem:[#allocation87_spill] sm:$0xff] %v4643_v31  ;;  %v1124_v31 = vpop.f32.mrf.mxu1  ;;  %v1296_v23 = vpop.f32.mrf.mxu3 }
 0x226   : > { %1399 = vmatmul.f32.gmra.mxu0 %v510_v45  ;;  %v1210_v45 = vpop.f32.mrf.mxu2 }
 0x22b   : > { %v4645_v4 = vpop.f32.mrf.mxu0 }
 0x22c   : > { %5930 = vst [vmem:[#allocation88_spill] sm:$0xff] %v4645_v4  ;;  %v514_v4 = vld [vmem:[#allocation2 + $0x85] sm:$0xff] }
 0x22e   : > { %1402 = vmatmul.f32.gmra.mxu0 %v511_v43  ;;  %v4655_v43 = vpop.f32.mrf.mxu1  ;;  %v4659_v44 = vpop.f32.mrf.mxu2 }
 0x233   : > { %v4649_v42 = vpop.f32.mrf.mxu0 }
 0x234   : > { %5932 = vst [vmem:[#allocation90_spill] sm:$0xff] %v4649_v42  ;;  %v515_v42 = vld [vmem:[#allocation2 + $0x8d] sm:$0xff] }
 0x236   : > { %1405 = vmatmul.f32.gmra.mxu0 %v512_v63  ;;  %v4661_v63 = vpop.f32.mrf.mxu3  ;;  %v4669_v55 = vpop.f32.mrf.mxu2 }
 0x23b   : > { %v4651_v7 = vpop.f32.mrf.mxu0 }
 0x23c   : > { %5933 = vst [vmem:[#allocation91_spill] sm:$0xff] %v4651_v7  ;;  %v4663_v7 = vpop.f32.mrf.mxu1 }
 0x23e   : > { %1408 = vmatmul.f32.gmra.mxu0 %v513_v20  ;;  %v516_v20 = vld [vmem:[#allocation2 + $0x95] sm:$0xff]  ;;  %v4674_v56 = vpop.f32.mrf.mxu3 }
 0x243   : > { %v4653_v8 = vpop.f32.mrf.mxu0 }
 0x244   : > { %5934 = vst [vmem:[#allocation92_spill] sm:$0xff] %v4653_v8  ;;  %v692_v8 = vadd.f32 %v4602_v27, %v4409_v60  ;;  %v4682_v29 = vpop.f32.mrf.mxu1 }
 0x246   : > { %1411 = vmatmul.f32.gmra.mxu0 %v514_v4  ;;  %v778_v4 = vadd.f32 %v4482_v13, %v692_v8  ;;  %v4687_v8 = vpop.f32.mrf.mxu2  ;;  %v4691_v50 = vpop.f32.mrf.mxu3 }
 0x24b   : > { %v4657_v48 = vpop.f32.mrf.mxu0 }
 0x24c   : > { %5935 = vst [vmem:[#allocation93_spill] sm:$0xff] %v4657_v48  ;;  %v758_v48 = vadd.f32 %v4602_v27, %v4553_v58 }
 0x24e   : > { %1414 = vmatmul.f32.gmra.mxu0 %v515_v42  ;;  %v864_v42 = vadd.f32 %v4561_v10, %v778_v4  ;;  %v844_v60 = vadd.f32 %v4446_v12, %v758_v48  ;;  %v518_v12 = vld [vmem:[#allocation2 + $0xa5] sm:$0xff]  ;;  %v698_v48 = vadd.f32 %v4602_v27, %v4423_v3  ;;  %v519_v3 = vld [vmem:[#allocation2 + $0xad] sm:$0xff] }
 0x250   : > { %v930_v10 = vadd.f32 %v4462_v40, %v844_v60  ;;  %v784_v40 = vadd.f32 %v4501_v39, %v698_v48 }
 0x253   : > { %v4665_v37 = vpop.f32.mrf.mxu0 }
 0x254   : > { %5936 = vst [vmem:[#allocation94_spill] sm:$0xff] %v4665_v37  ;;  %v695_v37 = vadd.f32 %v4602_v27, %v4417_v0 }
 0x256   : > { %1417 = vmatmul.f32.gmra.mxu0 %v516_v20  ;;  %v950_v20 = vadd.f32 %v4470_v49, %v864_v42  ;;  %v781_v13 = vadd.f32 %v4491_v25, %v695_v37  ;;  %v4698_v25 = vpop.f32.mrf.mxu1  ;;  %v4703_v42 = vpop.f32.mrf.mxu2 }
 0x258   : > { %v1036_v58 = vadd.f32 %v4589_v2, %v950_v20  ;;  %v867_v4 = vadd.f32 %v4567_v33, %v781_v13  ;;  %v870_v33 = vadd.f32 %v4575_v11, %v784_v40 }
 0x25a   : > { %v1122_v49 = vadd.f32 %v1121_v30, %v1036_v58  ;;  %v953_v37 = vadd.f32 %v4477_v1, %v867_v4  ;;  %v4707_v1 = vpop.f32.mrf.mxu3  ;;  %v956_v39 = vadd.f32 %v4484_v16, %v870_v33  ;;  %v520_v4 = vld [vmem:[#allocation2 + $0xb5] sm:$0xff]  ;;  %v704_v16 = vadd.f32 %v4602_v27, %v4433_v18 }
 0x25b   : > { %v4677_v38 = vpop.f32.mrf.mxu0 }
 0x25c   : > { %5937 = vst [vmem:[#allocation95_spill] sm:$0xff] %v4677_v38  ;;  %v1016_v38 = vadd.f32 %v1015_v53, %v930_v10  ;;  %v1208_v2 = vadd.f32 %v1207_v62, %v1122_v49  ;;  %v1039_v53 = vadd.f32 %v4597_v51, %v953_v37  ;;  %v1042_v62 = vadd.f32 %v4610_v28, %v956_v39  ;;  %v521_v37 = vld [vmem:[#allocation2 + $0xbd] sm:$0xff] }
 0x25e   : > { %1420 = vmatmul.f32.gmra.mxu0 %v517_v22  ;;  %v1294_v60 = vadd.f32 %v1293_v34, %v1208_v2  ;;  %v1125_v30 = vadd.f32 %v1124_v31, %v1039_v53  ;;  %v4717_v58 = vpop.f32.mrf.mxu1  ;;  %v707_v2 = vadd.f32 %v4602_v27, %v4438_v35 }
 0x260   : > { %v1211_v34 = vadd.f32 %v1210_v45, %v1125_v30 }
 0x262   : > { %v1297_v31 = vadd.f32 %v1296_v23, %v1211_v34  ;;  %v4728_v28 = vpop.f32.mrf.mxu3  ;;  %v523_v34 = vld [vmem:[#allocation2 + $0xcd] sm:$0xff] }
 0x263   : > { %v1101_v0 = vpop.f32.mrf.mxu0 }
 0x264   : > { %v4695_v22 = vadd.f32 %v1101_v0, %v1016_v38  ;;  %v701_v38 = vadd.f32 %v4602_v27, %v4428_v6  ;;  %v1128_v0 = vadd.f32 %v4655_v43, %v1042_v62 }
 0x266   : > { %1423 = vmatmul.f32.gmra.mxu0 %v518_v12  ;;  %v787_v51 = vadd.f32 %v4511_v59, %v701_v38  ;;  %v4723_v12 = vpop.f32.mrf.mxu2  ;;  %v1214_v18 = vadd.f32 %v4659_v44, %v1128_v0  ;;  %v4736_v43 = vpop.f32.mrf.mxu1  ;;  %v710_v38 = vadd.f32 %v4602_v27, %v4443_v57  ;;  %v5938_v0 = vld [vmem:[#allocation40_spill] sm:$0xff] }
 0x268   : > { %v873_v6 = vadd.f32 %v4581_v15, %v787_v51  ;;  %v790_v15 = vadd.f32 %v4519_v21, %v704_v16  ;;  %v1300_v49 = vadd.f32 %v4661_v63, %v1214_v18  ;;  %v793_v63 = vadd.f32 %v4527_v36, %v707_v2 }
 0x26a   : > { %v959_v59 = vadd.f32 %v4493_v26, %v873_v6  ;;  %v876_v40 = vadd.f32 %v4468_v41, %v790_v15  ;;  %v713_v6 = vadd.f32 %v4602_v27, %v4448_v17 }
 0x26b   : > { %v1379_v20 = vpop.f32.mrf.mxu0 }
 0x26c   : > { %v4709_v13 = vadd.f32 %v1379_v20, %v1294_v60  ;;  %v1045_v45 = vadd.f32 %v4617_v24, %v959_v59  ;;  %v962_v21 = vadd.f32 %v4499_v32, %v876_v40  ;;  %v4754_v60 = vpop.f32.mrf.mxu3  ;;  %v522_v20 = vld [vmem:[#allocation2 + $0xc5] sm:$0xff]  ;;  %v5942_v40 = vld [vmem:[#allocation78_spill] sm:$0xff] }
 0x26e   : > { %1426 = vmatmul.f32.gmra.mxu0 %v519_v3  ;;  %1450 = vadd.xlane.f32.xlu0 %v4709_v13  ;;  %v1498_v11 = vmul.f32 %v4709_v13, %v4709_v13  ;;  %v1131_v53 = vadd.f32 %v4663_v7, %v1045_v45  ;;  %v4746_v44 = vpop.f32.mrf.mxu2  ;;  %v1048_v35 = vadd.f32 %v4619_v14, %v962_v21  ;;  %v4761_v39 = vpop.f32.mrf.mxu1 }
 0x26f   : > { %v879_v3 = vadd.f32 %v4475_v61, %v793_v63  ;;  %v5943_v63 = vld [vmem:[#allocation42_spill] sm:$0xff] }
 0x270   : > { %1521 = vadd.xlane.f32.xlu1 %v1498_v11  ;;  %v1217_v41 = vadd.f32 %v4669_v55, %v1131_v53  ;;  %v1134_v30 = vadd.f32 %v4682_v29, %v1048_v35  ;;  %v5944_v35 = vld [vmem:[#allocation34_spill] sm:$0xff] }
 0x271   : > { %v965_v55 = vadd.f32 %v4507_v52, %v879_v3 }
 0x272   : > { %v1303_v7 = vadd.f32 %v4674_v56, %v1217_v41  ;;  %v796_v56 = vadd.f32 %v4537_v47, %v710_v38  ;;  %v1220_v61 = vadd.f32 %v4687_v8, %v1134_v30 }
 0x273   : > { %v1382_v10 = vpop.f32.mrf.mxu0  ;;  %v1051_v57 = vadd.f32 %v4621_v54, %v965_v55 }
 0x274   : > { %v4725_v48 = vadd.f32 %v1382_v10, %v1297_v31  ;;  %v1306_v29 = vadd.f32 %v4691_v50, %v1220_v61  ;;  %v4775_v51 = vpop.f32.mrf.mxu3  ;;  %v882_v62 = vadd.f32 %v4486_v19, %v796_v56  ;;  %v799_v10 = vadd.f32 %v4547_v5, %v713_v6  ;;  %v5947_v61 = vld [vmem:[#allocation79_spill] sm:$0xff] }
 0x275   : > { %v1137_v47 = vadd.f32 %v4698_v25, %v1051_v57  ;;  %v5949_v6 = vld [vmem:[#allocation35_spill] sm:$0xff] }
 0x276   : > { %1429 = vmatmul.f32.gmra.mxu0 %v520_v4  ;;  %1452 = vadd.xlane.f32.xlu0 %v4725_v48  ;;  %v1499_v23 = vmul.f32 %v4725_v48, %v4725_v48  ;;  %v4772_v11 = vpop.f32.mrf.mxu2  ;;  %v968_v54 = vadd.f32 %v4515_v9, %v882_v62  ;;  %v4784_v8 = vpop.f32.mrf.mxu1  ;;  %v524_v9 = vld [vmem:[#allocation2 + $0xd5] sm:$0xff]  ;;  %v885_v59 = vadd.f32 %v5938_v0, %v799_v10 }
 0x277   : > { %v1223_v4 = vadd.f32 %v4703_v42, %v1137_v47  ;;  %v5940_v42 = vld [vmem:[#allocation46_spill] sm:$0xff]  ;;  %v722_v47 = vadd.f32 %v4602_v27, %v5949_v6  ;;  %v5950_v10 = vld [vmem:[#allocation51_spill] sm:$0xff] }
 0x278   : > { %1523 = vadd.xlane.f32.xlu2 %v1499_v23  ;;  %v1054_v19 = vadd.f32 %v4623_v46, %v968_v54  ;;  %v5939_v23 = vld [vmem:[#allocation32_spill] sm:$0xff]  ;;  %v971_v46 = vadd.f32 %v5940_v42, %v885_v59 }
 0x279   : > { %v1309_v25 = vadd.f32 %v4707_v1, %v1223_v4  ;;  %v716_v15 = vadd.f32 %v4602_v27, %v5939_v23  ;;  %v5954_v42 = vld [vmem:[#allocation36_spill] sm:$0xff] }
 0x27a   : > { %v1140_v18 = vadd.f32 %v4717_v58, %v1054_v19  ;;  %v1057_v2 = vadd.f32 %v5942_v40, %v971_v46  ;;  %v725_v46 = vadd.f32 %v4602_v27, %v5954_v42 }
 0x27b   : > { %v1385_v26 = vpop.f32.mrf.mxu0 }
 0x27c   : > { %v4743_v33 = vadd.f32 %v1385_v26, %v1300_v49  ;;  %v1320_v5 = vpop.f32.mrf.mxu3  ;;  %v5941_v26 = vld [vmem:[#allocation58_spill] sm:$0xff] }
 0x27d   : > { %v802_v1 = vadd.f32 %v5941_v26, %v716_v15  ;;  %v5953_v15 = vld [vmem:[#allocation47_spill] sm:$0xff] }
 0x27e   : > { %1432 = vmatmul.f32.gmra.mxu0 %v521_v37  ;;  %1454 = vadd.xlane.f32.xlu1 %v4743_v33  ;;  %v1500_v24 = vmul.f32 %v4743_v33, %v4743_v33  ;;  %v1234_v17 = vpop.f32.mrf.mxu2  ;;  %v1226_v37 = vadd.f32 %v4723_v12, %v1140_v18  ;;  %v1151_v53 = vpop.f32.mrf.mxu1  ;;  %v5945_v12 = vld [vmem:[#allocation49_spill] sm:$0xff] }
 0x27f   : > { %v888_v41 = vadd.f32 %v5943_v63, %v802_v1 }
 0x280   : > { %1525 = vadd.xlane.f32.xlu0 %v1500_v24  ;;  %v1312_v58 = vadd.f32 %v4728_v28, %v1226_v37  ;;  %v525_v24 = vld [vmem:[#allocation2 + $0xdd] sm:$0xf]  ;;  %v5946_v28 = vld [vmem:[#allocation61_spill] sm:$0xff]  ;;  %v5955_v37 = vld [vmem:[#allocation54_spill] sm:$0xff] }
 0x281   : > { %v974_v38 = vadd.f32 %v5945_v12, %v888_v41  ;;  %v5959_v12 = vld [vmem:[#allocation37_spill] sm:$0xff] }
 0x283   : > { %v1388_v32 = vpop.f32.mrf.mxu0  ;;  %v1060_v57 = vadd.f32 %v5947_v61, %v974_v38  ;;  %v728_v38 = vadd.f32 %v4602_v27, %v5959_v12 }
 0x284   : > { %v4763_v36 = vadd.f32 %v1388_v32, %v1303_v7  ;;  %v719_v7 = vadd.f32 %v4602_v27, %v5944_v35  ;;  %v1143_v32 = vadd.f32 %v4736_v43, %v1057_v2  ;;  %v1323_v30 = vpop.f32.mrf.mxu3  ;;  %v5956_v2 = vld [vmem:[#allocation68_spill] sm:$0xff] }
 0x285   : > { %v1146_v54 = vadd.f32 %v4761_v39, %v1060_v57  ;;  %v5961_v57 = vld [vmem:[#allocation71_spill] sm:$0xff] }
 0x286   : > { %1435 = vmatmul.f32.gmra.mxu0 %v522_v20  ;;  %1456 = vadd.xlane.f32.xlu1 %v4763_v36  ;;  %v1501_v14 = vmul.f32 %v4763_v36, %v4763_v36  ;;  %v1237_v20 = vpop.f32.mrf.mxu2  ;;  %v1229_v56 = vadd.f32 %v4746_v44, %v1143_v32  ;;  %v1154_v43 = vpop.f32.mrf.mxu1 }
 0x288   : > { %1527 = vadd.xlane.f32.xlu2 %v1501_v14  ;;  %v805_v14 = vadd.f32 %v5946_v28, %v719_v7  ;;  %v5958_v7 = vld [vmem:[#allocation50_spill] sm:$0xff] }
 0x28b   : > { %v1391_v52 = vpop.f32.mrf.mxu0 }
 0x28c   : > { %v4781_v31 = vadd.f32 %v1391_v52, %v1306_v29  ;;  %v1315_v29 = vadd.f32 %v4754_v60, %v1229_v56  ;;  %v1326_v59 = vpop.f32.mrf.mxu3 }
 0x28e   : > { %1438 = vmatmul.f32.gmra.mxu0 %v523_v34  ;;  %v1502_v50 = vmul.f32 %v4781_v31, %v4781_v31  ;;  %v5948_v34 = vld [vmem:[#allocation44_spill] sm:$0xff]  ;;  %v1240_v4 = vpop.f32.mrf.mxu2  ;;  %v1157_v26 = vpop.f32.mrf.mxu1 }
 0x28f   : > { %v891_v62 = vadd.f32 %v5948_v34, %v805_v14  ;;  %v5960_v14 = vld [vmem:[#allocation57_spill] sm:$0xff] }
 0x290   : > { %1458 = vadd.xlane.f32.xlu2 %v4781_v31  ;;  %1529 = vadd.xlane.f32.xlu1 %v1502_v50 }
 0x291   : > { %v977_v44 = vadd.f32 %v5950_v10, %v891_v62  ;;  %v5964_v10 = vld [vmem:[#allocation38_spill] sm:$0xff] }
 0x293   : > { %v1394_v16 = vpop.f32.mrf.mxu0 }
 0x294   : > { %v4797_v45 = vadd.f32 %v1394_v16, %v1309_v25  ;;  %v5951_v25 = vld [vmem:[#allocation65_spill] sm:$0xff]  ;;  %v1232_v16 = vadd.f32 %v4772_v11, %v1146_v54  ;;  %v1329_v35 = vpop.f32.mrf.mxu3 }
 0x295   : > { %v808_v60 = vadd.f32 %v5951_v25, %v722_v47 }
 0x296   : > { %1441 = vmatmul.f32.gmra.mxu0 %v524_v9  ;;  %v1503_v49 = vmul.f32 %v4797_v45, %v4797_v45  ;;  %v5952_v9 = vld [vmem:[#allocation80_spill] sm:$0xff]  ;;  %v1318_v39 = vadd.f32 %v4775_v51, %v1232_v16  ;;  %v811_v51 = vadd.f32 %v5956_v2, %v725_v46  ;;  %v1243_v63 = vpop.f32.mrf.mxu2  ;;  %v1160_v61 = vpop.f32.mrf.mxu1  ;;  %v5965_v16 = vld [vmem:[#allocation59_spill] sm:$0xff] }
 0x297   : > { %v1063_v0 = vadd.f32 %v5952_v9, %v977_v44  ;;  %v894_v18 = vadd.f32 %v5953_v15, %v808_v60  ;;  %v731_v44 = vadd.f32 %v4602_v27, %v5964_v10  ;;  %v5969_v2 = vld [vmem:[#allocation39_spill] sm:$0xff] }
 0x298   : > { %1460 = vadd.xlane.f32.xlu2 %v4797_v45  ;;  %1531 = vadd.xlane.f32.xlu0 %v1503_v49  ;;  %v897_v32 = vadd.f32 %v5958_v7, %v811_v51  ;;  %v734_v51 = vadd.f32 %v4602_v27, %v5969_v2  ;;  %v5972_v7 = vld [vmem:[#allocation77_spill] sm:$0xff] }
 0x299   : > { %v1149_v49 = vadd.f32 %v4784_v8, %v1063_v0  ;;  %v980_v40 = vadd.f32 %v5955_v37, %v894_v18  ;;  %v5966_v0 = vld [vmem:[#allocation74_spill] sm:$0xff]  ;;  %v5983_v2 = vld [vmem:[#allocation45_spill] sm:$0xff] }
 0x29a   : > { %v983_v56 = vadd.f32 %v5960_v14, %v897_v32 }
 0x29b   : > { %v1397_v21 = vpop.f32.mrf.mxu0 }
 0x29c   : > { %v4811_v3 = vadd.f32 %v1397_v21, %v1312_v58  ;;  %v1235_v58 = vadd.f32 %v1234_v17, %v1149_v49  ;;  %v5957_v21 = vld [vmem:[#allocation81_spill] sm:$0xff]  ;;  %v1332_v25 = vpop.f32.mrf.mxu3 }
 0x29e   : > { %1444 = vmatmul.f32.gmra.mxu0 %v525_v24  ;;  %v1504_v55 = vmul.f32 %v4811_v3, %v4811_v3  ;;  %v1066_v24 = vadd.f32 %v5957_v21, %v980_v40  ;;  %v1321_v41 = vadd.f32 %v1320_v5, %v1235_v58  ;;  %v814_v5 = vadd.f32 %v5961_v57, %v728_v38  ;;  %v1246_v62 = vpop.f32.mrf.mxu2  ;;  %v1163_v18 = vpop.f32.mrf.mxu1  ;;  %v5970_v58 = vld [vmem:[#allocation62_spill] sm:$0xff]  ;;  %v5974_v57 = vld [vmem:[#allocation60_spill] sm:$0xff] }
 0x2a0   : > { %1533 = vadd.xlane.f32.xlu2 %v1504_v55  ;;  %1462 = vadd.xlane.f32.xlu0 %v4811_v3  ;;  %v1152_v55 = vadd.f32 %v1151_v53, %v1066_v24  ;;  %v5963_v53 = vld [vmem:[#allocation53_spill] sm:$0xff] }
 0x2a1   : > { %v900_v54 = vadd.f32 %v5963_v53, %v814_v5 }
 0x2a3   : > { %v1400_v52 = vpop.f32.mrf.mxu0  ;;  %v986_v9 = vadd.f32 %v5965_v16, %v900_v54  ;;  %v5977_v54 = vld [vmem:[#allocation87_spill] sm:$0xff] }
 0x2a4   : > { %v4825_v50 = vadd.f32 %v1400_v52, %v1315_v29  ;;  %v1238_v29 = vadd.f32 %v1237_v20, %v1152_v55  ;;  %v5962_v52 = vld [vmem:[#allocation82_spill] sm:$0xff]  ;;  %v1335_v24 = vpop.f32.mrf.mxu3  ;;  %v5973_v55 = vld [vmem:[#allocation41_spill] sm:$0xff] }
 0x2a5   : > { %v1069_v34 = vadd.f32 %v5962_v52, %v983_v56  ;;  %v737_v14 = vadd.f32 %v4602_v27, %v5973_v55 }
 0x2a6   : > { %1464 = vadd.xlane.f32.xlu1 %v4825_v50  ;;  %v1505_v19 = vmul.f32 %v4825_v50, %v4825_v50  ;;  %v1324_v6 = vadd.f32 %v1323_v30, %v1238_v29  ;;  %v1249_v40 = vpop.f32.mrf.mxu2  ;;  %v1166_v32 = vpop.f32.mrf.mxu1 }
 0x2a8   : > { %1535 = vadd.xlane.f32.xlu0 %v1505_v19  ;;  %v1155_v19 = vadd.f32 %v1154_v43, %v1069_v34  ;;  %v5968_v43 = vld [vmem:[#allocation56_spill] sm:$0xff] }
 0x2a9   : > { %v5976_v34 = vld [vmem:[#allocation64_spill] sm:$0xff] }
 0x2aa   : > { %v1241_v30 = vadd.f32 %v1240_v4, %v1155_v19  ;;  %v5978_v19 = vld [vmem:[#allocation63_spill] sm:$0xff] }
 0x2ab   : > { %v1403_v23 = vpop.f32.mrf.mxu0 }
 0x2ac   : > { %v4839_v1 = vadd.f32 %v1403_v23, %v1318_v39  ;;  %v817_v39 = vadd.f32 %v5966_v0, %v731_v44  ;;  %v5967_v23 = vld [vmem:[#allocation84_spill] sm:$0xff]  ;;  %v1327_v42 = vadd.f32 %v1326_v59, %v1241_v30  ;;  %v5971_v59 = vld [vmem:[#allocation86_spill] sm:$0xff]  ;;  %v1338_v53 = vpop.f32.mrf.mxu3 }
 0x2ad   : > { %v1072_v15 = vadd.f32 %v5967_v23, %v986_v9 }
 0x2ae   : > { %1466 = vadd.xlane.f32.xlu2 %v4839_v1  ;;  %v1506_v11 = vmul.f32 %v4839_v1, %v4839_v1  ;;  %v903_v49 = vadd.f32 %v5968_v43, %v817_v39  ;;  %v1252_v29 = vpop.f32.mrf.mxu2  ;;  %v5980_v39 = vld [vmem:[#allocation67_spill] sm:$0xff] }
 0x2af   : > { %v1158_v37 = vadd.f32 %v1157_v26, %v1072_v15  ;;  %v820_v26 = vadd.f32 %v5972_v7, %v734_v51  ;;  %v5981_v15 = vld [vmem:[#allocation26_spill] sm:$0xff]  ;;  %v743_v51 = vadd.f32 %v4602_v27, %v5983_v2 }
 0x2b0   : > { %1537 = vadd.xlane.f32.xlu1 %v1506_v11  ;;  %v989_v21 = vadd.f32 %v5970_v58, %v903_v49 }
 0x2b1   : > { %v906_v5 = vadd.f32 %v5974_v57, %v820_v26 }
 0x2b3   : > { %v1406_v8 = vpop.f32.mrf.mxu0 }
 0x2b4   : > { %v4850_v28 = vadd.f32 %v1406_v8, %v1321_v41  ;;  %v1244_v41 = vadd.f32 %v1243_v63, %v1158_v37  ;;  %v1075_v8 = vadd.f32 %v5971_v59, %v989_v21  ;;  %v5975_v63 = vld [vmem:[#allocation89_spill] sm:$0xff]  ;;  %v1341_v37 = vpop.f32.mrf.mxu3  ;;  %v5984_v21 = vld [vmem:[#allocation66_spill] sm:$0xff] }
 0x2b5   : > { %v823_v52 = vadd.f32 %v5975_v63, %v737_v14  ;;  %v5985_v59 = vld [vmem:[#allocation70_spill] sm:$0xff] }
 0x2b6   : > { %1468 = vadd.xlane.f32.xlu0 %v4850_v28  ;;  %v1507_v17 = vmul.f32 %v4850_v28, %v4850_v28  ;;  %v1330_v12 = vadd.f32 %v1329_v35, %v1244_v41  ;;  %v1161_v56 = vadd.f32 %v1160_v61, %v1075_v8  ;;  %v5979_v61 = vld [vmem:[#allocation43_spill] sm:$0xff]  ;;  %v1255_v43 = vpop.f32.mrf.mxu2  ;;  %v5987_v14 = vld [vmem:[#allocation90_spill] sm:$0xff] }
 0x2b7   : > { %v909_v16 = vadd.f32 %v5978_v19, %v823_v52  ;;  %v740_v9 = vadd.f32 %v4602_v27, %v5979_v61  ;;  %v5988_v52 = vld [vmem:[#allocation69_spill] sm:$0xff]  ;;  %v5992_v61 = vld [vmem:[#allocation91_spill] sm:$0xff] }
 0x2b8   : > { %1539 = vadd.xlane.f32.xlu2 %v1507_v17 }
 0x2b9   : > { %v995_v30 = vadd.f32 %v5980_v39, %v909_v16 }
 0x2bb   : > { %v1409_v47 = vpop.f32.mrf.mxu0 }
 0x2bc   : > { %v4861_v60 = vadd.f32 %v1409_v47, %v1324_v6  ;;  %v992_v6 = vadd.f32 %v5976_v34, %v906_v5  ;;  %v1247_v47 = vadd.f32 %v1246_v62, %v1161_v56 }
 0x2be   : > { %1470 = vadd.xlane.f32.xlu1 %v4861_v60  ;;  %v1508_v20 = vmul.f32 %v4861_v60, %v4861_v60  ;;  %v1078_v35 = vadd.f32 %v5977_v54, %v992_v6  ;;  %v1333_v10 = vadd.f32 %v1332_v25, %v1247_v47  ;;  %v5982_v25 = vld [vmem:[#allocation88_spill] sm:$0xff]  ;;  %v1258_v57 = vpop.f32.mrf.mxu2  ;;  %v1344_v54 = vpop.f32.mrf.mxu3 }
 0x2c0   : > { %1541 = vadd.xlane.f32.xlu0 %v1508_v20  ;;  %v1169_v20 = vpop.f32.mrf.mxu1  ;;  %v1164_v23 = vadd.f32 %v1163_v18, %v1078_v35 }
 0x2c2   : > { %v1250_v49 = vadd.f32 %v1249_v40, %v1164_v23 }
 0x2c3   : > { %v1412_v46 = vpop.f32.mrf.mxu0 }
 0x2c4   : > { %v4870_v11 = vadd.f32 %v1412_v46, %v1327_v42  ;;  %v826_v42 = vadd.f32 %v5981_v15, %v740_v9  ;;  %v1081_v46 = vadd.f32 %v5982_v25, %v995_v30  ;;  %v1336_v41 = vadd.f32 %v1335_v24, %v1250_v49  ;;  %v5989_v24 = vld [vmem:[#allocation48_spill] sm:$0xff] }
 0x2c5   : > { %v746_v34 = vadd.f32 %v4602_v27, %v5989_v24  ;;  %v5996_v24 = vld [vmem:[#allocation52_spill] sm:$0xff] }
 0x2c6   : > { %1472 = vadd.xlane.f32.xlu2 %v4870_v11  ;;  %v1509_v4 = vmul.f32 %v4870_v11, %v4870_v11  ;;  %v1167_v18 = vadd.f32 %v1166_v32, %v1081_v46  ;;  %v5993_v46 = vld [vmem:[#allocation73_spill] sm:$0xff] }
 0x2c8   : > { %1543 = vadd.xlane.f32.xlu1 %v1509_v4  ;;  %v912_v4 = vadd.f32 %v5984_v21, %v826_v42  ;;  %v1172_v7 = vpop.f32.mrf.mxu1  ;;  %v1253_v55 = vadd.f32 %v1252_v29, %v1167_v18 }
 0x2ca   : > { %v998_v8 = vadd.f32 %v5985_v59, %v912_v4  ;;  %v1339_v5 = vadd.f32 %v1338_v53, %v1253_v55  ;;  %v5991_v53 = vld [vmem:[#allocation28_spill] sm:$0xff] }
 0x2cb   : > { %v1415_v38 = vpop.f32.mrf.mxu0  ;;  %v832_v16 = vadd.f32 %v5991_v53, %v746_v34  ;;  %v752_v34 = vadd.f32 %v4602_v27, %v5996_v24 }
 0x2cc   : > { %v4882_v17 = vadd.f32 %v1415_v38, %v1330_v12  ;;  %v5986_v12 = vld [vmem:[#allocation27_spill] sm:$0xff]  ;;  %v1084_v56 = vadd.f32 %v5987_v14, %v998_v8 }
 0x2cd   : > { %v829_v38 = vadd.f32 %v5986_v12, %v743_v51  ;;  %v918_v49 = vadd.f32 %v5993_v46, %v832_v16 }
 0x2ce   : > { %1474 = vadd.xlane.f32.xlu0 %v4882_v17  ;;  %v1170_v47 = vadd.f32 %v1169_v20, %v1084_v56 }
 0x2cf   : > { %v915_v32 = vadd.f32 %v5988_v52, %v829_v38 }
 0x2d0   : > { %v1256_v30 = vadd.f32 %v1255_v43, %v1170_v47  ;;  %v1175_v23 = vpop.f32.mrf.mxu1 }
 0x2d2   : > { %v1342_v15 = vadd.f32 %v1341_v37, %v1256_v30  ;;  %v1347_v37 = vpop.f32.mrf.mxu3  ;;  %v5999_v30 = vld [vmem:[#allocation93_spill] sm:$0xff] }
 0x2d3   : > { %v1418_v44 = vpop.f32.mrf.mxu0 }
 0x2d4   : > { %v4892_v0 = vadd.f32 %v1418_v44, %v1333_v10  ;;  %v5990_v10 = vld [vmem:[#allocation72_spill] sm:$0xff] }
 0x2d5   : > { %v1001_v44 = vadd.f32 %v5990_v10, %v915_v32 }
 0x2d6   : > { %1476 = vadd.xlane.f32.xlu1 %v4892_v0  ;;  %v1511_v62 = vmul.f32 %v4892_v0, %v4892_v0 }
 0x2d7   : > { %v1087_v9 = vadd.f32 %v5992_v61, %v1001_v44  ;;  %v5997_v61 = vld [vmem:[#allocation29_spill] sm:$0xff] }
 0x2d8   : > { %1547 = vadd.xlane.f32.xlu2 %v1511_v62 }
 0x2d9   : > { %v1173_v2 = vadd.f32 %v1172_v7, %v1087_v9  ;;  %v5995_v7 = vld [vmem:[#allocation92_spill] sm:$0xff]  ;;  %v838_v9 = vadd.f32 %v5997_v61, %v752_v34 }
 0x2db   : > { %v1421_v58 = vpop.f32.mrf.mxu0  ;;  %v1259_v55 = vadd.f32 %v1258_v57, %v1173_v2 }
 0x2dc   : > { %v4904_v26 = vadd.f32 %v1421_v58, %v1336_v41  ;;  %v1261_v58 = vpop.f32.mrf.mxu2  ;;  %v5994_v41 = vld [vmem:[#allocation75_spill] sm:$0xff] }
 0x2dd   : > { %v1004_v59 = vadd.f32 %v5994_v41, %v918_v49 }
 0x2df   : > { %v1090_v12 = vadd.f32 %v5995_v7, %v1004_v59 }
 0x2e0   : > { %1478 = vadd.xlane.f32.xlu2 %v4904_v26 }
 0x2e1   : > { %v1451_v40 = vpop.xlane.xlu0 %1450 }
 0x2e2   : > { %v4909_v63 = vmul.f32 0.25, %v1451_v40  ;;  %v1178_v40 = vpop.f32.mrf.mxu1 }
 0x2e3   : > { %v1424_v6 = vpop.f32.mrf.mxu0  ;;  %v1522_v39 = vpop.xlane.xlu1 %1521 }
 0x2e4   : > { %v4914_v35 = vadd.f32 %v1424_v6, %v1339_v5  ;;  %v1591_v29 = vmul.f32 4.0, %v4909_v63  ;;  %v1345_v5 = vadd.f32 %v1344_v54, %v1259_v55  ;;  %v1176_v6 = vadd.f32 %v1175_v23, %v1090_v12  ;;  %v1264_v53 = vpop.f32.mrf.mxu2 }
 0x2e6   : > { %v1614_v19 = vmul.f32 %v1591_v29, %v4909_v63  ;;  %1480 = vadd.xlane.f32.xlu0 %v4914_v35  ;;  %v1513_v43 = vmul.f32 %v4914_v35, %v4914_v35 }
 0x2e8   : > { %v1637_v62 = vsub.f32 %v1522_v39, %v1614_v19  ;;  %v5998_v39 = vld [vmem:[#allocation76_spill] sm:$0xff] }
 0x2e9   : > { %v1453_v20 = vpop.xlane.xlu0 %1452  ;;  %v1093_v23 = vadd.f32 %v5999_v30, %v5998_v39 }
 0x2ea   : > { %v1660_v42 = vmul.f32 0.33333334, %v1637_v62  ;;  %v4922_v25 = vmul.f32 0.25, %v1453_v20 }
 0x2eb   : > { %v1427_v51 = vpop.f32.mrf.mxu0  ;;  %v1524_v38 = vpop.xlane.xlu2 %1523  ;;  %v1179_v12 = vadd.f32 %v1178_v40, %v1093_v23 }
 0x2ec   : > { %v4925_v21 = vadd.f32 0.001, %v1660_v42  ;;  %v4927_v4 = vadd.f32 %v1427_v51, %v1342_v15  ;;  %v1592_v18 = vmul.f32 4.0, %v4922_v25  ;;  %v1262_v15 = vadd.f32 %v1261_v58, %v1176_v6  ;;  %v1350_v42 = vpop.f32.mrf.mxu3  ;;  %v6000_v51 = vld [vmem:[#allocation55_spill] sm:$0xff]  ;;  %v1181_v58 = vpop.f32.mrf.mxu1 }
 0x2ed   : > { %v1265_v30 = vadd.f32 %v1264_v53, %v1179_v12 }
 0x2ee   : > { %3849 = vrsqrt.f32 %v4925_v21  ;;  %v1615_v8 = vmul.f32 %v1592_v18, %v4922_v25  ;;  %1551 = vadd.xlane.f32.xlu0 %v1513_v43  ;;  %1482 = vadd.xlane.f32.xlu1 %v4927_v4  ;;  %v1514_v57 = vmul.f32 %v4927_v4, %v4927_v4  ;;  %v755_v18 = vadd.f32 %v4602_v27, %v6000_v51 }
 0x2ef   : > { %v1348_v43 = vadd.f32 %v1347_v37, %v1262_v15  ;;  %v6002_v37 = vld [vmem:[#allocation83_spill] sm:$0xff]  ;;  %vm1735_vm1 = vweird.f32 %v4925_v21  ;;  %v6005_v15 = vld [vmem:[#allocation33_spill] sm:$0xff] }
 0x2f0   : > { %v1638_v14 = vsub.f32 %v1524_v38, %v1615_v8  ;;  %v6001_v8 = vld [vmem:[#allocation31_spill] sm:$0xff] }
 0x2f1   : > { %v1455_v56 = vpop.xlane.xlu1 %1454  ;;  %v924_v7 = vadd.f32 %v6001_v8, %v838_v9 }
 0x2f2   : > { %v1661_v52 = vmul.f32 0.33333334, %v1638_v14  ;;  %v4937_v32 = vmul.f32 0.25, %v1455_v56 }
 0x2f3   : > { %v1430_v47 = vpop.f32.mrf.mxu0  ;;  %v1526_v20 = vpop.xlane.xlu0 %1525  ;;  %v1010_v34 = vadd.f32 %v6002_v37, %v924_v7 }
 0x2f4   : > { %v3850_v29 = vpop.eup %3849  ;;  %v4941_v10 = vadd.f32 0.001, %v1661_v52  ;;  %v4943_v44 = vadd.f32 %v1430_v47, %v1345_v5  ;;  %v1593_v19 = vmul.f32 4.0, %v4937_v32  ;;  %v6003_v47 = vld [vmem:[#allocation30_spill] sm:$0xff]  ;;  %v1184_v37 = vpop.f32.mrf.mxu1 }
 0x2f5   : > { %v1730_v54 = vmul.f32 %v3850_v29, %v4925_v21  ;;  %vm1736_vm0 = vweird.f32 %v3850_v29  ;;  %v6004_v21 = vld [vmem:[#allocation94_spill] sm:$0xff] }
 0x2f6   : > { %3851 = vrsqrt.f32 %v4941_v10  ;;  %v1616_v16 = vmul.f32 %v1593_v19, %v4937_v32  ;;  %1484 = vadd.xlane.f32.xlu2 %v4943_v44  ;;  %1553 = vadd.xlane.f32.xlu1 %v1514_v57  ;;  %v1515_v27 = vmul.f32 %v4943_v44, %v4943_v44  ;;  %v841_v19 = vadd.f32 %v6003_v47, %v755_v18  ;;  %vm1737_vm2 = vmor %vm1735_vm1, %vm1736_vm0 }
 0x2f7   : > { %v1731_v62 = vmul.f32 %v3850_v29, %v1730_v54  ;;  %v1683_v57 = vsub.f32 %v4709_v13, %v4909_v63  ;;  %v4976_v54 = vld [vmem:[%s5837_s3] ss:$0 sm:$0xff]  ;;  %v1096_v61 = vadd.f32 %v6004_v21, %v1010_v34  ;;  %v1267_v13 = vpop.f32.mrf.mxu2  ;;  %vm1745_vm4 = vweird.f32 %v4941_v10 }
 0x2f8   : > { %v1639_v46 = vsub.f32 %v1526_v20, %v1616_v16  ;;  %v4986_v63 = vld [vmem:[%s5838_s4] ss:$0 sm:$0xff] }
 0x2f9   : > { %v1732_v49 = vmul.f32 0.5, %v1731_v62  ;;  %v1457_v2 = vpop.xlane.xlu1 %1456 }
 0x2fa   : > { %v1662_v41 = vmul.f32 0.33333334, %v1639_v46  ;;  %v4957_v59 = vmul.f32 0.25, %v1457_v2  ;;  %v927_v46 = vadd.f32 %v6005_v15, %v841_v19  ;;  %v1353_v2 = vpop.f32.mrf.mxu3 }
 0x2fb   : > { %v1733_v38 = vsub.f32 1.5, %v1732_v49  ;;  %v1433_v55 = vpop.f32.mrf.mxu0  ;;  %v1528_v14 = vpop.xlane.xlu2 %1527  ;;  %v1351_v49 = vadd.f32 %v1350_v42, %v1265_v30 }
 0x2fc   : > { %v3852_v56 = vpop.eup %3851  ;;  %v4960_v5 = vadd.f32 0.001, %v1662_v41  ;;  %v4962_v52 = vadd.f32 %v1433_v55, %v1348_v43  ;;  %v1594_v24 = vmul.f32 4.0, %v4957_v59  ;;  %v1182_v43 = vadd.f32 %v1181_v58, %v1096_v61 }
 0x2fd   : > { %v1734_v6 = vmul.f32 %v3850_v29, %v1733_v38  ;;  %v1740_v40 = vmul.f32 %v3852_v56, %v4941_v10  ;;  %vm1746_vm3 = vweird.f32 %v3852_v56 }
 0x2fe   : > { %3853 = vrsqrt.f32 %v4960_v5  ;;  %v1617_v16 = vmul.f32 %v1594_v24, %v4957_v59  ;;  %1555 = vadd.xlane.f32.xlu2 %v1515_v27  ;;  %1486 = vadd.xlane.f32.xlu0 %v4962_v52  ;;  %v1516_v8 = vmul.f32 %v4962_v52, %v4962_v52  ;;  %vm1747_vm5 = vmor %vm1745_vm4, %vm1746_vm3  ;;  %vm1755_vm7 = vweird.f32 %v4960_v5 }
 0x2ff   : > { %v1738_v9 = vsel %vm1737_vm2, %v3850_v29, %v1734_v6  ;;  %v1741_v39 = vmul.f32 %v3852_v56, %v1740_v40  ;;  %v1684_v6 = vsub.f32 %v4725_v48, %v4922_v25  ;;  %v6007_v40 = vld [vmem:[#allocation95_spill] sm:$0xff]  ;;  %v1270_v48 = vpop.f32.mrf.mxu2 }
 0x300   : > { %v1959_v23 = vmul.f32 %v1738_v9, %v1683_v57  ;;  %v1640_v62 = vsub.f32 %v1528_v14, %v1617_v16  ;;  %v6006_v14 = vld [vmem:[#allocation85_spill] sm:$0xff]  ;;  %v1268_v16 = vadd.f32 %v1267_v13, %v1182_v43 }
 0x301   : > { %v1742_v20 = vmul.f32 0.5, %v1741_v39  ;;  %v1013_v24 = vadd.f32 %v6006_v14, %v927_v46 }
 0x302   : > { %v1985_v51 = vmul.f32 %v4976_v54, %v1959_v23  ;;  %v1663_v18 = vmul.f32 0.33333334, %v1640_v62  ;;  %v1354_v25 = vadd.f32 %v1353_v2, %v1268_v16  ;;  %v1356_v43 = vpop.f32.mrf.mxu3 }
 0x303   : > { %v1743_v29 = vsub.f32 1.5, %v1742_v20  ;;  %v1436_v53 = vpop.f32.mrf.mxu0  ;;  %v1459_v41 = vpop.xlane.xlu2 %1458  ;;  %v1099_v47 = vadd.f32 %v6007_v40, %v1013_v24 }
 0x304   : > { %v3854_v7 = vpop.eup %3853  ;;  %v2011_v12 = vadd.f32 %v4986_v63, %v1985_v51  ;;  %v4993_v38 = vadd.f32 0.001, %v1663_v18  ;;  %v4995_v55 = vadd.f32 %v1436_v53, %v1351_v49  ;;  %v4997_v42 = vmul.f32 0.25, %v1459_v41  ;;  %v1530_v30 = vpop.xlane.xlu1 %1529 }
 0x305   : > { %v1744_v27 = vmul.f32 %v3852_v56, %v1743_v29  ;;  %v1750_v58 = vmul.f32 %v3854_v7, %v4960_v5  ;;  %v1185_v23 = vadd.f32 %v1184_v37, %v1099_v47  ;;  %vm1756_vm6 = vweird.f32 %v3854_v7 }
 0x306   : > { %v2034_v34 = vmax.f32 %v2011_v12, 0.0  ;;  %3855 = vrsqrt.f32 %v4993_v38  ;;  %1557 = vadd.xlane.f32.xlu0 %v1516_v8  ;;  %1488 = vadd.xlane.f32.xlu1 %v4995_v55  ;;  %v1595_v10 = vmul.f32 4.0, %v4997_v42  ;;  %v1517_v2 = vmul.f32 %v4995_v55, %v4995_v55  ;;  %vm1757_vm8 = vmor %vm1755_vm7, %vm1756_vm6 }
 0x307   : > { %v1748_v19 = vsel %vm1747_vm5, %v3852_v56, %v1744_v27  ;;  %v1751_v57 = vmul.f32 %v3854_v7, %v1750_v58  ;;  %v1685_v12 = vsub.f32 %v4743_v33, %v4937_v32  ;;  %v1271_v5 = vadd.f32 %v1270_v48, %v1185_v23 }
 0x308   : > { %2057 = vst [vmem:[#allocation3] sm:$0xff] %v2034_v34  ;;  %v1960_v21 = vmul.f32 %v1748_v19, %v1684_v6  ;;  %v1618_v9 = vmul.f32 %v1595_v10, %v4997_v42  ;;  %v1187_v34 = vpop.f32.mrf.mxu1  ;;  %vm1765_vm10 = vweird.f32 %v4993_v38 }
 0x309   : > { %v1752_v61 = vmul.f32 0.5, %v1751_v57  ;;  %v1357_v32 = vadd.f32 %v1356_v43, %v1271_v5  ;;  %v1188_v57 = vadd.f32 %v1187_v34, %v4695_v22  ;;  %v1686_v22 = vsub.f32 %v4763_v36, %v4957_v59 }
 0x30a   : > { %v1986_v39 = vmul.f32 %v4976_v54, %v1960_v21  ;;  %v1641_v20 = vsub.f32 %v1530_v30, %v1618_v9  ;;  %v1512_v34 = vmul.f32 %v4904_v26, %v4904_v26 }
 0x30b   : > { %v1753_v62 = vsub.f32 1.5, %v1752_v61  ;;  %v1439_v15 = vpop.f32.mrf.mxu0  ;;  %v1461_v56 = vpop.xlane.xlu2 %1460 }
 0x30c   : > { %v3856_v46 = vpop.eup %3855  ;;  %v2012_v49 = vadd.f32 %v4986_v63, %v1986_v39  ;;  %v5012_v13 = vadd.f32 %v1439_v15, %v1354_v25  ;;  %v5014_v51 = vmul.f32 0.25, %v1461_v56  ;;  %v1532_v18 = vpop.xlane.xlu0 %1531  ;;  %v1664_v41 = vmul.f32 0.33333334, %v1641_v20 }
 0x30d   : > { %v1754_v29 = vmul.f32 %v3854_v7, %v1753_v62  ;;  %v1760_v53 = vmul.f32 %v3856_v46, %v4993_v38  ;;  %vm1766_vm9 = vweird.f32 %v3856_v46  ;;  %v1273_v25 = vpop.f32.mrf.mxu2  ;;  %v1359_v15 = vpop.f32.mrf.mxu3 }
 0x30e   : > { %v2035_v8 = vmax.f32 %v2012_v49, 0.0  ;;  %v1596_v14 = vmul.f32 4.0, %v5014_v51  ;;  %1490 = vadd.xlane.f32.xlu2 %v5012_v13  ;;  %1559 = vadd.xlane.f32.xlu1 %v1517_v2  ;;  %v5025_v37 = vadd.f32 0.001, %v1664_v41  ;;  %v1518_v48 = vmul.f32 %v5012_v13, %v5012_v13  ;;  %vm1767_vm11 = vmor %vm1765_vm10, %vm1766_vm9 }
 0x30f   : > { %v2080_v24 = vld [vmem:[#allocation3 + $0x2] sm:$0x1]  ;;  %v1758_v27 = vsel %vm1757_vm8, %v3854_v7, %v1754_v29  ;;  %v1761_v58 = vmul.f32 %v3856_v46, %v1760_v53 }
 0x310   : > { %2081 = vst [vmem:[#allocation3] sm:$0x1] %v2080_v24  ;;  %v1961_v6 = vmul.f32 %v1758_v27, %v1685_v12  ;;  %v1619_v40 = vmul.f32 %v1596_v14, %v5014_v51  ;;  %3857 = vrsqrt.f32 %v5025_v37  ;;  %v1510_v24 = vmul.f32 %v4882_v17, %v4882_v17 }
 0x311   : > { %2058 = vst [vmem:[#allocation3 + $0x8] sm:$0xff] %v2035_v8  ;;  %v1762_v33 = vmul.f32 0.5, %v1761_v58  ;;  %vm1775_vm14 = vweird.f32 %v5025_v37 }
 0x312   : > { %v1987_v47 = vmul.f32 %v4976_v54, %v1961_v6  ;;  %v1642_v19 = vsub.f32 %v1532_v18, %v1619_v40  ;;  %v1274_v18 = vadd.f32 %v1273_v25, %v1188_v57 }
 0x313   : > { %v1763_v7 = vsub.f32 1.5, %v1762_v33  ;;  %v1442_v10 = vpop.f32.mrf.mxu0  ;;  %v1534_v36 = vpop.xlane.xlu2 %1533 }
 0x314   : > { %v2013_v16 = vadd.f32 %v4986_v63, %v1987_v47  ;;  %v1665_v21 = vmul.f32 0.33333334, %v1642_v19  ;;  %v5032_v61 = vadd.f32 %v1442_v10, %v1357_v32  ;;  %v1463_v9 = vpop.xlane.xlu0 %1462  ;;  %v1360_v53 = vadd.f32 %v1359_v15, %v1274_v18 }
 0x315   : > { %v1764_v39 = vmul.f32 %v3856_v46, %v1763_v7  ;;  %v5037_v30 = vmul.f32 0.25, %v1463_v9 }
 0x316   : > { %v2036_v23 = vmax.f32 %v2013_v16, 0.0  ;;  %v5041_v62 = vadd.f32 0.001, %v1665_v21  ;;  %1561 = vadd.xlane.f32.xlu2 %v1518_v48  ;;  %1492 = vadd.xlane.f32.xlu1 %v5032_v61  ;;  %v3858_v20 = vpop.eup %3857  ;;  %v1687_v48 = vsub.f32 %v4781_v31, %v4997_v42 }
 0x317   : > { %v1768_v56 = vsel %vm1767_vm11, %v3856_v46, %v1764_v39  ;;  %v1597_v49 = vmul.f32 4.0, %v5037_v30  ;;  %v1770_v43 = vmul.f32 %v3858_v20, %v5025_v37  ;;  %vm1776_vm13 = vweird.f32 %v3858_v20 }
 0x318   : > { %v2082_v2 = vld [vmem:[#allocation3 + $0xf] sm:$0x1]  ;;  %2059 = vst [vmem:[#allocation3 + $0x10] sm:$0xff] %v2036_v23  ;;  %v1962_v38 = vmul.f32 %v1768_v56, %v1686_v22  ;;  %3859 = vrsqrt.f32 %v5041_v62  ;;  %vm1777_vm15 = vmor %vm1775_vm14, %vm1776_vm13  ;;  %vm1785_vm1 = vweird.f32 %v5041_v62 }
 0x319   : > { %2083 = vst [vmem:[#allocation3 + $0x11] sm:$0x1] %v2082_v2  ;;  %v1620_v59 = vmul.f32 %v1597_v49, %v5037_v30  ;;  %v1465_v29 = vpop.xlane.xlu1 %1464  ;;  %v1771_v8 = vmul.f32 %v3858_v20, %v1770_v43 }
 0x31a   : > { %v1988_v41 = vmul.f32 %v4976_v54, %v1962_v38  ;;  %v5049_v46 = vmul.f32 0.25, %v1465_v29 }
 0x31b   : > { %v1643_v12 = vsub.f32 %v1534_v36, %v1620_v59  ;;  %v1445_v14 = vpop.f32.mrf.mxu0  ;;  %v1772_v58 = vmul.f32 0.5, %v1771_v8 }
 0x31c   : > { %v2014_v27 = vadd.f32 %v4986_v63, %v1988_v41  ;;  %v5054_v5 = vadd.f32 %v1445_v14, %v1360_v53  ;;  %v1598_v40 = vmul.f32 4.0, %v5049_v46  ;;  %v1536_v9 = vpop.xlane.xlu0 %1535  ;;  %v1688_v41 = vsub.f32 %v4797_v45, %v5014_v51 }
 0x31d   : > { %v1666_v6 = vmul.f32 0.33333334, %v1643_v12  ;;  %v1773_v47 = vsub.f32 1.5, %v1772_v58  ;;  %v1519_v51 = vmul.f32 %v5032_v61, %v5032_v61 }
 0x31e   : > { %v3860_v33 = vpop.eup %3859  ;;  %v2037_v32 = vmax.f32 %v2014_v27, 0.0  ;;  %1549 = vadd.xlane.f32.xlu2 %v1512_v34  ;;  %1545 = vadd.xlane.f32.xlu1 %v1510_v24  ;;  %v1495_v19 = vsel %vm1494_vm12, %v5054_v5, 0.0  ;;  %v1621_v16 = vmul.f32 %v1598_v40, %v5049_v46  ;;  %v1520_v56 = vmul.f32 %v5054_v5, %v5054_v5 }
 0x31f   : > { %v2084_v57 = vld [vmem:[#allocation3 + $0x14] sm:$0x1]  ;;  %v1780_v7 = vmul.f32 %v3860_v33, %v5041_v62  ;;  %v5062_v10 = vadd.f32 0.001, %v1666_v6  ;;  %1496 = vadd.xlane.f32.xlu0 %v1495_v19  ;;  %v1774_v21 = vmul.f32 %v3858_v20, %v1773_v47  ;;  %vm1786_vm0 = vweird.f32 %v3860_v33 }
 0x320   : > { %2085 = vst [vmem:[#allocation3 + $0x12] sm:$0x1] %v2084_v57  ;;  %v1644_v39 = vsub.f32 %v1536_v9, %v1621_v16  ;;  %vm1787_vm2 = vmor %vm1785_vm1, %vm1786_vm0 }
 0x321   : > { %2060 = vst [vmem:[#allocation3 + $0x18] sm:$0xff] %v2037_v32  ;;  %v1781_v25 = vmul.f32 %v3860_v33, %v1780_v7  ;;  %3861 = vrsqrt.f32 %v5062_v10  ;;  %v1467_v23 = vpop.xlane.xlu2 %1466  ;;  %v1778_v22 = vsel %vm1777_vm15, %v3858_v20, %v1774_v21  ;;  %v1565_v20 = vsel %vm1494_vm12, %v1520_v56, 0.0 }
 0x322   : > { %v5070_v15 = vmul.f32 0.25, %v1467_v23  ;;  %v1963_v49 = vmul.f32 %v1778_v22, %v1687_v48  ;;  %v1667_v18 = vmul.f32 0.33333334, %v1644_v39  ;;  %vm1795_vm4 = vweird.f32 %v5062_v10 }
 0x323   : > { %v1782_v37 = vmul.f32 0.5, %v1781_v25  ;;  %v1538_v53 = vpop.xlane.xlu1 %1537  ;;  %v1689_v39 = vsub.f32 %v4811_v3, %v5037_v30 }
 0x324   : > { %v1599_v2 = vmul.f32 4.0, %v5070_v15  ;;  %v1989_v31 = vmul.f32 %v4976_v54, %v1963_v49  ;;  %v5076_v38 = vadd.f32 0.001, %v1667_v18 }
 0x325   : > { %v1783_v42 = vsub.f32 1.5, %v1782_v37 }
 0x326   : > { %v1622_v43 = vmul.f32 %v1599_v2, %v5070_v15  ;;  %v2015_v59 = vadd.f32 %v4986_v63, %v1989_v31  ;;  %3863 = vrsqrt.f32 %v5076_v38  ;;  %vm1805_vm7 = vweird.f32 %v5076_v38 }
 0x327   : > { %v3862_v36 = vpop.eup %3861  ;;  %v1784_v29 = vmul.f32 %v3860_v33, %v1783_v42  ;;  %1566 = vadd.xlane.f32.xlu0 %v1565_v20 }
 0x328   : > { %v1790_v8 = vmul.f32 %v3862_v36, %v5062_v10  ;;  %v1645_v12 = vsub.f32 %v1538_v53, %v1622_v43  ;;  %v2038_v14 = vmax.f32 %v2015_v59, 0.0  ;;  %vm1796_vm3 = vweird.f32 %v3862_v36 }
 0x329   : > { %v1788_v24 = vsel %vm1787_vm2, %v3860_v33, %v1784_v29  ;;  %v1469_v27 = vpop.xlane.xlu0 %1468  ;;  %vm1797_vm5 = vmor %vm1795_vm4, %vm1796_vm3  ;;  %v1690_v53 = vsub.f32 %v4825_v50, %v5049_v46 }
 0x32a   : > { %v1964_v58 = vmul.f32 %v1788_v24, %v1688_v41  ;;  %v1791_v34 = vmul.f32 %v3862_v36, %v1790_v8  ;;  %v1668_v6 = vmul.f32 0.33333334, %v1645_v12  ;;  %v5086_v40 = vmul.f32 0.25, %v1469_v27  ;;  %2061 = vst [vmem:[#allocation3 + $0x20] sm:$0xff] %v2038_v14 }
 0x32b   : > { %v1540_v25 = vpop.xlane.xlu2 %1539 }
 0x32c   : > { %v1990_v62 = vmul.f32 %v4976_v54, %v1964_v58  ;;  %v1792_v32 = vmul.f32 0.5, %v1791_v34  ;;  %v5089_v47 = vadd.f32 0.001, %v1668_v6  ;;  %v3864_v19 = vpop.eup %3863  ;;  %v1600_v45 = vmul.f32 4.0, %v5086_v40 }
 0x32d   : > { %v1800_v7 = vmul.f32 %v3864_v19, %v5076_v38  ;;  %vm1806_vm6 = vweird.f32 %v3864_v19 }
 0x32e   : > { %v2016_v33 = vadd.f32 %v4986_v63, %v1990_v62  ;;  %v1793_v57 = vsub.f32 1.5, %v1792_v32  ;;  %3865 = vrsqrt.f32 %v5089_v47  ;;  %v1623_v16 = vmul.f32 %v1600_v45, %v5086_v40  ;;  %vm1807_vm8 = vmor %vm1805_vm7, %vm1806_vm6 }
 0x32f   : > { %1563 = vadd.xlane.f32.xlu0 %v1519_v51  ;;  %v1801_v48 = vmul.f32 %v3864_v19, %v1800_v7  ;;  %vm1815_vm10 = vweird.f32 %v5089_v47 }
 0x330   : > { %v2039_v21 = vmax.f32 %v2016_v33, 0.0  ;;  %v1794_v9 = vmul.f32 %v3862_v36, %v1793_v57  ;;  %v1646_v23 = vsub.f32 %v1540_v25, %v1623_v16 }
 0x331   : > { %v1471_v22 = vpop.xlane.xlu1 %1470  ;;  %v2086_v56 = vld [vmem:[#allocation3 + $0x21] sm:$0x1]  ;;  %v2088_v49 = vld [vmem:[#allocation3 + $0x26] sm:$0x1]  ;;  %v1802_v18 = vmul.f32 0.5, %v1801_v48 }
 0x332   : > { %2062 = vst [vmem:[#allocation3 + $0x28] sm:$0xff] %v2039_v21  ;;  %v1798_v37 = vsel %vm1797_vm5, %v3862_v36, %v1794_v9  ;;  %v1669_v31 = vmul.f32 0.33333334, %v1646_v23  ;;  %v5101_v42 = vmul.f32 0.25, %v1471_v22  ;;  %v1691_v21 = vsub.f32 %v4839_v1, %v5070_v15 }
 0x333   : > { %2087 = vst [vmem:[#allocation3 + $0x23] sm:$0x1] %v2086_v56  ;;  %v1965_v2 = vmul.f32 %v1798_v37, %v1689_v39  ;;  %v1803_v10 = vsub.f32 1.5, %v1802_v18  ;;  %v1542_v14 = vpop.xlane.xlu0 %1541 }
 0x334   : > { %2089 = vst [vmem:[#allocation3 + $0x24] sm:$0x1] %v2088_v49  ;;  %v3866_v43 = vpop.eup %3865  ;;  %v1715_v3 = vadd.f32 0.001, %v1669_v31  ;;  %v1601_v30 = vmul.f32 4.0, %v5101_v42 }
 0x335   : > { %v1991_v20 = vmul.f32 %v4976_v54, %v1965_v2  ;;  %v1804_v59 = vmul.f32 %v3864_v19, %v1803_v10  ;;  %v1810_v36 = vmul.f32 %v3866_v43, %v5089_v47  ;;  %vm1816_vm9 = vweird.f32 %v3866_v43 }
 0x336   : > { %3867 = vrsqrt.f32 %v1715_v3  ;;  %v1624_v41 = vmul.f32 %v1601_v30, %v5101_v42  ;;  %vm1817_vm11 = vmor %vm1815_vm10, %vm1816_vm9  ;;  %vm1825_vm13 = vweird.f32 %v1715_v3 }
 0x337   : > { %v2017_v29 = vadd.f32 %v4986_v63, %v1991_v20  ;;  %v1808_v8 = vsel %vm1807_vm8, %v3864_v19, %v1804_v59  ;;  %v1811_v12 = vmul.f32 %v3866_v43, %v1810_v36 }
 0x338   : > { %v1966_v27 = vmul.f32 %v1808_v8, %v1690_v53  ;;  %v1647_v58 = vsub.f32 %v1542_v14, %v1624_v41 }
 0x339   : > { %v2040_v24 = vmax.f32 %v2017_v29, 0.0  ;;  %v1473_v34 = vpop.xlane.xlu2 %1472  ;;  %v1812_v6 = vmul.f32 0.5, %v1811_v12 }
 0x33a   : > { %v5111_v38 = vmul.f32 0.25, %v1473_v34  ;;  %v1992_v62 = vmul.f32 %v4976_v54, %v1966_v27  ;;  %v1670_v32 = vmul.f32 0.33333334, %v1647_v58  ;;  %v1693_v34 = vsub.f32 %v4861_v60, %v5101_v42 }
 0x33b   : > { %2063 = vst [vmem:[#allocation3 + $0x30] sm:$0xff] %v2040_v24  ;;  %v1813_v45 = vsub.f32 1.5, %v1812_v6  ;;  %v1544_v9 = vpop.xlane.xlu1 %1543 }
 0x33c   : > { %v1602_v50 = vmul.f32 4.0, %v5111_v38  ;;  %v3868_v46 = vpop.eup %3867  ;;  %v2018_v19 = vadd.f32 %v4986_v63, %v1992_v62  ;;  %v1716_v51 = vadd.f32 0.001, %v1670_v32 }
 0x33d   : > { %v1814_v33 = vmul.f32 %v3866_v43, %v1813_v45  ;;  %v1820_v57 = vmul.f32 %v3868_v46, %v1715_v3  ;;  %vm1826_vm12 = vweird.f32 %v3868_v46 }
 0x33e   : > { %v1625_v7 = vmul.f32 %v1602_v50, %v5111_v38  ;;  %v2041_v16 = vmax.f32 %v2018_v19, 0.0  ;;  %3869 = vrsqrt.f32 %v1716_v51  ;;  %vm1827_vm14 = vmor %vm1825_vm13, %vm1826_vm12  ;;  %vm1835_vm0 = vweird.f32 %v1716_v51 }
 0x33f   : > { %v1818_v48 = vsel %vm1817_vm11, %v3866_v43, %v1814_v33  ;;  %v1821_v25 = vmul.f32 %v3868_v46, %v1820_v57  ;;  %v1692_v43 = vsub.f32 %v4850_v28, %v5086_v40 }
 0x340   : > { %v1648_v39 = vsub.f32 %v1544_v9, %v1625_v7  ;;  %2064 = vst [vmem:[#allocation3 + $0x38] sm:$0xff] %v2041_v16  ;;  %v1967_v23 = vmul.f32 %v1818_v48, %v1691_v21  ;;  %v1694_v21 = vsub.f32 %v4870_v11, %v5111_v38 }
 0x341   : > { %v1822_v56 = vmul.f32 0.5, %v1821_v25  ;;  %v5132_v33 = vpop.xlane.xlu0 %1474 }
 0x342   : > { %v2090_v22 = vld [vmem:[#allocation3 + $0x33] sm:$0x1]  ;;  %v1671_v49 = vmul.f32 0.33333334, %v1648_v39  ;;  %v1993_v47 = vmul.f32 %v4976_v54, %v1967_v23 }
 0x343   : > { %2091 = vst [vmem:[#allocation3 + $0x35] sm:$0x1] %v2090_v22  ;;  %v1823_v37 = vsub.f32 1.5, %v1822_v56 }
 0x344   : > { %v1717_v18 = vadd.f32 0.001, %v1671_v49  ;;  %v3870_v2 = vpop.eup %3869  ;;  %v2019_v1 = vadd.f32 %v4986_v63, %v1993_v47 }
 0x345   : > { %v1824_v15 = vmul.f32 %v3868_v46, %v1823_v37  ;;  %v1830_v31 = vmul.f32 %v3870_v2, %v1716_v51  ;;  %vm1836_vm15 = vweird.f32 %v3870_v2 }
 0x346   : > { %3871 = vrsqrt.f32 %v1717_v18  ;;  %v2042_v10 = vmax.f32 %v2019_v1, 0.0  ;;  %vm1837_vm1 = vmor %vm1835_vm0, %vm1836_vm15  ;;  %vm1845_vm3 = vweird.f32 %v1717_v18 }
 0x347   : > { %v2092_v20 = vld [vmem:[#allocation3 + $0x38] sm:$0x1]  ;;  %v1828_v30 = vsel %vm1827_vm14, %v3868_v46, %v1824_v15  ;;  %v1831_v59 = vmul.f32 %v3870_v2, %v1830_v31 }
 0x348   : > { %2093 = vst [vmem:[#allocation3 + $0x36] sm:$0x1] %v2092_v20  ;;  %v1968_v36 = vmul.f32 %v1828_v30, %v1692_v43 }
 0x349   : > { %v1477_v29 = vpop.xlane.xlu1 %1476  ;;  %2065 = vst [vmem:[#allocation3 + $0x40] sm:$0xff] %v2042_v10  ;;  %v1832_v53 = vmul.f32 0.5, %v1831_v59 }
 0x34a   : > { %v5124_v41 = vmul.f32 0.25, %v1477_v29  ;;  %v1994_v8 = vmul.f32 %v4976_v54, %v1968_v36 }
 0x34b   : > { %v1833_v12 = vsub.f32 1.5, %v1832_v53  ;;  %v1548_v62 = vpop.xlane.xlu2 %1547 }
 0x34c   : > { %v3872_v3 = vpop.eup %3871  ;;  %v1604_v14 = vmul.f32 4.0, %v5124_v41  ;;  %v2020_v28 = vadd.f32 %v4986_v63, %v1994_v8  ;;  %v1696_v8 = vsub.f32 %v4892_v0, %v5124_v41 }
 0x34d   : > { %v1840_v40 = vmul.f32 %v3872_v3, %v1717_v18  ;;  %v1834_v24 = vmul.f32 %v3870_v2, %v1833_v12  ;;  %vm1846_vm2 = vweird.f32 %v3872_v3 }
 0x34e   : > { %v1627_v27 = vmul.f32 %v1604_v14, %v5124_v41  ;;  %v2043_v58 = vmax.f32 %v2020_v28, 0.0  ;;  %vm1847_vm4 = vmor %vm1845_vm3, %vm1846_vm2 }
 0x34f   : > { %v1841_v6 = vmul.f32 %v3872_v3, %v1840_v40  ;;  %v1838_v32 = vsel %vm1837_vm1, %v3870_v2, %v1834_v24 }
 0x350   : > { %v1650_v45 = vsub.f32 %v1548_v62, %v1627_v27  ;;  %v2094_v50 = vld [vmem:[#allocation3 + $0x45] sm:$0x1]  ;;  %2066 = vst [vmem:[#allocation3 + $0x48] sm:$0xff] %v2043_v58  ;;  %v1969_v46 = vmul.f32 %v1838_v32, %v1693_v34 }
 0x351   : > { %v1842_v19 = vmul.f32 0.5, %v1841_v6  ;;  %2095 = vst [vmem:[#allocation3 + $0x47] sm:$0x1] %v2094_v50 }
 0x352   : > { %v1673_v57 = vmul.f32 0.33333334, %v1650_v45  ;;  %v1995_v51 = vmul.f32 %v4976_v54, %v1969_v46 }
 0x353   : > { %v1843_v7 = vsub.f32 1.5, %v1842_v19  ;;  %v5143_v2 = vpop.xlane.xlu2 %1478 }
 0x354   : > { %v1719_v16 = vadd.f32 0.001, %v1673_v57  ;;  %v2021_v60 = vadd.f32 %v4986_v63, %v1995_v51 }
 0x355   : > { %v1844_v42 = vmul.f32 %v3872_v3, %v1843_v7 }
 0x356   : > { %3873 = vrsqrt.f32 %v1719_v16  ;;  %v2044_v9 = vmax.f32 %v2021_v60, 0.0  ;;  %vm1865_vm6 = vweird.f32 %v1719_v16 }
 0x357   : > { %v1848_v48 = vsel %vm1847_vm4, %v3872_v3, %v1844_v42  ;;  %v2096_v25 = vld [vmem:[#allocation3 + $0x4a] sm:$0x1] }
 0x358   : > { %v1970_v39 = vmul.f32 %v1848_v48, %v1694_v21  ;;  %2097 = vst [vmem:[#allocation3 + $0x48] sm:$0x1] %v2096_v25 }
 0x359   : > { %v1481_v23 = vpop.xlane.xlu0 %1480  ;;  %2067 = vst [vmem:[#allocation3 + $0x50] sm:$0xff] %v2044_v9 }
 0x35a   : > { %v1996_v22 = vmul.f32 %v4976_v54, %v1970_v39  ;;  %v5139_v56 = vmul.f32 0.25, %v1481_v23 }
 0x35c   : > { %v3874_v49 = vpop.eup %3873  ;;  %v2022_v47 = vadd.f32 %v4986_v63, %v1996_v22  ;;  %v1606_v37 = vmul.f32 4.0, %v5139_v56 }
 0x35d   : > { %v1860_v18 = vmul.f32 %v3874_v49, %v1719_v16  ;;  %vm1866_vm5 = vweird.f32 %v3874_v49 }
 0x35e   : > { %v2045_v11 = vmax.f32 %v2022_v47, 0.0  ;;  %v1629_v1 = vmul.f32 %v1606_v37, %v5139_v56  ;;  %vm1867_vm7 = vmor %vm1865_vm6, %vm1866_vm5  ;;  %v1698_v37 = vsub.f32 %v4914_v35, %v5139_v56 }
 0x35f   : > { %v1861_v38 = vmul.f32 %v3874_v49, %v1860_v18 }
 0x360   : > { %2068 = vst [vmem:[#allocation3 + $0x58] sm:$0xff] %v2045_v11  ;;  %v2098_v15 = vld [vmem:[#allocation3 + $0x57] sm:$0x1] }
 0x361   : > { %v1862_v31 = vmul.f32 0.5, %v1861_v38  ;;  %v1552_v10 = vpop.xlane.xlu0 %1551  ;;  %v1483_v43 = vpop.xlane.xlu1 %1482  ;;  %2099 = vst [vmem:[#allocation3 + $0x59] sm:$0x1] %v2098_v15 }
 0x362   : > { %v1652_v20 = vsub.f32 %v1552_v10, %v1629_v1  ;;  %v5146_v30 = vmul.f32 0.25, %v1483_v43 }
 0x363   : > { %v1863_v59 = vsub.f32 1.5, %v1862_v31 }
 0x364   : > { %v1675_v36 = vmul.f32 0.33333334, %v1652_v20  ;;  %v1607_v29 = vmul.f32 4.0, %v5146_v30 }
 0x365   : > { %v1864_v53 = vmul.f32 %v3874_v49, %v1863_v59 }
 0x366   : > { %v1721_v3 = vadd.f32 0.001, %v1675_v36  ;;  %v1630_v40 = vmul.f32 %v1607_v29, %v5146_v30 }
 0x367   : > { %v2100_v12 = vld [vmem:[#allocation3 + $0x5c] sm:$0x1]  ;;  %v1868_v14 = vsel %vm1867_vm7, %v3874_v49, %v1864_v53 }
 0x368   : > { %2101 = vst [vmem:[#allocation3 + $0x5a] sm:$0x1] %v2100_v12  ;;  %v1972_v28 = vmul.f32 %v1868_v14, %v1696_v8  ;;  %3875 = vrsqrt.f32 %v1721_v3  ;;  %vm1885_vm9 = vweird.f32 %v1721_v3 }
 0x369   : > { %v1485_v24 = vpop.xlane.xlu2 %1484  ;;  %v1554_v27 = vpop.xlane.xlu1 %1553 }
 0x36a   : > { %v1998_v58 = vmul.f32 %v4976_v54, %v1972_v28  ;;  %v5153_v34 = vmul.f32 0.25, %v1485_v24  ;;  %v1653_v6 = vsub.f32 %v1554_v27, %v1630_v40  ;;  %v1699_v28 = vsub.f32 %v4927_v4, %v5146_v30 }
 0x36c   : > { %v2024_v62 = vadd.f32 %v4986_v63, %v1998_v58  ;;  %v1676_v32 = vmul.f32 0.33333334, %v1653_v6  ;;  %v1608_v0 = vmul.f32 4.0, %v5153_v34 }
 0x36e   : > { %v3876_v41 = vpop.eup %3875  ;;  %v2047_v45 = vmax.f32 %v2024_v62, 0.0  ;;  %v1722_v50 = vadd.f32 0.001, %v1676_v32  ;;  %v1631_v19 = vmul.f32 %v1608_v0, %v5153_v34 }
 0x36f   : > { %v1880_v46 = vmul.f32 %v3876_v41, %v1721_v3  ;;  %vm1886_vm8 = vweird.f32 %v3876_v41 }
 0x370   : > { %2070 = vst [vmem:[#allocation3 + $0x68] sm:$0xff] %v2047_v45  ;;  %3877 = vrsqrt.f32 %v1722_v50  ;;  %vm1887_vm10 = vmor %vm1885_vm9, %vm1886_vm8  ;;  %vm1895_vm12 = vweird.f32 %v1722_v50 }
 0x371   : > { %v1881_v57 = vmul.f32 %v3876_v41, %v1880_v46  ;;  %v1556_v51 = vpop.xlane.xlu2 %1555  ;;  %v1487_v7 = vpop.xlane.xlu0 %1486 }
 0x372   : > { %v1654_v16 = vsub.f32 %v1556_v51, %v1631_v19  ;;  %v5158_v60 = vmul.f32 0.25, %v1487_v7  ;;  %v5177_v19 = vmul.f32 0.25, %v5132_v33  ;;  %v5183_v7 = vmul.f32 0.25, %v5143_v2 }
 0x373   : > { %v1882_v42 = vmul.f32 0.5, %v1881_v57 }
 0x374   : > { %v1677_v21 = vmul.f32 0.33333334, %v1654_v16  ;;  %v1609_v9 = vmul.f32 4.0, %v5158_v60 }
 0x375   : > { %v1883_v48 = vsub.f32 1.5, %v1882_v42 }
 0x376   : > { %v3878_v25 = vpop.eup %3877  ;;  %v1723_v39 = vadd.f32 0.001, %v1677_v21  ;;  %v1632_v18 = vmul.f32 %v1609_v9, %v5158_v60  ;;  %v1700_v21 = vsub.f32 %v4943_v44, %v5153_v34 }
 0x377   : > { %v2102_v23 = vld [vmem:[#allocation3 + $0x69] sm:$0x1]  ;;  %v2104_v22 = vld [vmem:[#allocation3 + $0x6e] sm:$0x1]  ;;  %v1884_v49 = vmul.f32 %v3876_v41, %v1883_v48  ;;  %v1890_v47 = vmul.f32 %v3878_v25, %v1722_v50  ;;  %vm1896_vm11 = vweird.f32 %v3878_v25 }
 0x378   : > { %2103 = vst [vmem:[#allocation3 + $0x6b] sm:$0x1] %v2102_v23  ;;  %3879 = vrsqrt.f32 %v1723_v39  ;;  %vm1897_vm13 = vmor %vm1895_vm12, %vm1896_vm11  ;;  %vm1905_vm15 = vweird.f32 %v1723_v39 }
 0x379   : > { %2105 = vst [vmem:[#allocation3 + $0x6c] sm:$0x1] %v2104_v22  ;;  %v1888_v11 = vsel %vm1887_vm10, %v3876_v41, %v1884_v49  ;;  %v1891_v38 = vmul.f32 %v3878_v25, %v1890_v47  ;;  %v1558_v1 = vpop.xlane.xlu0 %1557  ;;  %v1489_v15 = vpop.xlane.xlu1 %1488 }
 0x37a   : > { %v1974_v31 = vmul.f32 %v1888_v11, %v1698_v37  ;;  %v1655_v10 = vsub.f32 %v1558_v1, %v1632_v18  ;;  %v5164_v43 = vmul.f32 0.25, %v1489_v15  ;;  %v1603_v37 = vmul.f32 4.0, %v5177_v19 }
 0x37b   : > { %v1892_v20 = vmul.f32 0.5, %v1891_v38  ;;  %v1605_v18 = vmul.f32 4.0, %v5183_v7 }
 0x37c   : > { %v2000_v59 = vmul.f32 %v4976_v54, %v1974_v31  ;;  %v1678_v36 = vmul.f32 0.33333334, %v1655_v10  ;;  %v1610_v29 = vmul.f32 4.0, %v5164_v43 }
 0x37d   : > { %v1893_v35 = vsub.f32 1.5, %v1892_v20  ;;  %v1626_v20 = vmul.f32 %v1603_v37, %v5177_v19 }
 0x37e   : > { %v3880_v56 = vpop.eup %3879  ;;  %v2026_v53 = vadd.f32 %v4986_v63, %v2000_v59  ;;  %v1724_v8 = vadd.f32 0.001, %v1678_v36  ;;  %v1633_v40 = vmul.f32 %v1610_v29, %v5164_v43  ;;  %v1701_v36 = vsub.f32 %v4962_v52, %v5158_v60 }
 0x37f   : > { %v1894_v3 = vmul.f32 %v3878_v25, %v1893_v35  ;;  %v1900_v12 = vmul.f32 %v3880_v56, %v1723_v39  ;;  %vm1906_vm14 = vweird.f32 %v3880_v56  ;;  %v1628_v29 = vmul.f32 %v1605_v18, %v5183_v7 }
 0x380   : > { %v2049_v14 = vmax.f32 %v2026_v53, 0.0  ;;  %3881 = vrsqrt.f32 %v1724_v8  ;;  %vm1907_vm0 = vmor %vm1905_vm15, %vm1906_vm14  ;;  %vm1915_vm2 = vweird.f32 %v1724_v8 }
 0x381   : > { %v1898_v24 = vsel %vm1897_vm13, %v3878_v25, %v1894_v3  ;;  %v1901_v27 = vmul.f32 %v3880_v56, %v1900_v12  ;;  %v1491_v58 = vpop.xlane.xlu2 %1490  ;;  %v1560_v6 = vpop.xlane.xlu1 %1559 }
 0x382   : > { %2072 = vst [vmem:[#allocation3 + $0x78] sm:$0xff] %v2049_v14  ;;  %v1975_v62 = vmul.f32 %v1898_v24, %v1699_v28  ;;  %v5172_v32 = vmul.f32 0.25, %v1491_v58  ;;  %v1656_v0 = vsub.f32 %v1560_v6, %v1633_v40 }
 0x383   : > { %v1902_v41 = vmul.f32 0.5, %v1901_v27 }
 0x384   : > { %v2001_v45 = vmul.f32 %v4976_v54, %v1975_v62  ;;  %v1679_v50 = vmul.f32 0.33333334, %v1656_v0  ;;  %v1611_v46 = vmul.f32 4.0, %v5172_v32  ;;  %v1703_v18 = vsub.f32 %v5012_v13, %v5172_v32 }
 0x385   : > { %v1903_v4 = vsub.f32 1.5, %v1902_v41 }
 0x386   : > { %v3882_v30 = vpop.eup %3881  ;;  %v2027_v57 = vadd.f32 %v4986_v63, %v2001_v45  ;;  %v5180_v51 = vadd.f32 0.001, %v1679_v50  ;;  %v1634_v33 = vmul.f32 %v1611_v46, %v5172_v32 }
 0x387   : > { %v1904_v16 = vmul.f32 %v3880_v56, %v1903_v4  ;;  %v1910_v42 = vmul.f32 %v3882_v30, %v1724_v8  ;;  %vm1916_vm1 = vweird.f32 %v3882_v30 }
 0x388   : > { %v2050_v9 = vmax.f32 %v2027_v57, 0.0  ;;  %3883 = vrsqrt.f32 %v5180_v51  ;;  %vm1917_vm3 = vmor %vm1915_vm2, %vm1916_vm1  ;;  %vm1925_vm5 = vweird.f32 %v5180_v51 }
 0x389   : > { %v2106_v48 = vld [vmem:[#allocation3 + $0x7b] sm:$0x1]  ;;  %v1908_v25 = vsel %vm1907_vm0, %v3880_v56, %v1904_v16  ;;  %v1911_v23 = vmul.f32 %v3882_v30, %v1910_v42  ;;  %v1562_v22 = vpop.xlane.xlu2 %1561  ;;  %v1493_v49 = vpop.xlane.xlu1 %1492 }
 0x38a   : > { %2107 = vst [vmem:[#allocation3 + $0x7d] sm:$0x1] %v2106_v48  ;;  %v1976_v2 = vmul.f32 %v1908_v25, %v1700_v21  ;;  %v1657_v47 = vsub.f32 %v1562_v22, %v1634_v33  ;;  %v5214_v57 = vmul.f32 0.25, %v1493_v49 }
 0x38b   : > { %2073 = vst [vmem:[#allocation3 + $0x80] sm:$0xff] %v2050_v9  ;;  %v1912_v39 = vmul.f32 0.5, %v1911_v23 }
 0x38c   : > { %v2002_v44 = vmul.f32 %v4976_v54, %v1976_v2  ;;  %v1680_v34 = vmul.f32 0.33333334, %v1657_v47  ;;  %v1612_v22 = vmul.f32 4.0, %v5214_v57  ;;  %v5229_v2 = vld [vmem:[%s5838_s4] ss:$0 sm:$0xff] }
 0x38d   : > { %v1913_v11 = vsub.f32 1.5, %v1912_v39 }
 0x38e   : > { %v3884_v38 = vpop.eup %3883  ;;  %v2028_v1 = vadd.f32 %v4986_v63, %v2002_v44  ;;  %v5193_v15 = vadd.f32 0.001, %v1680_v34 }
 0x38f   : > { %v1914_v31 = vmul.f32 %v3882_v30, %v1913_v11  ;;  %v1920_v10 = vmul.f32 %v3884_v38, %v5180_v51  ;;  %vm1926_vm4 = vweird.f32 %v3884_v38 }
 0x390   : > { %v2051_v59 = vmax.f32 %v2028_v1, 0.0  ;;  %3885 = vrsqrt.f32 %v5193_v15  ;;  %vm1927_vm6 = vmor %vm1925_vm5, %vm1926_vm4  ;;  %vm1935_vm8 = vweird.f32 %v5193_v15 }
 0x391   : > { %v1918_v35 = vsel %vm1917_vm3, %v3882_v30, %v1914_v31  ;;  %v1921_v56 = vmul.f32 %v3884_v38, %v1920_v10  ;;  %v1550_v53 = vpop.xlane.xlu2 %1549  ;;  %v1546_v3 = vpop.xlane.xlu1 %1545  ;;  %v1635_v10 = vmul.f32 %v1612_v22, %v5214_v57 }
 0x392   : > { %v2108_v12 = vld [vmem:[#allocation3 + $0x80] sm:$0x1]  ;;  %2074 = vst [vmem:[#allocation3 + $0x88] sm:$0xff] %v2051_v59  ;;  %v1977_v8 = vmul.f32 %v1918_v35, %v1701_v36  ;;  %v1651_v14 = vsub.f32 %v1550_v53, %v1628_v29  ;;  %v1649_v28 = vsub.f32 %v1546_v3, %v1626_v20  ;;  %v1497_v40 = vpop.xlane.xlu0 %1496 }
 0x393   : > { %2109 = vst [vmem:[#allocation3 + $0x7e] sm:$0x1] %v2108_v12  ;;  %v1922_v24 = vmul.f32 0.5, %v1921_v56  ;;  %v5201_v27 = vmul.f32 0.25, %v1497_v40 }
 0x394   : > { %v2003_v52 = vmul.f32 %v4976_v54, %v1977_v8  ;;  %v1674_v60 = vmul.f32 0.33333334, %v1651_v14  ;;  %v1672_v58 = vmul.f32 0.33333334, %v1649_v28  ;;  %v1702_v54 = vsub.f32 %v4995_v55, %v5164_v43  ;;  %v5222_v55 = vld [vmem:[%s5837_s3] ss:$0 sm:$0xff] }
 0x395   : > { %v1923_v6 = vsub.f32 1.5, %v1922_v24  ;;  %v1613_v62 = vmul.f32 4.0, %v5201_v27  ;;  %v1697_v14 = vsub.f32 %v4904_v26, %v5183_v7 }
 0x396   : > { %v3886_v0 = vpop.eup %3885  ;;  %v2029_v41 = vadd.f32 %v4986_v63, %v2003_v52  ;;  %v5206_v45 = vadd.f32 0.001, %v1674_v60  ;;  %v5208_v50 = vadd.f32 0.001, %v1672_v58  ;;  %v1695_v58 = vsub.f32 %v4882_v17, %v5177_v19 }
 0x397   : > { %v1924_v46 = vmul.f32 %v3884_v38, %v1923_v6  ;;  %v1930_v4 = vmul.f32 %v3886_v0, %v5193_v15  ;;  %v1636_v21 = vmul.f32 %v1613_v62, %v5201_v27  ;;  %vm1936_vm7 = vweird.f32 %v3886_v0 }
 0x398   : > { %v2052_v30 = vmax.f32 %v2029_v41, 0.0  ;;  %3887 = vrsqrt.f32 %v5206_v45  ;;  %vm1937_vm9 = vmor %vm1935_vm8, %vm1936_vm7  ;;  %vm1875_vm12 = vweird.f32 %v5206_v45  ;;  %vm1855_vm14 = vweird.f32 %v5208_v50 }
 0x399   : > { %v2110_v16 = vld [vmem:[#allocation3 + $0x8d] sm:$0x1]  ;;  %v1928_v63 = vsel %vm1927_vm6, %v3884_v38, %v1924_v46  ;;  %v1931_v42 = vmul.f32 %v3886_v0, %v1930_v4  ;;  %3889 = vrsqrt.f32 %v5208_v50 }
 0x39a   : > { %2111 = vst [vmem:[#allocation3 + $0x8f] sm:$0x1] %v2110_v16  ;;  %v1978_v51 = vmul.f32 %v1928_v63, %v1702_v54  ;;  %v1567_v9 = vpop.xlane.xlu0 %1566 }
 0x39b   : > { %2075 = vst [vmem:[#allocation3 + $0x90] sm:$0xff] %v2052_v30  ;;  %v1932_v33 = vmul.f32 0.5, %v1931_v42  ;;  %v1659_v48 = vsub.f32 %v1567_v9, %v1636_v21 }
 0x39c   : > { %v2004_v43 = vmul.f32 %v5222_v55, %v1978_v51  ;;  %v1705_v51 = vsub.f32 %v5054_v5, %v5201_v27 }
 0x39d   : > { %v1933_v25 = vsub.f32 1.5, %v1932_v33  ;;  %v1682_v23 = vmul.f32 0.33333334, %v1659_v48 }
 0x39e   : > { %v3888_v49 = vpop.eup %3887  ;;  %v2030_v47 = vadd.f32 %v5229_v2, %v2004_v43 }
 0x39f   : > { %v3890_v39 = vpop.eup %3889  ;;  %v1934_v37 = vmul.f32 %v3886_v0, %v1933_v25  ;;  %v1870_v44 = vmul.f32 %v3888_v49, %v5206_v45  ;;  %v1728_v34 = vadd.f32 0.001, %v1682_v23  ;;  %vm1876_vm10 = vweird.f32 %v3888_v49 }
 0x3a0   : > { %v2053_v11 = vmax.f32 %v2030_v47, 0.0  ;;  %v1850_v38 = vmul.f32 %v3890_v39, %v5208_v50  ;;  %vm1856_vm11 = vweird.f32 %v3890_v39  ;;  %vm1877_vm13 = vmor %vm1875_vm12, %vm1876_vm10  ;;  %v1704_v47 = vsub.f32 %v5032_v61, %v5214_v57 }
 0x3a1   : > { %v1938_v1 = vsel %vm1937_vm9, %v3886_v0, %v1934_v37  ;;  %v1871_v31 = vmul.f32 %v3888_v49, %v1870_v44  ;;  %3891 = vrsqrt.f32 %v1728_v34  ;;  %vm1857_vm15 = vmor %vm1855_vm14, %vm1856_vm11  ;;  %vm1955_vm1 = vweird.f32 %v1728_v34 }
 0x3a2   : > { %v2112_v20 = vld [vmem:[#allocation3 + $0x92] sm:$0x1]  ;;  %2076 = vst [vmem:[#allocation3 + $0x98] sm:$0xff] %v2053_v11  ;;  %v1979_v59 = vmul.f32 %v1938_v1, %v1703_v18  ;;  %v1851_v36 = vmul.f32 %v3890_v39, %v1850_v38  ;;  %v1564_v15 = vpop.xlane.xlu0 %1563 }
 0x3a3   : > { %2113 = vst [vmem:[#allocation3 + $0x90] sm:$0x1] %v2112_v20  ;;  %v1872_v29 = vmul.f32 0.5, %v1871_v31  ;;  %v1658_v35 = vsub.f32 %v1564_v15, %v1635_v10 }
 0x3a4   : > { %v2005_v56 = vmul.f32 %v5222_v55, %v1979_v59  ;;  %v1852_v13 = vmul.f32 0.5, %v1851_v36 }
 0x3a5   : > { %v1873_v32 = vsub.f32 1.5, %v1872_v29  ;;  %v1681_v53 = vmul.f32 0.33333334, %v1658_v35 }
 0x3a6   : > { %v2031_v3 = vadd.f32 %v5229_v2, %v2005_v56  ;;  %v1853_v12 = vsub.f32 1.5, %v1852_v13 }
 0x3a7   : > { %v3892_v8 = vpop.eup %3891  ;;  %v1874_v28 = vmul.f32 %v3888_v49, %v1873_v32  ;;  %v1727_v40 = vadd.f32 0.001, %v1681_v53 }
 0x3a8   : > { %v2054_v24 = vmax.f32 %v2031_v3, 0.0  ;;  %v1854_v52 = vmul.f32 %v3890_v39, %v1853_v12  ;;  %v1950_v60 = vmul.f32 %v3892_v8, %v1728_v34  ;;  %vm1956_vm0 = vweird.f32 %v3892_v8 }
 0x3a9   : > { %v2114_v6 = vld [vmem:[#allocation3 + $0x9f] sm:$0x1]  ;;  %v1878_v62 = vsel %vm1877_vm13, %v3888_v49, %v1874_v28  ;;  %3893 = vrsqrt.f32 %v1727_v40  ;;  %vm1957_vm2 = vmor %vm1955_vm1, %vm1956_vm0  ;;  %vm1945_vm4 = vweird.f32 %v1727_v40 }
 0x3aa   : > { %2077 = vst [vmem:[#allocation3 + $0xa0] sm:$0xff] %v2054_v24  ;;  %v1973_v0 = vmul.f32 %v1878_v62, %v1697_v14  ;;  %v1858_v26 = vsel %vm1857_vm15, %v3890_v39, %v1854_v52  ;;  %v1951_v7 = vmul.f32 %v3892_v8, %v1950_v60 }
 0x3ab   : > { %2115 = vst [vmem:[#allocation3 + $0xa1] sm:$0x1] %v2114_v6  ;;  %v1971_v41 = vmul.f32 %v1858_v26, %v1695_v58 }
 0x3ac   : > { %v1999_v45 = vmul.f32 %v5222_v55, %v1973_v0  ;;  %v1952_v46 = vmul.f32 0.5, %v1951_v7 }
 0x3ad   : > { %v1997_v4 = vmul.f32 %v5222_v55, %v1971_v41 }
 0x3ae   : > { %v2025_v50 = vadd.f32 %v5229_v2, %v1999_v45  ;;  %v1953_v30 = vsub.f32 1.5, %v1952_v46 }
 0x3af   : > { %v3894_v17 = vpop.eup %3893  ;;  %v2023_v19 = vadd.f32 %v5229_v2, %v1997_v4 }
 0x3b0   : > { %v2048_v54 = vmax.f32 %v2025_v50, 0.0  ;;  %v1954_v16 = vmul.f32 %v3892_v8, %v1953_v30  ;;  %v1940_v63 = vmul.f32 %v3894_v17, %v1727_v40  ;;  %vm1946_vm3 = vweird.f32 %v3894_v17 }
 0x3b1   : > { %v2116_v42 = vld [vmem:[#allocation3 + $0xa4] sm:$0x1]  ;;  %v2046_v21 = vmax.f32 %v2023_v19, 0.0  ;;  %vm1947_vm5 = vmor %vm1945_vm4, %vm1946_vm3 }
 0x3b2   : > { %2117 = vst [vmem:[#allocation3 + $0xa2] sm:$0x1] %v2116_v42  ;;  %v1958_v9 = vsel %vm1957_vm2, %v3892_v8, %v1954_v16  ;;  %v1941_v33 = vmul.f32 %v3894_v17, %v1940_v63 }
 0x3b3   : > { %2071 = vst [vmem:[#allocation3 + $0x70] sm:$0xff] %v2048_v54  ;;  %v1981_v48 = vmul.f32 %v1958_v9, %v1705_v51 }
 0x3b4   : > { %2069 = vst [vmem:[#allocation3 + $0x60] sm:$0xff] %v2046_v21  ;;  %v1942_v43 = vmul.f32 0.5, %v1941_v33 }
 0x3b5   : > { %v2007_v25 = vmul.f32 %v5222_v55, %v1981_v48 }
 0x3b6   : > { %v1943_v23 = vsub.f32 1.5, %v1942_v43 }
 0x3b7   : > { %v2033_v22 = vadd.f32 %v5229_v2, %v2007_v25 }
 0x3b8   : > { %v1944_v49 = vmul.f32 %v3894_v17, %v1943_v23 }
 0x3b9   : > { %v2056_v5 = vmax.f32 %v2033_v22, 0.0 }
 0x3ba   : > { %v1948_v27 = vsel %vm1947_vm5, %v3894_v17, %v1944_v49 }
 0x3bb   : > { %2079 = vst [vmem:[#allocation3 + $0xb0] sm:$0xf] %v2056_v5  ;;  %v1980_v39 = vmul.f32 %v1948_v27, %v1704_v47 }
 0x3bd   : > { %v2006_v37 = vmul.f32 %v5222_v55, %v1980_v39 }
 0x3bf   : > { %v2032_v44 = vadd.f32 %v5229_v2, %v2006_v37 }
 0x3c0   : > { %2123 = sbr.rel (%p3691_p7) target bundleno = 969 (0x3c9), region = 68 }
 0x3c1   : > { %v2055_v34 = vmax.f32 %v2032_v44, 0.0 }
 0x3c2   : > { %v2118_v18 = vld [vmem:[#allocation3 + $0xb1] sm:$0x1] }
 0x3c3   : > { %2119 = vst [vmem:[#allocation3 + $0xb3] sm:$0x1] %v2118_v18 }
 0x3c4   : > { %2078 = vst [vmem:[#allocation3 + $0xa8] sm:$0xff] %v2055_v34 }
 0x3c5   : > { %v2124_v11 = vld [vmem:[#allocation3 + $0x24] sm:$0xff]  ;;  %v2125_v38 = vld [vmem:[#allocation3 + $0x2c] sm:$0xff]  ;;  %v2126_v1 = vld [vmem:[#allocation3 + $0x34] sm:$0x3] }
 0x3c6   : > { %2127 = vst [vmem:[#allocation3] sm:$0xff] %v2124_v11 }
 0x3c7   : > { %2128 = vst [vmem:[#allocation3 + $0x8] sm:$0xff] %v2125_v38 }
 0x3c8   : > { %2129 = vst [vmem:[#allocation3 + $0x10] sm:$0x3] %v2126_v1 }
 0x3c9 PF: > { %p3692_p9 = scmp.ne.s32.totalorder %s4108_s12, 1 }
 0x3cb   : > { %2133 = sbr.rel (%p3692_p9) target bundleno = 980 (0x3d4), region = 72 }
 0x3d0   : > { %v2134_v61 = vld [vmem:[#allocation3 + $0x7e] sm:$0xff]  ;;  %v2135_v57 = vld [vmem:[#allocation3 + $0x86] sm:$0xff]  ;;  %v2136_v55 = vld [vmem:[#allocation3 + $0x8e] sm:$0x3] }
 0x3d1   : > { %2137 = vst [vmem:[#allocation3 + $0xa2] sm:$0xff] %v2134_v61 }
 0x3d2   : > { %2138 = vst [vmem:[#allocation3 + $0xaa] sm:$0xff] %v2135_v57 }
 0x3d3   : > { %2139 = vst [vmem:[#allocation3 + $0xb2] sm:$0x3] %v2136_v55 }
 0x3d4 PF: > { %v2285_v2 = vld [vmem:[#allocation8 + $0x78] sm:$0xff]  ;;  %v2284_v10 = vld [vmem:[#allocation8 + $0x70] sm:$0xff]  ;;  %v2283_v36 = vld [vmem:[#allocation8 + $0x68] sm:$0xff]  ;;  %s3746_s1 = smul.u32 18, %s4108_s12  ;;  %s3584_s20 = sshll.u32 %s4297_s15, 4  ;;  %s3585_s20 = int_to_ptr.vmem [resolvable:$true] %s3584_s20 }
 0x3d5   : > { %v2301_v31 = vld [vmem:[#allocation8 + $0xf8] sm:$0xff]  ;;  %2418 = vmatpush.msra.mxu1 %v2285_v2  ;;  %v2300_v20 = vld [vmem:[#allocation8 + $0xf0] sm:$0xff]  ;;  %v2299_v15 = vld [vmem:[#allocation8 + $0xe8] sm:$0xff]  ;;  %s3747_s5 = smul.u32 36, %s4112_s13  ;;  %s6008_s24 = sand.u32 1, %s4100_s10  }
 0x3d6   : > { %2489 = vmatpush.msra.mxu2 %v2301_v31  ;;  %v2317_v59 = vld [vmem:[#allocation8 + $0x178] sm:$0xff]  ;;  %v2316_v29 = vld [vmem:[#allocation8 + $0x170] sm:$0xff]  ;;  %v2315_v35 = vld [vmem:[#allocation8 + $0x168] sm:$0xff]  ;;  %s3570_s27 = scalar_lea.sflag [#allocation7], %s6008_s24  ;;  %s4040_s25 = scalar_lea.hbm %s5843_s9, 576 }
 0x3d7   : > { %2560 = vmatpush.msra.mxu3 %v2317_v59  ;;  %2419 = vmatpush.msra.mxu1 %v2284_v10  ;;  %v2282_v56 = vld [vmem:[#allocation8 + $0x60] sm:$0xff]  ;;  %v2281_v53 = vld [vmem:[#allocation8 + $0x58] sm:$0xff]  ;;  %v2280_v8 = vld [vmem:[#allocation8 + $0x50] sm:$0xff]  ;;  %s3581_s30 = sadd.s32 %s3747_s5, %s3746_s1 }
 0x3d8   : > { %2490 = vmatpush.msra.mxu2 %v2300_v20  ;;  %v2298_v13 = vld [vmem:[#allocation8 + $0xe0] sm:$0xff]  ;;  %v2297_v3 = vld [vmem:[#allocation8 + $0xd8] sm:$0xff]  ;;  %v2296_v14 = vld [vmem:[#allocation8 + $0xd0] sm:$0xff]  ;;  %s3693_s12 = sshll.u32 %s3581_s30, 3 }
 0x3d9   : > { %2561 = vmatpush.msra.mxu3 %v2316_v29  ;;  %2420 = vmatpush.msra.mxu1 %v2283_v36  ;;  %v2314_v32 = vld [vmem:[#allocation8 + $0x160] sm:$0xff]  ;;  %v2313_v12 = vld [vmem:[#allocation8 + $0x158] sm:$0xff]  ;;  %v2312_v28 = vld [vmem:[#allocation8 + $0x150] sm:$0xff]  ;;  %s3583_s19 = scalar_lea.hbm %s5843_s9, %s3693_s12 }
 0x3da   : > { %2491 = vmatpush.msra.mxu2 %v2299_v15  ;;  %v2279_v40 = vld [vmem:[#allocation8 + $0x48] sm:$0xff]  ;;  %v2278_v60 = vld [vmem:[#allocation8 + $0x40] sm:$0xff]  ;;  %v2277_v62 = vld [vmem:[#allocation8 + $0x38] sm:$0xff]  ;;  %s3586_s21 = sshll.u32 %s3583_s19, 4  ;;  %s3587_s21 = int_to_ptr.hbm [resolvable:$true] %s3586_s21 }
 0x3db   : > { %2562 = vmatpush.msra.mxu3 %v2315_v35  ;;  %2421 = vmatpush.msra.mxu1 %v2282_v56  ;;  %v2295_v24 = vld [vmem:[#allocation8 + $0xc8] sm:$0xff]  ;;  %v2294_v58 = vld [vmem:[#allocation8 + $0xc0] sm:$0xff]  ;;  %v2293_v0 = vld [vmem:[#allocation8 + $0xb8] sm:$0xff]  ;;  %s4034_s29 = sshra.s32 %s3587_s21, 4  ;;  %s4035_s29 = int_to_ptr.hbm [resolvable:$true] %s4034_s29 }
 0x3dc   : > { %2492 = vmatpush.msra.mxu2 %v2298_v13  ;;  %v2311_v52 = vld [vmem:[#allocation8 + $0x148] sm:$0xff]  ;;  %v2310_v6 = vld [vmem:[#allocation8 + $0x140] sm:$0xff]  ;;  %v2309_v26 = vld [vmem:[#allocation8 + $0x138] sm:$0xff]  ;;  %s4036_s28 = scalar_lea.hbm %s4035_s29, 144  ;;  %p4041_p13 = scmp.lt.s32.totalorder %s4035_s29, %s5843_s9 }
 0x3dd   : > { %2563 = vmatpush.msra.mxu3 %v2314_v32  ;;  %2422 = vmatpush.msra.mxu1 %v2281_v53  ;;  %v2276_v7 = vld [vmem:[#allocation8 + $0x30] sm:$0xff]  ;;  %v2275_v46 = vld [vmem:[#allocation8 + $0x28] sm:$0xff]  ;;  %v2274_v30 = vld [vmem:[#allocation8 + $0x20] sm:$0xff]  ;;  %p4037_p10 = scmp.ne.s32.totalorder %s4035_s29, %s4036_s28  ;;  %p4042_p0 = scmp.lt.s32.totalorder %s4040_s25, %s4036_s28 }
 0x3de   : > { %2493 = vmatpush.msra.mxu2 %v2297_v3  ;;  %v2292_v41 = vld [vmem:[#allocation8 + $0xb0] sm:$0xff]  ;;  %v2291_v4 = vld [vmem:[#allocation8 + $0xa8] sm:$0xff]  ;;  %v2290_v17 = vld [vmem:[#allocation8 + $0xa0] sm:$0xff] }
 0x3df   : > { %2564 = vmatpush.msra.mxu3 %v2313_v12  ;;  %2423 = vmatpush.msra.mxu1 %v2280_v8  ;;  %v2308_v45 = vld [vmem:[#allocation8 + $0x130] sm:$0xff]  ;;  %v2307_v50 = vld [vmem:[#allocation8 + $0x128] sm:$0xff]  ;;  %v2306_v19 = vld [vmem:[#allocation8 + $0x120] sm:$0xff]  ;;  %p4038_p11 = pnand %p4037_p10, %p4236_p3  ;;  %p4043_p1 = por %p4042_p0, %p4041_p13 }
 0x3e0   : > { %2494 = vmatpush.msra.mxu2 %v2296_v14  ;;  %v2273_v54 = vld [vmem:[#allocation8 + $0x18] sm:$0xff]  ;;  %v2272_v42 = vld [vmem:[#allocation8 + $0x10] sm:$0xff]  ;;  %v2271_v9 = vld [vmem:[#allocation8 + $0x8] sm:$0xff] }
 0x3e1   : > { %2565 = vmatpush.msra.mxu3 %v2312_v28  ;;  %2424 = vmatpush.msra.mxu1 %v2279_v40  ;;  %v2289_v16 = vld [vmem:[#allocation8 + $0x98] sm:$0xff]  ;;  %v2288_v21 = vld [vmem:[#allocation8 + $0x90] sm:$0xff]  ;;  %v2287_v33 = vld [vmem:[#allocation8 + $0x88] sm:$0xff]  ;;  %p4039_p12 = pneg %p4038_p11 }
 0x3e2   : > { %2495 = vmatpush.msra.mxu2 %v2295_v24  ;;  %v2305_v63 = vld [vmem:[#allocation8 + $0x118] sm:$0xff]  ;;  %v2304_v51 = vld [vmem:[#allocation8 + $0x110] sm:$0xff]  ;;  %v2303_v48 = vld [vmem:[#allocation8 + $0x108] sm:$0xff] }
 0x3e3   : > { %2566 = vmatpush.msra.mxu3 %v2311_v52  ;;  %2425 = vmatpush.msra.mxu1 %v2278_v60  ;;  %v2270_v43 = vld [vmem:[#allocation8] sm:$0xff]  ;;  %v2140_v23 = vld [vmem:[#allocation3] sm:$0xff]  ;;  %v2348_v39 = vld [vmem:[#allocation8 + $0x270] sm:$0xff]  ;;  %p4044_p2 = pnand %p4043_p1, %p4039_p12 }
 0x3e4   : > { %2496 = vmatpush.msra.mxu2 %v2294_v58  ;;  %v2286_v25 = vld [vmem:[#allocation8 + $0x80] sm:$0xff]  ;;  %v2349_v49 = vld [vmem:[#allocation8 + $0x278] sm:$0xff]  ;;  %v2332_v37 = vld [vmem:[#allocation8 + $0x1f0] sm:$0xff] }
 0x3e5   : > { %2567 = vmatpush.msra.mxu3 %v2310_v6  ;;  %2426 = vmatpush.msra.mxu1 %v2277_v62  ;;  %v2158_v22 = vld [vmem:[#allocation3 + $0x1] sm:$0xff]  ;;  %v2347_v44 = vld [vmem:[#allocation8 + $0x268] sm:$0xff]  ;;  %v2344_v2 = vld [vmem:[#allocation8 + $0x250] sm:$0xff] }
 0x3e6   : > { %2497 = vmatpush.msra.mxu2 %v2293_v0  ;;  %v2302_v47 = vld [vmem:[#allocation8 + $0x100] sm:$0xff]  ;;  %v2333_v27 = vld [vmem:[#allocation8 + $0x1f8] sm:$0xff]  ;;  %v2331_v34 = vld [vmem:[#allocation8 + $0x1e8] sm:$0xff] }
 0x3e7   : > { %2568 = vmatpush.msra.mxu3 %v2309_v26  ;;  %2427 = vmatpush.msra.mxu1 %v2276_v7  ;;  %v2176_v5 = vld [vmem:[#allocation3 + $0x2] sm:$0xff]  ;;  %v2177_v57 = vld [vmem:[#allocation3 + $0xa] sm:$0xff]  ;;  %v5260_v20 = vld [vmem:[#allocation3 + $0x12] sm:$0xff] }
 0x3e8   : > { %2498 = vmatpush.msra.mxu2 %v2292_v41  ;;  %v2346_v18 = vld [vmem:[#allocation8 + $0x260] sm:$0xff]  ;;  %v2345_v61 = vld [vmem:[#allocation8 + $0x258] sm:$0xff]  ;;  %v2142_v31 = vld [vmem:[#allocation3 + $0x10] sm:$0xff] }
 0x3e9   : > { %2569 = vmatpush.msra.mxu3 %v2308_v45  ;;  %2428 = vmatpush.msra.mxu1 %v2275_v46  ;;  %v2141_v11 = vld [vmem:[#allocation3 + $0x8] sm:$0xff]  ;;  %v2329_v55 = vld [vmem:[#allocation8 + $0x1d8] sm:$0xff]  ;;  %v2160_v10 = vld [vmem:[#allocation3 + $0x11] sm:$0xff] }
 0x3ea   : > { %2499 = vmatpush.msra.mxu2 %v2291_v4  ;;  %v2159_v38 = vld [vmem:[#allocation3 + $0x9] sm:$0xff]  ;;  %v2328_v59 = vld [vmem:[#allocation8 + $0x1d0] sm:$0xff]  ;;  %v2144_v32 = vld [vmem:[#allocation3 + $0x20] sm:$0xff] }
 0x3eb   : > { %2570 = vmatpush.msra.mxu3 %v2307_v50  ;;  %2429 = vmatpush.msra.mxu1 %v2274_v30  ;;  %v2330_v1 = vld [vmem:[#allocation8 + $0x1e0] sm:$0xff]  ;;  %v2343_v36 = vld [vmem:[#allocation8 + $0x248] sm:$0xff]  ;;  %v2143_v15 = vld [vmem:[#allocation3 + $0x18] sm:$0xff] }
 0x3ec   : > { %2500 = vmatpush.msra.mxu2 %v2290_v17  ;;  %v2161_v29 = vld [vmem:[#allocation3 + $0x19] sm:$0xff]  ;;  %v2327_v56 = vld [vmem:[#allocation8 + $0x1c8] sm:$0xff]  ;;  %v2342_v13 = vld [vmem:[#allocation8 + $0x240] sm:$0xff] }
 0x3ed   : > { %2571 = vmatpush.msra.mxu3 %v2306_v19  ;;  %2430 = vmatpush.msra.mxu1 %v2273_v54  ;;  %v5263_v35 = vld [vmem:[#allocation3 + $0x1a] sm:$0xff]  ;;  %v5266_v3 = vld [vmem:[#allocation3 + $0x22] sm:$0xff]  ;;  %v5269_v28 = vld [vmem:[#allocation3 + $0x2a] sm:$0xff] }
 0x3ee   : > { %2501 = vmatpush.msra.mxu2 %v2289_v16  ;;  %v2162_v53 = vld [vmem:[#allocation3 + $0x21] sm:$0xff]  ;;  %v2163_v14 = vld [vmem:[#allocation3 + $0x29] sm:$0xff]  ;;  %v2164_v60 = vld [vmem:[#allocation3 + $0x31] sm:$0xff] }
 0x3ef   : > { %2572 = vmatpush.msra.mxu3 %v2305_v63  ;;  %2431 = vmatpush.msra.mxu1 %v2272_v42  ;;  %v2326_v12 = vld [vmem:[#allocation8 + $0x1c0] sm:$0xff]  ;;  %v2341_v40 = vld [vmem:[#allocation8 + $0x238] sm:$0xff]  ;;  %v2146_v52 = vld [vmem:[#allocation3 + $0x30] sm:$0xff] }
 0x3f0   : > { %2502 = vmatpush.msra.mxu2 %v2288_v21  ;;  %v2145_v8 = vld [vmem:[#allocation3 + $0x28] sm:$0xff]  ;;  %v2325_v24 = vld [vmem:[#allocation8 + $0x1b8] sm:$0xff]  ;;  %v5272_v58 = vld [vmem:[#allocation3 + $0x32] sm:$0xff] }
 0x3f1   : > { %2573 = vmatpush.msra.mxu3 %v2304_v51  ;;  %2432 = vmatpush.msra.mxu1 %v2271_v9  ;;  %v2340_v6 = vld [vmem:[#allocation8 + $0x230] sm:$0xff]  ;;  %v2339_v41 = vld [vmem:[#allocation8 + $0x228] sm:$0xff]  ;;  %v2148_v46 = vld [vmem:[#allocation3 + $0x40] sm:$0xff] }
 0x3f2   : > { %2503 = vmatpush.msra.mxu2 %v2287_v33  ;;  %v2324_v62 = vld [vmem:[#allocation8 + $0x1b0] sm:$0xff]  ;;  %v2323_v45 = vld [vmem:[#allocation8 + $0x1a8] sm:$0xff]  ;;  %v2166_v4 = vld [vmem:[#allocation3 + $0x41] sm:$0xff] }
 0x3f3   : > { %2574 = vmatpush.msra.mxu3 %v2303_v48  ;;  %2433 = vmatpush.msra.mxu1 %v2270_v43  ;;  %v2147_v0 = vld [vmem:[#allocation3 + $0x38] sm:$0xff]  ;;  %v5278_v50 = vld [vmem:[#allocation3 + $0x42] sm:$0xff]  ;;  %v5281_v16 = vld [vmem:[#allocation3 + $0x4a] sm:$0xff] }
 0x3f4   : > { %2504 = vmatpush.msra.mxu2 %v2286_v25  ;;  %2434 = vmatmul.f32.vlgmr.msra.gmra.mxu1 %v2140_v23  ;;  %v2165_v26 = vld [vmem:[#allocation3 + $0x39] sm:$0xff]  ;;  %v2338_v30 = vld [vmem:[#allocation8 + $0x220] sm:$0xff]  ;;  %v2150_v42 = vld [vmem:[#allocation3 + $0x50] sm:$0xff] }
 0x3f5   : > { %2505 = vmatmul.f32.vlgmr.msra.gmra.mxu2 %v2158_v22  ;;  %2575 = vmatpush.msra.mxu3 %v2302_v47  ;;  %v5275_v7 = vld [vmem:[#allocation3 + $0x3a] sm:$0xff]  ;;  %v2322_v17 = vld [vmem:[#allocation8 + $0x1a0] sm:$0xff]  ;;  %v2168_v21 = vld [vmem:[#allocation3 + $0x51] sm:$0xff] }
 0x3f6   : > { %2702 = vmatpush.msrb.mxu2 %v2349_v49  ;;  %2576 = vmatmul.f32.vlgmr.msra.gmra.mxu3 %v2176_v5  ;;  %v2149_v19 = vld [vmem:[#allocation3 + $0x48] sm:$0xff]  ;;  %v2337_v63 = vld [vmem:[#allocation8 + $0x218] sm:$0xff]  ;;  %v5284_v51 = vld [vmem:[#allocation3 + $0x52] sm:$0xff] }
 0x3f7   : > { %2631 = vmatpush.msrb.mxu1 %v2333_v27  ;;  %v2167_v54 = vld [vmem:[#allocation3 + $0x49] sm:$0xff]  ;;  %v2321_v9 = vld [vmem:[#allocation8 + $0x198] sm:$0xff]  ;;  %v2336_v48 = vld [vmem:[#allocation8 + $0x210] sm:$0xff] }
 0x3f8   : > { %2703 = vmatpush.msrb.mxu2 %v2348_v39  ;;  %v2365_v33 = vld [vmem:[#allocation8 + $0x2f8] sm:$0xff]  ;;  %v2364_v43 = vld [vmem:[#allocation8 + $0x2f0] sm:$0xff]  ;;  %v2363_v25 = vld [vmem:[#allocation8 + $0x2e8] sm:$0xff] }
 0x3f9   : > { %2632 = vmatpush.msrb.mxu1 %v2332_v37  ;;  %2773 = vmatpush.msrb.mxu3 %v2365_v33  ;;  %v2151_v23 = vld [vmem:[#allocation3 + $0x58] sm:$0xff]  ;;  %v2362_v5 = vld [vmem:[#allocation8 + $0x2e0] sm:$0xff]  ;;  %v2361_v27 = vld [vmem:[#allocation8 + $0x2d8] sm:$0xff] }
 0x3fa   : > { %2704 = vmatpush.msrb.mxu2 %v2347_v44  ;;  %v2169_v22 = vld [vmem:[#allocation3 + $0x59] sm:$0xff]  ;;  %v2366_v33 = vld [vmem:[#allocation8 + $0x300] sm:$0xff] }
 0x3fb   : > { %2633 = vmatpush.msrb.mxu1 %v2331_v34  ;;  %2774 = vmatpush.msrb.mxu3 %v2364_v43  ;;  %v5287_v49 = vld [vmem:[#allocation3 + $0x5a] sm:$0xff]  ;;  %v5307_v43 = vld [vmem:[%s5840_s6] ss:$0 sm:$0xff] }
 0x3fc   : > { %2705 = vmatpush.msrb.mxu2 %v2346_v18  ;;  %2437 = vmatmul.f32.gmra.mxu1 %v2141_v11  ;;  %v2320_v47 = vld [vmem:[#allocation8 + $0x190] sm:$0xff]  ;;  %v2381_v39 = vld [vmem:[#allocation8 + $0x378] sm:$0xff]  ;;  %v2335_v11 = vld [vmem:[#allocation8 + $0x208] sm:$0xff] }
 0x3fd   : > { %2508 = vmatmul.f32.gmra.mxu2 %v2159_v38  ;;  %2634 = vmatpush.msrb.mxu1 %v2330_v1  ;;  %v2360_v37 = vld [vmem:[#allocation8 + $0x2d0] sm:$0xff]  ;;  %v2152_v34 = vld [vmem:[#allocation3 + $0x60] sm:$0xff]  ;;  %v2359_v38 = vld [vmem:[#allocation8 + $0x2c8] sm:$0xff] }
 0x3fe   : > { %2706 = vmatpush.msrb.mxu2 %v2345_v61  ;;  %2579 = vmatmul.f32.gmra.mxu3 %v2177_v57  ;;  %v2380_v44 = vld [vmem:[#allocation8 + $0x370] sm:$0xff]  ;;  %v2170_v18 = vld [vmem:[#allocation3 + $0x61] sm:$0xff]  ;;  %v2379_v1 = vld [vmem:[#allocation8 + $0x368] sm:$0xff] }
 0x3ff   : > { %2635 = vmatpush.msrb.mxu1 %v2329_v55  ;;  %2775 = vmatpush.msrb.mxu3 %v2363_v25  ;;  %v5290_v61 = vld [vmem:[#allocation3 + $0x62] sm:$0xff] }
 0x400   : > { %2707 = vmatpush.msrb.mxu2 %v2344_v2  ;;  %2844 = vmatpush.msra.mxu0 %v2381_v39  ;;  %v2358_v57 = vld [vmem:[#allocation8 + $0x2c0] sm:$0xff]  ;;  %v2319_v2 = vld [vmem:[#allocation8 + $0x188] sm:$0xff] }
 0x401   : > { %2636 = vmatpush.msrb.mxu1 %v2328_v59  ;;  %2776 = vmatpush.msrb.mxu3 %v2362_v5  ;;  %v2378_v55 = vld [vmem:[#allocation8 + $0x360] sm:$0xff]  ;;  %v2356_v59 = vld [vmem:[#allocation8 + $0x2b0] sm:$0xff]  ;;  %v2411_v39 = vld [vmem:[#allocation8 + $0x468] sm:$0xff] }
 0x402   : > { %2708 = vmatpush.msrb.mxu2 %v2343_v36  ;;  %2845 = vmatpush.msra.mxu0 %v2380_v44  ;;  %v2376_v36 = vld [vmem:[#allocation8 + $0x350] sm:$0xff]  ;;  %v5310_v5 = vld [vmem:[#allocation3 + $0x82] sm:$0xff]  ;;  %v5314_v44 = vld [vmem:[#allocation3 + $0x2c] sm:$0xff] }
 0x403   : > { %2637 = vmatpush.msrb.mxu1 %v2327_v56  ;;  %2777 = vmatpush.msrb.mxu3 %v2361_v27  ;;  %v2334_v56 = vld [vmem:[#allocation8 + $0x200] sm:$0xff] }
 0x404   : > { %2440 = vmatmul.f32.gmra.mxu1 %v2142_v31  ;;  %2709 = vmatpush.msrb.mxu2 %v2342_v13  ;;  %v2357_v31 = vld [vmem:[#allocation8 + $0x2b8] sm:$0xff]  ;;  %v2355_v13 = vld [vmem:[#allocation8 + $0x2a8] sm:$0xff] }
 0x405   : > { %2511 = vmatmul.f32.gmra.mxu2 %v2160_v10  ;;  %2638 = vmatpush.msrb.mxu1 %v2326_v12  ;;  %v2377_v10 = vld [vmem:[#allocation8 + $0x358] sm:$0xff]  ;;  %v2354_v12 = vld [vmem:[#allocation8 + $0x2a0] sm:$0xff] }
 0x406   : > { %2582 = vmatmul.f32.gmra.mxu3 %v5260_v20  ;;  %2710 = vmatpush.msrb.mxu2 %v2341_v40  ;;  %v2373_v40 = vld [vmem:[#allocation8 + $0x338] sm:$0xff] }
 0x407   : > { %2639 = vmatpush.msrb.mxu1 %v2325_v24  ;;  %2778 = vmatpush.msrb.mxu3 %v2360_v37  ;;  %v2318_v24 = vld [vmem:[#allocation8 + $0x180] sm:$0xff] }
 0x408   : > { %2711 = vmatpush.msrb.mxu2 %v2340_v6  ;;  %2846 = vmatpush.msra.mxu0 %v2379_v1  ;;  %v2172_v6 = vld [vmem:[#allocation3 + $0x71] sm:$0xff]  ;;  %v2175_v1 = vld [vmem:[#allocation3 + $0x89] sm:$0xff] }
 0x409   : > { %2640 = vmatpush.msrb.mxu1 %v2324_v62  ;;  %2779 = vmatpush.msrb.mxu3 %v2359_v38  ;;  %v2372_v62 = vld [vmem:[#allocation8 + $0x330] sm:$0xff]  ;;  %v2157_v38 = vld [vmem:[#allocation3 + $0x88] sm:$0xff] }
 0x40a   : > { %2712 = vmatpush.msrb.mxu2 %v2339_v41  ;;  %2847 = vmatpush.msra.mxu0 %v2378_v55  ;;  %v2371_v41 = vld [vmem:[#allocation8 + $0x328] sm:$0xff] }
 0x40b   : > { %2641 = vmatpush.msrb.mxu1 %v2323_v45  ;;  %2780 = vmatpush.msrb.mxu3 %v2358_v57  ;;  %v2413_v45 = vld [vmem:[#allocation8 + $0x478] sm:$0xff]  ;;  %v2395_v55 = vld [vmem:[#allocation8 + $0x3e8] sm:$0xff] }
 0x40c   : > { %2443 = vmatmul.f32.gmra.mxu1 %v2143_v15  ;;  %2713 = vmatpush.msrb.mxu2 %v2338_v30  ;;  %v2153_v15 = vld [vmem:[#allocation3 + $0x68] sm:$0xff]  ;;  %v2369_v30 = vld [vmem:[#allocation8 + $0x318] sm:$0xff] }
 0x40d   : > { %2514 = vmatmul.f32.gmra.mxu2 %v2161_v29  ;;  %2642 = vmatpush.msrb.mxu1 %v2322_v17  ;;  %v2171_v29 = vld [vmem:[#allocation3 + $0x69] sm:$0xff]  ;;  %v2397_v17 = vld [vmem:[#allocation8 + $0x3f8] sm:$0xff] }
 0x40e   : > { %2585 = vmatmul.f32.gmra.mxu3 %v5263_v35  ;;  %2714 = vmatpush.msrb.mxu2 %v2337_v63  ;;  %v2368_v63 = vld [vmem:[#allocation8 + $0x310] sm:$0xff] }
 0x40f   : > { %2643 = vmatpush.msrb.mxu1 %v2321_v9  ;;  %2781 = vmatpush.msrb.mxu3 %v2357_v31  ;;  %v2412_v9 = vld [vmem:[#allocation8 + $0x470] sm:$0xff] }
 0x410   : > { %2715 = vmatpush.msrb.mxu2 %v2336_v48  ;;  %2848 = vmatpush.msra.mxu0 %v2377_v10  ;;  %v5302_v48 = vld [vmem:[#allocation3 + $0x24] sm:$0xff] }
 0x411   : > { %2644 = vmatpush.msrb.mxu1 %v2320_v47  ;;  %2782 = vmatpush.msrb.mxu3 %v2356_v59  ;;  %v2396_v47 = vld [vmem:[#allocation8 + $0x3f0] sm:$0xff] }
 0x412   : > { %2716 = vmatpush.msrb.mxu2 %v2335_v11  ;;  %2849 = vmatpush.msra.mxu0 %v2376_v36  ;;  %v5323_v59 = vld [vmem:[#allocation3 + $0x34] sm:$0xff] }
 0x413   : > { %2645 = vmatpush.msrb.mxu1 %v2319_v2  ;;  %2783 = vmatpush.msrb.mxu3 %v2355_v13  ;;  %v5319_v2 = vld [vmem:[#allocation3 + $0x8a] sm:$0xff]  ;;  %v2196_v13 = vld [vmem:[#allocation3 + $0x13] sm:$0xff] }
 0x414   : > { %2446 = vmatmul.f32.gmra.mxu1 %v2144_v32  ;;  %v2375_v32 = vld [vmem:[#allocation8 + $0x348] sm:$0xff]  ;;  %2717 = vmatpush.msrb.mxu2 %v2334_v56 }
 0x415   : > { %2517 = vmatmul.f32.gmra.mxu2 %v2162_v53  ;;  %v5293_v53 = vld [vmem:[#allocation3 + $0x6a] sm:$0xff]  ;;  %2850 = vmatpush.msra.mxu0 %v2375_v32 }
 0x416   : > { %2588 = vmatmul.f32.gmra.mxu3 %v5266_v3  ;;  %2646 = vmatpush.msrb.mxu1 %v2318_v24  ;;  %v5330_v24 = vld [vmem:[#allocation3 + $0x3c] sm:$0xff] }
 0x417   : > { %2784 = vmatpush.msrb.mxu3 %v2354_v12  ;;  %2986 = vmatpush.msra.mxu2 %v2413_v45  ;;  %v2394_v12 = vld [vmem:[#allocation8 + $0x3e0] sm:$0xff]  ;;  %v2215_v45 = vld [vmem:[#allocation3 + $0x1c] sm:$0xff] }
 0x418   : > { %2915 = vmatpush.msra.mxu1 %v2397_v17 }
 0x419   : > { %2987 = vmatpush.msra.mxu2 %v2412_v9  ;;  %v2408_v9 = vld [vmem:[#allocation8 + $0x450] sm:$0xff] }
 0x41a   : > { %2916 = vmatpush.msra.mxu1 %v2396_v47 }
 0x41b   : > { %2988 = vmatpush.msra.mxu2 %v2411_v39  ;;  %v2199_v39 = vld [vmem:[#allocation3 + $0x2b] sm:$0xff] }
 0x41c   : > { %2449 = vmatmul.f32.gmra.mxu1 %v2145_v8  ;;  %v2374_v8 = vld [vmem:[#allocation8 + $0x340] sm:$0xff] }
 0x41d   : > { %2520 = vmatmul.f32.gmra.mxu2 %v2163_v14  ;;  %v2353_v14 = vld [vmem:[#allocation8 + $0x298] sm:$0xff]  ;;  %2851 = vmatpush.msra.mxu0 %v2374_v8  ;;  %v2214_v8 = vld [vmem:[#allocation3 + $0x14] sm:$0xff] }
 0x41e   : > { %2591 = vmatmul.f32.gmra.mxu3 %v5269_v28  ;;  %2917 = vmatpush.msra.mxu1 %v2395_v55 }
 0x41f   : > { %2785 = vmatpush.msrb.mxu3 %v2353_v14  ;;  %2852 = vmatpush.msra.mxu0 %v2373_v40 }
 0x420   : > { %2918 = vmatpush.msra.mxu1 %v2394_v12 }
 0x421   : > { %2853 = vmatpush.msra.mxu0 %v2372_v62 }
 0x423   : > { %2854 = vmatpush.msra.mxu0 %v2371_v41 }
 0x424   : > { %2452 = vmatmul.f32.gmra.mxu1 %v2146_v52  ;;  %v2352_v52 = vld [vmem:[#allocation8 + $0x290] sm:$0xff] }
 0x425   : > { %2523 = vmatmul.f32.gmra.mxu2 %v2164_v60  ;;  %v2154_v60 = vld [vmem:[#allocation3 + $0x70] sm:$0xff]  ;;  %2786 = vmatpush.msrb.mxu3 %v2352_v52 }
 0x426   : > { %2594 = vmatmul.f32.gmra.mxu3 %v5272_v58 }
 0x42c   : > { %2455 = vmatmul.f32.gmra.mxu1 %v2147_v0  ;;  %v2351_v0 = vld [vmem:[#allocation8 + $0x288] sm:$0xff] }
 0x42d   : > { %2526 = vmatmul.f32.gmra.mxu2 %v2165_v26  ;;  %v5296_v26 = vld [vmem:[#allocation3 + $0x72] sm:$0xff]  ;;  %2787 = vmatpush.msrb.mxu3 %v2351_v0  ;;  %v2197_v0 = vld [vmem:[#allocation3 + $0x1b] sm:$0xff] }
 0x42e   : > { %2597 = vmatmul.f32.gmra.mxu3 %v5275_v7 }
 0x434   : > { %2458 = vmatmul.f32.gmra.mxu1 %v2148_v46  ;;  %v2350_v46 = vld [vmem:[#allocation8 + $0x280] sm:$0xff] }
 0x435   : > { %2529 = vmatmul.f32.gmra.mxu2 %v2166_v4  ;;  %v2370_v4 = vld [vmem:[#allocation8 + $0x320] sm:$0xff]  ;;  %2788 = vmatpush.msrb.mxu3 %v2350_v46 }
 0x436   : > { %2600 = vmatmul.f32.gmra.mxu3 %v5278_v50  ;;  %2855 = vmatpush.msra.mxu0 %v2370_v4 }
 0x438   : > { %2856 = vmatpush.msra.mxu0 %v2369_v30  ;;  %v5337_v30 = vld [vmem:[#allocation3 + $0x44] sm:$0xff] }
 0x43a   : > { %2857 = vmatpush.msra.mxu0 %v2368_v63  ;;  %v2198_v63 = vld [vmem:[#allocation3 + $0x23] sm:$0xff] }
 0x43c   : > { %2461 = vmatmul.f32.gmra.mxu1 %v2149_v19  ;;  %v2155_v19 = vld [vmem:[#allocation3 + $0x78] sm:$0xff] }
 0x43d   : > { %2532 = vmatmul.f32.gmra.mxu2 %v2167_v54  ;;  %v2173_v54 = vld [vmem:[#allocation3 + $0x79] sm:$0xff] }
 0x43e   : > { %2603 = vmatmul.f32.gmra.mxu3 %v5281_v16 }
 0x444   : > { %2464 = vmatmul.f32.gmra.mxu1 %v2150_v42  ;;  %v5299_v42 = vld [vmem:[#allocation3 + $0x7a] sm:$0xff] }
 0x445   : > { %2535 = vmatmul.f32.gmra.mxu2 %v2168_v21  ;;  %v2367_v21 = vld [vmem:[#allocation8 + $0x308] sm:$0xff] }
 0x446   : > { %2606 = vmatmul.f32.gmra.mxu3 %v5284_v51  ;;  %2858 = vmatpush.msra.mxu0 %v2367_v21 }
 0x448   : > { %2859 = vmatpush.msra.mxu0 %v2366_v33 }
 0x449   : > { %2860 = vmatmul.f32.vlgmr.msra.gmra.mxu0 %v5302_v48 }
 0x44c   : > { %2467 = vmatmul.f32.gmra.mxu1 %v2151_v23  ;;  %v2156_v23 = vld [vmem:[#allocation3 + $0x80] sm:$0xff] }
 0x44d   : > { %2538 = vmatmul.f32.gmra.mxu2 %v2169_v22  ;;  %v2174_v22 = vld [vmem:[#allocation3 + $0x81] sm:$0xff] }
 0x44e   : > { %2609 = vmatmul.f32.gmra.mxu3 %v5287_v49 }
 0x451   : > { %2863 = vmatmul.f32.gmra.mxu0 %v5314_v44 }
 0x454   : > { %2470 = vmatmul.f32.gmra.mxu1 %v2152_v34 }
 0x455   : > { %2541 = vmatmul.f32.gmra.mxu2 %v2170_v18 }
 0x456   : > { %2612 = vmatmul.f32.gmra.mxu3 %v5290_v61 }
 0x459   : > { %2866 = vmatmul.f32.gmra.mxu0 %v5323_v59 }
 0x45c   : > { %2473 = vmatmul.f32.gmra.mxu1 %v2153_v15  ;;  %v2410_v15 = vld [vmem:[#allocation8 + $0x460] sm:$0xff] }
 0x45d   : > { %2544 = vmatmul.f32.gmra.mxu2 %v2171_v29 }
 0x45e   : > { %2615 = vmatmul.f32.gmra.mxu3 %v5293_v53  ;;  %2989 = vmatpush.msra.mxu2 %v2410_v15  ;;  %v5361_v15 = vld [vmem:[#allocation3 + $0x5c] sm:$0xff] }
 0x461   : > { %2869 = vmatmul.f32.gmra.mxu0 %v5330_v24 }
 0x464   : > { %2476 = vmatmul.f32.gmra.mxu1 %v2154_v60  ;;  %v2409_v60 = vld [vmem:[#allocation8 + $0x458] sm:$0xff] }
 0x465   : > { %2547 = vmatmul.f32.gmra.mxu2 %v2172_v6 }
 0x466   : > { %2618 = vmatmul.f32.gmra.mxu3 %v5296_v26  ;;  %2990 = vmatpush.msra.mxu2 %v2409_v60 }
 0x468   : > { %2991 = vmatpush.msra.mxu2 %v2408_v9 }
 0x469   : > { %2872 = vmatmul.f32.gmra.mxu0 %v5337_v30 }
 0x46c   : > { %2479 = vmatmul.f32.gmra.mxu1 %v2155_v19 }
 0x46d   : > { %2550 = vmatmul.f32.gmra.mxu2 %v2173_v54 }
 0x46e   : > { %2621 = vmatmul.f32.gmra.mxu3 %v5299_v42 }
 0x471   : > { %v2435_v25 = vpop.f32.mrf.mxu1 }
 0x472   : > { %v2436_v27 = vadd.f32 %v5307_v43, %v2435_v25 }
 0x474   : > { %2482 = vmatmul.f32.gmra.mxu1 %v2156_v23  ;;  %v5345_v23 = vld [vmem:[#allocation3 + $0x4c] sm:$0xff] }
 0x475   : > { %2553 = vmatmul.f32.gmra.mxu2 %v2174_v22  ;;  %2875 = vmatmul.f32.gmra.mxu0 %v5345_v23 }
 0x476   : > { %2624 = vmatmul.f32.gmra.mxu3 %v5310_v5 }
 0x478   : > { %v2506_v37 = vpop.f32.mrf.mxu2 }
 0x479   : > { %v2507_v34 = vadd.f32 %v2506_v37, %v2436_v27  ;;  %v2438_v18 = vpop.f32.mrf.mxu1  ;;  %v2577_v11 = vpop.f32.mrf.mxu3 }
 0x47a   : > { %v2439_v31 = vadd.f32 %v5307_v43, %v2438_v18 }
 0x47b   : > { %v5316_v57 = vadd.f32 %v2577_v11, %v2507_v34  ;;  %v2407_v34 = vld [vmem:[#allocation8 + $0x448] sm:$0xff] }
 0x47c   : > { %2485 = vmatmul.f32.gmra.mxu1 %v2157_v38  ;;  %2992 = vmatpush.msra.mxu2 %v2407_v34  ;;  %v5353_v11 = vld [vmem:[#allocation3 + $0x54] sm:$0xff] }
 0x47d   : > { %2556 = vmatmul.f32.gmra.mxu2 %v2175_v1  ;;  %2878 = vmatmul.f32.gmra.mxu0 %v5353_v11 }
 0x47e   : > { %2627 = vmatmul.f32.gmra.mxu3 %v5319_v2 }
 0x480   : > { %v2509_v10 = vpop.f32.mrf.mxu2 }
 0x481   : > { %v2510_v36 = vadd.f32 %v2509_v10, %v2439_v31  ;;  %v2441_v29 = vpop.f32.mrf.mxu1  ;;  %v2580_v56 = vpop.f32.mrf.mxu3  ;;  %v2200_v31 = vld [vmem:[#allocation3 + $0x33] sm:$0xff] }
 0x482   : > { %v2442_v14 = vadd.f32 %v5307_v43, %v2441_v29 }
 0x483   : > { %v5325_v32 = vadd.f32 %v2580_v56, %v2510_v36  ;;  %v2406_v36 = vld [vmem:[#allocation8 + $0x440] sm:$0xff] }
 0x484   : > { %2647 = vmatmul.f32.vlgmr.msrb.gmra.mxu1 %v5260_v20  ;;  %v2393_v20 = vld [vmem:[#allocation8 + $0x3d8] sm:$0xff]  ;;  %2993 = vmatpush.msra.mxu2 %v2406_v36  ;;  %v2390_v56 = vld [vmem:[#allocation8 + $0x3c0] sm:$0xff] }
 0x485   : > { %2718 = vmatmul.f32.vlgmr.msrb.gmra.mxu2 %v2196_v13  ;;  %2919 = vmatpush.msra.mxu1 %v2393_v20  ;;  %v2404_v20 = vld [vmem:[#allocation8 + $0x430] sm:$0xff] }
 0x486   : > { %2789 = vmatmul.f32.vlgmr.msrb.gmra.mxu3 %v2214_v8  ;;  %v2201_v8 = vld [vmem:[#allocation3 + $0x3b] sm:$0xff]  ;;  %2881 = vmatmul.f32.gmra.mxu0 %v5361_v15 }
 0x488   : > { %v2512_v40 = vpop.f32.mrf.mxu2 }
 0x489   : > { %v2513_v52 = vadd.f32 %v2512_v40, %v2442_v14  ;;  %v2444_v6 = vpop.f32.mrf.mxu1  ;;  %v2583_v62 = vpop.f32.mrf.mxu3 }
 0x48a   : > { %v2445_v46 = vadd.f32 %v5307_v43, %v2444_v6  ;;  %v2389_v6 = vld [vmem:[#allocation8 + $0x3b8] sm:$0xff] }
 0x48b   : > { %v5332_v41 = vadd.f32 %v2583_v62, %v2513_v52  ;;  %v5369_v52 = vld [vmem:[#allocation3 + $0x64] sm:$0xff] }
 0x48c   : > { %2650 = vmatmul.f32.gmra.mxu1 %v5263_v35  ;;  %v2392_v35 = vld [vmem:[#allocation8 + $0x3d0] sm:$0xff] }
 0x48d   : > { %2721 = vmatmul.f32.gmra.mxu2 %v2197_v0  ;;  %2920 = vmatpush.msra.mxu1 %v2392_v35 }
 0x48e   : > { %2792 = vmatmul.f32.gmra.mxu3 %v2215_v45  ;;  %v2202_v45 = vld [vmem:[#allocation3 + $0x43] sm:$0xff]  ;;  %2884 = vmatmul.f32.gmra.mxu0 %v5369_v52 }
 0x490   : > { %v2515_v4 = vpop.f32.mrf.mxu2 }
 0x491   : > { %v2516_v17 = vadd.f32 %v2515_v4, %v2445_v46  ;;  %v2447_v19 = vpop.f32.mrf.mxu1  ;;  %v2586_v54 = vpop.f32.mrf.mxu3  ;;  %v5377_v4 = vld [vmem:[#allocation3 + $0x6c] sm:$0xff] }
 0x492   : > { %v2448_v33 = vadd.f32 %v5307_v43, %v2447_v19 }
 0x493   : > { %v5339_v21 = vadd.f32 %v2586_v54, %v2516_v17 }
 0x494   : > { %2653 = vmatmul.f32.gmra.mxu1 %v5266_v3 }
 0x495   : > { %2724 = vmatmul.f32.gmra.mxu2 %v2198_v63  ;;  %v2203_v63 = vld [vmem:[#allocation3 + $0x4b] sm:$0xff] }
 0x496   : > { %2795 = vmatmul.f32.gmra.mxu3 %v5302_v48  ;;  %v2391_v48 = vld [vmem:[#allocation8 + $0x3c8] sm:$0xff]  ;;  %2887 = vmatmul.f32.gmra.mxu0 %v5377_v4 }
 0x497   : > { %2921 = vmatpush.msra.mxu1 %v2391_v48  ;;  %v5393_v48 = vld [vmem:[#allocation3 + $0x7c] sm:$0xff] }
 0x498   : > { %v2518_v25 = vpop.f32.mrf.mxu2 }
 0x499   : > { %v2519_v22 = vadd.f32 %v2518_v25, %v2448_v33  ;;  %v2450_v47 = vpop.f32.mrf.mxu1  ;;  %v2589_v27 = vpop.f32.mrf.mxu3  ;;  %2922 = vmatpush.msra.mxu1 %v2390_v56  ;;  %v2388_v33 = vld [vmem:[#allocation8 + $0x3b0] sm:$0xff]  ;;  %v2401_v56 = vld [vmem:[#allocation8 + $0x418] sm:$0xff] }
 0x49a   : > { %v2451_v3 = vadd.f32 %v5307_v43, %v2450_v47  ;;  %v5385_v25 = vld [vmem:[#allocation3 + $0x74] sm:$0xff] }
 0x49b   : > { %v5347_v37 = vadd.f32 %v2589_v27, %v2519_v22  ;;  %2923 = vmatpush.msra.mxu1 %v2389_v6 }
 0x49c   : > { %2656 = vmatmul.f32.gmra.mxu1 %v5269_v28 }
 0x49d   : > { %2727 = vmatmul.f32.gmra.mxu2 %v2199_v39  ;;  %2924 = vmatpush.msra.mxu1 %v2388_v33  ;;  %v2204_v39 = vld [vmem:[#allocation3 + $0x53] sm:$0xff] }
 0x49e   : > { %2798 = vmatmul.f32.gmra.mxu3 %v5314_v44  ;;  %2890 = vmatmul.f32.gmra.mxu0 %v5385_v25 }
 0x4a0   : > { %v2521_v18 = vpop.f32.mrf.mxu2 }
 0x4a1   : > { %v2522_v38 = vadd.f32 %v2521_v18, %v2451_v3  ;;  %v2453_v1 = vpop.f32.mrf.mxu1  ;;  %v2592_v55 = vpop.f32.mrf.mxu3  ;;  %v2387_v3 = vld [vmem:[#allocation8 + $0x3a8] sm:$0xff] }
 0x4a2   : > { %v2454_v28 = vadd.f32 %v5307_v43, %v2453_v1  ;;  %2925 = vmatpush.msra.mxu1 %v2387_v3 }
 0x4a3   : > { %v5355_v10 = vadd.f32 %v2592_v55, %v2522_v38  ;;  %v2402_v38 = vld [vmem:[#allocation8 + $0x420] sm:$0xff] }
 0x4a4   : > { %2659 = vmatmul.f32.gmra.mxu1 %v5272_v58  ;;  %v2405_v58 = vld [vmem:[#allocation8 + $0x438] sm:$0xff] }
 0x4a5   : > { %2730 = vmatmul.f32.gmra.mxu2 %v2200_v31  ;;  %v2205_v31 = vld [vmem:[#allocation3 + $0x5b] sm:$0xff] }
 0x4a6   : > { %2801 = vmatmul.f32.gmra.mxu3 %v5323_v59  ;;  %2994 = vmatpush.msra.mxu2 %v2405_v58 }
 0x4a7   : > { %2893 = vmatmul.f32.gmra.mxu0 %v5393_v48 }
 0x4a8   : > { %v2524_v44 = vpop.f32.mrf.mxu2  ;;  %2995 = vmatpush.msra.mxu2 %v2404_v20  ;;  %v2384_v20 = vld [vmem:[#allocation8 + $0x390] sm:$0xff] }
 0x4a9   : > { %v2525_v29 = vadd.f32 %v2524_v44, %v2454_v28  ;;  %v2456_v13 = vpop.f32.mrf.mxu1  ;;  %v2595_v12 = vpop.f32.mrf.mxu3  ;;  %v2386_v28 = vld [vmem:[#allocation8 + $0x3a0] sm:$0xff] }
 0x4aa   : > { %v2457_v40 = vadd.f32 %v5307_v43, %v2456_v13  ;;  %2926 = vmatpush.msra.mxu1 %v2386_v28  ;;  %v5401_v44 = vld [vmem:[#allocation3 + $0x84] sm:$0xff] }
 0x4ab   : > { %v5363_v14 = vadd.f32 %v2595_v12, %v2525_v29 }
 0x4ac   : > { %2662 = vmatmul.f32.gmra.mxu1 %v5275_v7 }
 0x4ad   : > { %2733 = vmatmul.f32.gmra.mxu2 %v2201_v8  ;;  %v2206_v8 = vld [vmem:[#allocation3 + $0x63] sm:$0xff] }
 0x4ae   : > { %2804 = vmatmul.f32.gmra.mxu3 %v5330_v24 }
 0x4af   : > { %2896 = vmatmul.f32.gmra.mxu0 %v5401_v44 }
 0x4b0   : > { %v2527_v59 = vpop.f32.mrf.mxu2 }
 0x4b1   : > { %v2528_v60 = vadd.f32 %v2527_v59, %v2457_v40  ;;  %v2459_v62 = vpop.f32.mrf.mxu1  ;;  %v2598_v0 = vpop.f32.mrf.mxu3  ;;  %v5409_v59 = vld [vmem:[#allocation3 + $0x8c] sm:$0xff] }
 0x4b2   : > { %v2460_v7 = vadd.f32 %v5307_v43, %v2459_v62 }
 0x4b3   : > { %v5371_v46 = vadd.f32 %v2598_v0, %v2528_v60  ;;  %v2207_v0 = vld [vmem:[#allocation3 + $0x6b] sm:$0xff] }
 0x4b4   : > { %2665 = vmatmul.f32.gmra.mxu1 %v5278_v50 }
 0x4b5   : > { %2736 = vmatmul.f32.gmra.mxu2 %v2202_v45 }
 0x4b6   : > { %2807 = vmatmul.f32.gmra.mxu3 %v5337_v30  ;;  %v2403_v30 = vld [vmem:[#allocation8 + $0x428] sm:$0xff] }
 0x4b7   : > { %2996 = vmatpush.msra.mxu2 %v2403_v30  ;;  %2899 = vmatmul.f32.gmra.mxu0 %v5409_v59 }
 0x4b8   : > { %v2530_v24 = vpop.f32.mrf.mxu2 }
 0x4b9   : > { %v2531_v17 = vadd.f32 %v2530_v24, %v2460_v7  ;;  %v2462_v19 = vpop.f32.mrf.mxu1  ;;  %v2601_v54 = vpop.f32.mrf.mxu3  ;;  %2997 = vmatpush.msra.mxu2 %v2402_v38  ;;  %v2400_v7 = vld [vmem:[#allocation8 + $0x410] sm:$0xff]  ;;  %v2382_v38 = vld [vmem:[#allocation8 + $0x380] sm:$0xff] }
 0x4ba   : > { %v2463_v50 = vadd.f32 %v5307_v43, %v2462_v19  ;;  %v5417_v24 = vld [vmem:[#allocation3 + $0x94] sm:$0xff] }
 0x4bb   : > { %v5379_v9 = vadd.f32 %v2601_v54, %v2531_v17  ;;  %2998 = vmatpush.msra.mxu2 %v2401_v56 }
 0x4bc   : > { %2668 = vmatmul.f32.gmra.mxu1 %v5281_v16 }
 0x4bd   : > { %2739 = vmatmul.f32.gmra.mxu2 %v2203_v63  ;;  %v2208_v63 = vld [vmem:[#allocation3 + $0x73] sm:$0xff] }
 0x4be   : > { %2810 = vmatmul.f32.gmra.mxu3 %v5345_v23  ;;  %2999 = vmatpush.msra.mxu2 %v2400_v7  ;;  %v2195_v7 = vld [vmem:[#allocation3 + $0x9a] sm:$0xff] }
 0x4bf   : > { %2902 = vmatmul.f32.gmra.mxu0 %v5417_v24 }
 0x4c0   : > { %v2533_v35 = vpop.f32.mrf.mxu2 }
 0x4c1   : > { %v2534_v22 = vadd.f32 %v2533_v35, %v2463_v50  ;;  %v2465_v47 = vpop.f32.mrf.mxu1  ;;  %v2604_v27 = vpop.f32.mrf.mxu3  ;;  %v2399_v50 = vld [vmem:[#allocation8 + $0x408] sm:$0xff]  ;;  %v2231_v35 = vld [vmem:[#allocation3 + $0x9c] sm:$0xff] }
 0x4c2   : > { %v2466_v16 = vadd.f32 %v5307_v43, %v2465_v47  ;;  %3000 = vmatpush.msra.mxu2 %v2399_v50 }
 0x4c3   : > { %v5387_v34 = vadd.f32 %v2604_v27, %v2534_v22 }
 0x4c4   : > { %2671 = vmatmul.f32.gmra.mxu1 %v5284_v51 }
 0x4c5   : > { %2742 = vmatmul.f32.gmra.mxu2 %v2204_v39  ;;  %v2209_v39 = vld [vmem:[#allocation3 + $0x7b] sm:$0xff] }
 0x4c6   : > { %2813 = vmatmul.f32.gmra.mxu3 %v5353_v11 }
 0x4c7   : > { %2905 = vmatmul.f32.gmra.mxu0 %v2231_v35 }
 0x4c8   : > { %v2536_v23 = vpop.f32.mrf.mxu2 }
 0x4c9   : > { %v2537_v18 = vadd.f32 %v2536_v23, %v2466_v16  ;;  %v2468_v1 = vpop.f32.mrf.mxu1  ;;  %v2607_v55 = vpop.f32.mrf.mxu3  ;;  %v2232_v23 = vld [vmem:[#allocation3 + $0xa4] sm:$0xff] }
 0x4ca   : > { %v2469_v51 = vadd.f32 %v5307_v43, %v2468_v1 }
 0x4cb   : > { %v5395_v36 = vadd.f32 %v2607_v55, %v2537_v18 }
 0x4cc   : > { %2674 = vmatmul.f32.gmra.mxu1 %v5287_v49  ;;  %v2385_v49 = vld [vmem:[#allocation8 + $0x398] sm:$0xff] }
 0x4cd   : > { %2745 = vmatmul.f32.gmra.mxu2 %v2205_v31  ;;  %2927 = vmatpush.msra.mxu1 %v2385_v49  ;;  %v2210_v31 = vld [vmem:[#allocation3 + $0x83] sm:$0xff] }
 0x4ce   : > { %2816 = vmatmul.f32.gmra.mxu3 %v5361_v15 }
 0x4cf   : > { %2928 = vmatpush.msra.mxu1 %v2384_v20  ;;  %2908 = vmatmul.f32.gmra.mxu0 %v2232_v23  ;;  %v2255_v23 = vld [vmem:[#allocation3 + $0x3e] sm:$0xff] }
 0x4d0   : > { %v2539_v11 = vpop.f32.mrf.mxu2 }
 0x4d1   : > { %v2540_v29 = vadd.f32 %v2539_v11, %v2469_v51  ;;  %v2471_v13 = vpop.f32.mrf.mxu1  ;;  %v2610_v12 = vpop.f32.mrf.mxu3 }
 0x4d2   : > { %v2472_v58 = vadd.f32 %v5307_v43, %v2471_v13  ;;  %v2211_v13 = vld [vmem:[#allocation3 + $0x8b] sm:$0xff] }
 0x4d3   : > { %v5403_v40 = vadd.f32 %v2610_v12, %v2540_v29 }
 0x4d4   : > { %2677 = vmatmul.f32.gmra.mxu1 %v5290_v61 }
 0x4d5   : > { %2748 = vmatmul.f32.gmra.mxu2 %v2206_v8 }
 0x4d6   : > { %2819 = vmatmul.f32.gmra.mxu3 %v5369_v52 }
 0x4d8   : > { %v2542_v15 = vpop.f32.mrf.mxu2 }
 0x4d9   : > { %v2543_v60 = vadd.f32 %v2542_v15, %v2472_v58  ;;  %v2474_v6 = vpop.f32.mrf.mxu1  ;;  %v2613_v62 = vpop.f32.mrf.mxu3  ;;  %v2194_v15 = vld [vmem:[#allocation3 + $0x92] sm:$0xff] }
 0x4da   : > { %v2475_v61 = vadd.f32 %v5307_v43, %v2474_v6 }
 0x4db   : > { %v5411_v45 = vadd.f32 %v2613_v62, %v2543_v60  ;;  %v2212_v60 = vld [vmem:[#allocation3 + $0x93] sm:$0xff] }
 0x4dc   : > { %2680 = vmatmul.f32.gmra.mxu1 %v5293_v53 }
 0x4dd   : > { %2751 = vmatmul.f32.gmra.mxu2 %v2207_v0 }
 0x4de   : > { %2822 = vmatmul.f32.gmra.mxu3 %v5377_v4  ;;  %v2383_v4 = vld [vmem:[#allocation8 + $0x388] sm:$0xff] }
 0x4df   : > { %2929 = vmatpush.msra.mxu1 %v2383_v4  ;;  %v2253_v4 = vld [vmem:[#allocation3 + $0x2e] sm:$0xff] }
 0x4e0   : > { %v2545_v52 = vpop.f32.mrf.mxu2 }
 0x4e1   : > { %v2546_v17 = vadd.f32 %v2545_v52, %v2475_v61  ;;  %v2477_v19 = vpop.f32.mrf.mxu1  ;;  %v2616_v54 = vpop.f32.mrf.mxu3  ;;  %2930 = vmatpush.msra.mxu1 %v2382_v38 }
 0x4e2   : > { %v2478_v53 = vadd.f32 %v5307_v43, %v2477_v19  ;;  %v2234_v19 = vld [vmem:[#allocation3 + $0x25] sm:$0xff] }
 0x4e3   : > { %v5419_v33 = vadd.f32 %v2616_v54, %v2546_v17  ;;  %v2252_v54 = vld [vmem:[#allocation3 + $0x26] sm:$0xff] }
 0x4e4   : > { %2683 = vmatmul.f32.gmra.mxu1 %v5296_v26  ;;  %v2398_v26 = vld [vmem:[#allocation8 + $0x400] sm:$0xff] }
 0x4e5   : > { %2754 = vmatmul.f32.gmra.mxu2 %v2208_v63 }
 0x4e6   : > { %2825 = vmatmul.f32.gmra.mxu3 %v5385_v25  ;;  %3001 = vmatpush.msra.mxu2 %v2398_v26 }
 0x4e8   : > { %v2548_v30 = vpop.f32.mrf.mxu2 }
 0x4e9   : > { %v2549_v22 = vadd.f32 %v2548_v30, %v2478_v53  ;;  %v2480_v47 = vpop.f32.mrf.mxu1  ;;  %v2619_v27 = vpop.f32.mrf.mxu3  ;;  %v2235_v53 = vld [vmem:[#allocation3 + $0x2d] sm:$0xff] }
 0x4ea   : > { %v2481_v16 = vadd.f32 %v5307_v43, %v2480_v47  ;;  %v2236_v47 = vld [vmem:[#allocation3 + $0x35] sm:$0xff] }
 0x4eb   : > { %v5425_v3 = vadd.f32 %v2619_v27, %v2549_v22  ;;  %v2254_v27 = vld [vmem:[#allocation3 + $0x36] sm:$0xff] }
 0x4ec   : > { %2686 = vmatmul.f32.gmra.mxu1 %v5299_v42 }
 0x4ed   : > { %2757 = vmatmul.f32.gmra.mxu2 %v2209_v39 }
 0x4ee   : > { %2828 = vmatmul.f32.gmra.mxu3 %v5393_v48  ;;  %v2233_v48 = vld [vmem:[#allocation3 + $0xac] sm:$0xff] }
 0x4ef   : > { %2911 = vmatmul.f32.gmra.mxu0 %v2233_v48 }
 0x4f0   : > { %v2551_v25 = vpop.f32.mrf.mxu2 }
 0x4f1   : > { %v2552_v18 = vadd.f32 %v2551_v25, %v2481_v16  ;;  %v2483_v1 = vpop.f32.mrf.mxu1  ;;  %v2622_v55 = vpop.f32.mrf.mxu3  ;;  %v2237_v25 = vld [vmem:[#allocation3 + $0x3d] sm:$0xff] }
 0x4f2   : > { %v2484_v51 = vadd.f32 %v5307_v43, %v2483_v1 }
 0x4f3   : > { %v5430_v28 = vadd.f32 %v2622_v55, %v2552_v18  ;;  %v2238_v55 = vld [vmem:[#allocation3 + $0x45] sm:$0xff] }
 0x4f4   : > { %2689 = vmatmul.f32.gmra.mxu1 %v5310_v5 }
 0x4f5   : > { %2760 = vmatmul.f32.gmra.mxu2 %v2210_v31  ;;  %v2256_v31 = vld [vmem:[#allocation3 + $0x46] sm:$0xff] }
 0x4f6   : > { %2831 = vmatmul.f32.gmra.mxu3 %v5401_v44 }
 0x4f8   : > { %v2554_v42 = vpop.f32.mrf.mxu2 }
 0x4f9   : > { %v2555_v11 = vadd.f32 %v2554_v42, %v2484_v51  ;;  %v2486_v29 = vpop.f32.mrf.mxu1  ;;  %v2625_v56 = vpop.f32.mrf.mxu3 }
 0x4fa   : > { %v2487_v8 = vadd.f32 %v5307_v43, %v2486_v29  ;;  %v2257_v29 = vld [vmem:[#allocation3 + $0x4e] sm:$0xff] }
 0x4fb   : > { %v5435_v12 = vadd.f32 %v2625_v56, %v2555_v11  ;;  %v2239_v11 = vld [vmem:[#allocation3 + $0x4d] sm:$0xff] }
 0x4fc   : > { %2692 = vmatmul.f32.gmra.mxu1 %v5319_v2 }
 0x4fd   : > { %2763 = vmatmul.f32.gmra.mxu2 %v2211_v13 }
 0x4fe   : > { %2834 = vmatmul.f32.gmra.mxu3 %v5409_v59  ;;  %v2213_v59 = vld [vmem:[#allocation3 + $0x9b] sm:$0xff] }
 0x500   : > { %v2557_v5 = vpop.f32.mrf.mxu2 }
 0x501   : > { %v2558_v58 = vadd.f32 %v2557_v5, %v2487_v8  ;;  %v2628_v49 = vpop.f32.mrf.mxu3  ;;  %v2648_v44 = vpop.f32.mrf.mxu1  ;;  %v2240_v5 = vld [vmem:[#allocation3 + $0x55] sm:$0xff] }
 0x502   : > { %v2649_v62 = vadd.f32 %v2648_v44, %v5316_v57 }
 0x503   : > { %v5440_v6 = vadd.f32 %v2628_v49, %v2558_v58  ;;  %v2258_v58 = vld [vmem:[#allocation3 + $0x56] sm:$0xff] }
 0x504   : > { %2695 = vmatmul.f32.gmra.mxu1 %v2194_v15 }
 0x505   : > { %2766 = vmatmul.f32.gmra.mxu2 %v2212_v60  ;;  %v2241_v60 = vld [vmem:[#allocation3 + $0x5d] sm:$0xff] }
 0x506   : > { %2837 = vmatmul.f32.gmra.mxu3 %v5417_v24 }
 0x508   : > { %v2719_v43 = vpop.f32.mrf.mxu2 }
 0x509   : > { %v5444_v0 = vadd.f32 %v2719_v43, %v2649_v62  ;;  %v2651_v2 = vpop.f32.mrf.mxu1  ;;  %v2259_v62 = vld [vmem:[#allocation3 + $0x5e] sm:$0xff] }
 0x50a   : > { %v2652_v61 = vadd.f32 %v2651_v2, %v5325_v32 }
 0x50c   : > { %2698 = vmatmul.f32.gmra.mxu1 %v2195_v7 }
 0x50d   : > { %2769 = vmatmul.f32.gmra.mxu2 %v2213_v59  ;;  %v2242_v59 = vld [vmem:[#allocation3 + $0x65] sm:$0xff] }
 0x50e   : > { %2840 = vmatmul.f32.gmra.mxu3 %v2231_v35 }
 0x510   : > { %v2722_v20 = vpop.f32.mrf.mxu2 }
 0x511   : > { %v5447_v52 = vadd.f32 %v2722_v20, %v2652_v61  ;;  %v2654_v17 = vpop.f32.mrf.mxu1  ;;  %v2260_v61 = vld [vmem:[#allocation3 + $0x66] sm:$0xff] }
 0x512   : > { %v2655_v57 = vadd.f32 %v2654_v17, %v5332_v41 }
 0x514   : > { %2931 = vmatmul.f32.vlgmr.msra.gmra.mxu1 %v2234_v19 }
 0x515   : > { %3002 = vmatmul.f32.vlgmr.msra.gmra.mxu2 %v2252_v54  ;;  %v2243_v54 = vld [vmem:[#allocation3 + $0x6d] sm:$0xff] }
 0x518   : > { %v2725_v24 = vpop.f32.mrf.mxu2 }
 0x519   : > { %v5450_v63 = vadd.f32 %v2725_v24, %v2655_v57  ;;  %v2657_v50 = vpop.f32.mrf.mxu1  ;;  %v2261_v57 = vld [vmem:[#allocation3 + $0x6e] sm:$0xff] }
 0x51a   : > { %v2658_v32 = vadd.f32 %v2657_v50, %v5339_v21 }
 0x51c   : > { %2934 = vmatmul.f32.gmra.mxu1 %v2235_v53 }
 0x51d   : > { %3005 = vmatmul.f32.gmra.mxu2 %v2253_v4  ;;  %v2244_v4 = vld [vmem:[#allocation3 + $0x75] sm:$0xff] }
 0x520   : > { %v2728_v30 = vpop.f32.mrf.mxu2 }
 0x521   : > { %v5453_v35 = vadd.f32 %v2728_v30, %v2658_v32  ;;  %v2660_v22 = vpop.f32.mrf.mxu1  ;;  %v2262_v32 = vld [vmem:[#allocation3 + $0x76] sm:$0xff] }
 0x522   : > { %v2661_v41 = vadd.f32 %v2660_v22, %v5347_v37 }
 0x524   : > { %2937 = vmatmul.f32.gmra.mxu1 %v2236_v47 }
 0x525   : > { %3008 = vmatmul.f32.gmra.mxu2 %v2254_v27  ;;  %v2245_v27 = vld [vmem:[#allocation3 + $0x7d] sm:$0xff] }
 0x528   : > { %v2731_v39 = vpop.f32.mrf.mxu2 }
 0x529   : > { %v5456_v16 = vadd.f32 %v2731_v39, %v2661_v41  ;;  %v2663_v26 = vpop.f32.mrf.mxu1  ;;  %v2263_v41 = vld [vmem:[#allocation3 + $0x7e] sm:$0xff] }
 0x52a   : > { %v2664_v21 = vadd.f32 %v2663_v26, %v5355_v10  ;;  %v2790_v26 = vpop.f32.mrf.mxu3 }
 0x52c   : > { %2940 = vmatmul.f32.gmra.mxu1 %v2237_v25 }
 0x52d   : > { %3011 = vmatmul.f32.gmra.mxu2 %v2255_v23 }
 0x530   : > { %v2734_v18 = vpop.f32.mrf.mxu2 }
 0x531   : > { %v5459_v38 = vadd.f32 %v2734_v18, %v2664_v21  ;;  %v2666_v1 = vpop.f32.mrf.mxu1  ;;  %v2246_v18 = vld [vmem:[#allocation3 + $0x85] sm:$0xff] }
 0x532   : > { %v2667_v37 = vadd.f32 %v2666_v1, %v5363_v14 }
 0x534   : > { %2943 = vmatmul.f32.gmra.mxu1 %v2238_v55  ;;  %v2793_v55 = vpop.f32.mrf.mxu3 }
 0x535   : > { %3014 = vmatmul.f32.gmra.mxu2 %v2256_v31 }
 0x538   : > { %v2737_v51 = vpop.f32.mrf.mxu2 }
 0x539   : > { %v5462_v42 = vadd.f32 %v2737_v51, %v2667_v37  ;;  %v2669_v48 = vpop.f32.mrf.mxu1 }
 0x53a   : > { %v2670_v10 = vadd.f32 %v2669_v48, %v5371_v46  ;;  %v2247_v48 = vld [vmem:[#allocation3 + $0x8d] sm:$0xff] }
 0x53c   : > { %2946 = vmatmul.f32.gmra.mxu1 %v2239_v11  ;;  %v2265_v11 = vld [vmem:[#allocation3 + $0x8e] sm:$0xff] }
 0x53d   : > { %3017 = vmatmul.f32.gmra.mxu2 %v2257_v29 }
 0x540   : > { %v2740_v56 = vpop.f32.mrf.mxu2 }
 0x541   : > { %v5465_v13 = vadd.f32 %v2740_v56, %v2670_v10  ;;  %v2672_v8 = vpop.f32.mrf.mxu1  ;;  %v2796_v10 = vpop.f32.mrf.mxu3 }
 0x542   : > { %v2673_v14 = vadd.f32 %v2672_v8, %v5379_v9 }
 0x544   : > { %2949 = vmatmul.f32.gmra.mxu1 %v2240_v5 }
 0x545   : > { %3020 = vmatmul.f32.gmra.mxu2 %v2258_v58  ;;  %v2266_v58 = vld [vmem:[#allocation3 + $0x96] sm:$0xff] }
 0x548   : > { %v2743_v49 = vpop.f32.mrf.mxu2 }
 0x549   : > { %v5468_v44 = vadd.f32 %v2743_v49, %v2673_v14  ;;  %v2675_v15 = vpop.f32.mrf.mxu1 }
 0x54a   : > { %v2676_v46 = vadd.f32 %v2675_v15, %v5387_v34 }
 0x54c   : > { %2952 = vmatmul.f32.gmra.mxu1 %v2241_v60 }
 0x54d   : > { %3023 = vmatmul.f32.gmra.mxu2 %v2259_v62  ;;  %v2799_v62 = vpop.f32.mrf.mxu3 }
 0x550   : > { %v2746_v43 = vpop.f32.mrf.mxu2 }
 0x551   : > { %v5471_v2 = vadd.f32 %v2746_v43, %v2676_v46  ;;  %v2678_v7 = vpop.f32.mrf.mxu1  ;;  %v2267_v43 = vld [vmem:[#allocation3 + $0x9e] sm:$0xff] }
 0x552   : > { %v2679_v9 = vadd.f32 %v2678_v7, %v5395_v36 }
 0x554   : > { %2955 = vmatmul.f32.gmra.mxu1 %v2242_v59 }
 0x555   : > { %3026 = vmatmul.f32.gmra.mxu2 %v2260_v61 }
 0x558   : > { %v2749_v20 = vpop.f32.mrf.mxu2 }
 0x559   : > { %v5474_v17 = vadd.f32 %v2749_v20, %v2679_v9  ;;  %v2681_v19 = vpop.f32.mrf.mxu1  ;;  %v2791_v9 = vadd.f32 %v2790_v26, %v5444_v0  ;;  %v2797_v26 = vadd.f32 %v2796_v10, %v5450_v63 }
 0x55a   : > { %v2682_v34 = vadd.f32 %v2681_v19, %v5403_v40  ;;  %v2861_v40 = vpop.f32.mrf.mxu0  ;;  %v2250_v19 = vld [vmem:[#allocation3 + $0xa5] sm:$0xff] }
 0x55c   : > { %2958 = vmatmul.f32.gmra.mxu1 %v2243_v54  ;;  %v2268_v54 = vld [vmem:[#allocation3 + $0xa6] sm:$0xff] }
 0x55d   : > { %3029 = vmatmul.f32.gmra.mxu2 %v2261_v57  ;;  %v2802_v57 = vpop.f32.mrf.mxu3 }
 0x560   : > { %v2752_v24 = vpop.f32.mrf.mxu2 }
 0x561   : > { %v5477_v50 = vadd.f32 %v2752_v24, %v2682_v34  ;;  %v2684_v53 = vpop.f32.mrf.mxu1  ;;  %v2862_v34 = vadd.f32 %v2861_v40, %v2791_v9 }
 0x562   : > { %v2685_v30 = vadd.f32 %v2684_v53, %v5411_v45  ;;  %v2264_v45 = vld [vmem:[#allocation3 + $0x86] sm:$0xff]  ;;  %v2864_v51 = vpop.f32.mrf.mxu0 }
 0x564   : > { %2961 = vmatmul.f32.gmra.mxu1 %v2244_v4 }
 0x565   : > { %3032 = vmatmul.f32.gmra.mxu2 %v2262_v32 }
 0x568   : > { %v2755_v36 = vpop.f32.mrf.mxu2 }
 0x569   : > { %v5480_v22 = vadd.f32 %v2755_v36, %v2685_v30  ;;  %v2687_v47 = vpop.f32.mrf.mxu1  ;;  %v2251_v36 = vld [vmem:[#allocation3 + $0xad] sm:$0xff] }
 0x56a   : > { %v2688_v39 = vadd.f32 %v2687_v47, %v5419_v33  ;;  %v2867_v49 = vpop.f32.mrf.mxu0  ;;  %v2269_v47 = vld [vmem:[#allocation3 + $0xae] sm:$0xff] }
 0x56c   : > { %2964 = vmatmul.f32.gmra.mxu1 %v2245_v27  ;;  %v2805_v27 = vpop.f32.mrf.mxu3 }
 0x56d   : > { %3035 = vmatmul.f32.gmra.mxu2 %v2263_v41 }
 0x570   : > { %v2758_v25 = vpop.f32.mrf.mxu2 }
 0x571   : > { %v5483_v23 = vadd.f32 %v2758_v25, %v2688_v39  ;;  %v2690_v21 = vpop.f32.mrf.mxu1 }
 0x572   : > { %v2691_v1 = vadd.f32 %v2690_v21, %v5425_v3  ;;  %v2248_v3 = vld [vmem:[#allocation3 + $0x95] sm:$0xff]  ;;  %v2870_v59 = vpop.f32.mrf.mxu0 }
 0x574   : > { %2967 = vmatmul.f32.gmra.mxu1 %v2246_v18 }
 0x575   : > { %3038 = vmatmul.f32.gmra.mxu2 %v2264_v45  ;;  %v2868_v45 = vadd.f32 %v2867_v49, %v2797_v26 }
 0x578   : > { %v2761_v31 = vpop.f32.mrf.mxu2 }
 0x579   : > { %v5486_v37 = vadd.f32 %v2761_v31, %v2691_v1  ;;  %v2693_v33 = vpop.f32.mrf.mxu1 }
 0x57a   : > { %v2694_v29 = vadd.f32 %v2693_v33, %v5430_v28  ;;  %v2249_v28 = vld [vmem:[#allocation3 + $0x9d] sm:$0xff]  ;;  %v2873_v53 = vpop.f32.mrf.mxu0 }
 0x57c   : > { %2970 = vmatmul.f32.gmra.mxu1 %v2247_v48 }
 0x57d   : > { %3041 = vmatmul.f32.gmra.mxu2 %v2265_v11 }
 0x580   : > { %v2764_v56 = vpop.f32.mrf.mxu2 }
 0x581   : > { %v5489_v8 = vadd.f32 %v2764_v56, %v2694_v29  ;;  %v2696_v5 = vpop.f32.mrf.mxu1 }
 0x582   : > { %v2697_v14 = vadd.f32 %v2696_v5, %v5435_v12  ;;  %v2876_v25 = vpop.f32.mrf.mxu0  ;;  %v2803_v5 = vadd.f32 %v2802_v57, %v5456_v16 }
 0x584   : > { %2973 = vmatmul.f32.gmra.mxu1 %v2248_v3  ;;  %v2874_v49 = vadd.f32 %v2873_v53, %v2803_v5 }
 0x585   : > { %3044 = vmatmul.f32.gmra.mxu2 %v2266_v58 }
 0x588   : > { %v2767_v15 = vpop.f32.mrf.mxu2 }
 0x589   : > { %v5492_v60 = vadd.f32 %v2767_v15, %v2697_v14  ;;  %v2699_v46 = vpop.f32.mrf.mxu1 }
 0x58a   : > { %v2700_v7 = vadd.f32 %v2699_v46, %v5440_v6  ;;  %v2794_v6 = vadd.f32 %v2793_v55, %v5447_v52  ;;  %v2808_v55 = vpop.f32.mrf.mxu3  ;;  %v2879_v11 = vpop.f32.mrf.mxu0 }
 0x58c   : > { %2976 = vmatmul.f32.gmra.mxu1 %v2249_v28  ;;  %v2865_v0 = vadd.f32 %v2864_v51, %v2794_v6  ;;  %v2800_v51 = vadd.f32 %v2799_v62, %v5453_v35  ;;  %v2806_v28 = vadd.f32 %v2805_v27, %v5459_v38 }
 0x58d   : > { %3047 = vmatmul.f32.gmra.mxu2 %v2267_v43 }
 0x58e   : > { %v2871_v29 = vadd.f32 %v2870_v59, %v2800_v51 }
 0x590   : > { %v2770_v61 = vpop.f32.mrf.mxu2 }
 0x591   : > { %v5496_v20 = vadd.f32 %v2770_v61, %v2700_v7  ;;  %v2932_v12 = vpop.f32.mrf.mxu1  ;;  %v2877_v61 = vadd.f32 %v2876_v25, %v2806_v28 }
 0x592   : > { %v2933_v24 = vadd.f32 %v2932_v12, %v2862_v34  ;;  %v2811_v35 = vpop.f32.mrf.mxu3  ;;  %v2882_v15 = vpop.f32.mrf.mxu0 }
 0x593   : > { %v2812_v6 = vadd.f32 %v2811_v35, %v5465_v13 }
 0x594   : > { %2979 = vmatmul.f32.gmra.mxu1 %v2250_v19 }
 0x595   : > { %3050 = vmatmul.f32.gmra.mxu2 %v2268_v54  ;;  %v2809_v54 = vadd.f32 %v2808_v55, %v5462_v42  ;;  %v2883_v42 = vadd.f32 %v2882_v15, %v2812_v6 }
 0x597   : > { %v2880_v38 = vadd.f32 %v2879_v11, %v2809_v54 }
 0x598   : > { %v3003_v4 = vpop.f32.mrf.mxu2 }
 0x599   : > { %v5499_v32 = vadd.f32 %v3003_v4, %v2933_v24  ;;  %v2935_v30 = vpop.f32.mrf.mxu1 }
 0x59a   : > { %v2936_v41 = vadd.f32 %v2935_v30, %v2865_v0  ;;  %v2814_v59 = vpop.f32.mrf.mxu3  ;;  %v2885_v12 = vpop.f32.mrf.mxu0 }
 0x59b   : > { %3059 = vadd.xlane.f32.xlu0 %v5499_v32  ;;  %v3095_v52 = vmul.f32 %v5499_v32, %v5499_v32  ;;  %v2815_v26 = vadd.f32 %v2814_v59, %v5468_v44 }
 0x59c   : > { %2982 = vmatmul.f32.gmra.mxu1 %v2251_v36 }
 0x59d   : > { %3053 = vmatmul.f32.gmra.mxu2 %v2269_v47 }
 0x5a0   : > { %v3006_v39 = vpop.f32.mrf.mxu2 }
 0x5a1   : > { %v5503_v40 = vadd.f32 %v3006_v39, %v2936_v41  ;;  %v2938_v21 = vpop.f32.mrf.mxu1 }
 0x5a2   : > { %v2939_v1 = vadd.f32 %v2938_v21, %v2868_v45  ;;  %v2817_v24 = vpop.f32.mrf.mxu3  ;;  %v2888_v47 = vpop.f32.mrf.mxu0 }
 0x5a3   : > { %3113 = vadd.xlane.f32.xlu0 %v3095_v52  ;;  %v3096_v18 = vmul.f32 %v5503_v40, %v5503_v40  ;;  %v2818_v55 = vadd.f32 %v2817_v24, %v5471_v2 }
 0x5a5   : > { %3115 = vadd.xlane.f32.xlu1 %v3096_v18  ;;  %v2886_v18 = vadd.f32 %v2885_v12, %v2815_v26 }
 0x5a8   : > { %v3009_v31 = vpop.f32.mrf.mxu2 }
 0x5a9   : > { %v5510_v33 = vadd.f32 %v3009_v31, %v2939_v1  ;;  %v2941_v63 = vpop.f32.mrf.mxu1 }
 0x5aa   : > { %v2942_v10 = vadd.f32 %v2941_v63, %v2871_v29  ;;  %v2820_v41 = vpop.f32.mrf.mxu3  ;;  %v2891_v21 = vpop.f32.mrf.mxu0 }
 0x5ab   : > { %3061 = vadd.xlane.f32.xlu0 %v5503_v40  ;;  %v3097_v48 = vmul.f32 %v5510_v33, %v5510_v33 }
 0x5ad   : > { %3117 = vadd.xlane.f32.xlu2 %v3097_v48  ;;  %3063 = vadd.xlane.f32.xlu1 %v5510_v33  ;;  %v2889_v48 = vadd.f32 %v2888_v47, %v2818_v55 }
 0x5b0   : > { %v3012_v56 = vpop.f32.mrf.mxu2 }
 0x5b1   : > { %v5517_v3 = vadd.f32 %v3012_v56, %v2942_v10  ;;  %v2944_v58 = vpop.f32.mrf.mxu1  ;;  %v2821_v56 = vadd.f32 %v2820_v41, %v5474_v17 }
 0x5b2   : > { %v2945_v62 = vadd.f32 %v2944_v58, %v2874_v49  ;;  %v2823_v51 = vpop.f32.mrf.mxu3  ;;  %v2894_v11 = vpop.f32.mrf.mxu0 }
 0x5b3   : > { %v3098_v14 = vmul.f32 %v5517_v3, %v5517_v3 }
 0x5b5   : > { %3065 = vadd.xlane.f32.xlu1 %v5517_v3  ;;  %3119 = vadd.xlane.f32.xlu0 %v3098_v14  ;;  %v2892_v14 = vadd.f32 %v2891_v21, %v2821_v56 }
 0x5b8   : > { %v3015_v46 = vpop.f32.mrf.mxu2 }
 0x5b9   : > { %v5523_v43 = vadd.f32 %v3015_v46, %v2945_v62  ;;  %v2947_v7 = vpop.f32.mrf.mxu1  ;;  %v2824_v46 = vadd.f32 %v2823_v51, %v5477_v50 }
 0x5ba   : > { %v2948_v9 = vadd.f32 %v2947_v7, %v2877_v61  ;;  %v2826_v58 = vpop.f32.mrf.mxu3  ;;  %v2897_v15 = vpop.f32.mrf.mxu0 }
 0x5bb   : > { %3067 = vadd.xlane.f32.xlu2 %v5523_v43  ;;  %v3099_v16 = vmul.f32 %v5523_v43, %v5523_v43  ;;  %v2827_v12 = vadd.f32 %v2826_v58, %v5480_v22 }
 0x5bd   : > { %3121 = vadd.xlane.f32.xlu1 %v3099_v16  ;;  %v2895_v16 = vadd.f32 %v2894_v11, %v2824_v46 }
 0x5c0   : > { %v3018_v19 = vpop.f32.mrf.mxu2 }
 0x5c1   : > { %v5529_v57 = vadd.f32 %v3018_v19, %v2948_v9  ;;  %v2950_v34 = vpop.f32.mrf.mxu1 }
 0x5c2   : > { %v2951_v53 = vadd.f32 %v2950_v34, %v2880_v38  ;;  %v2829_v59 = vpop.f32.mrf.mxu3  ;;  %v2900_v54 = vpop.f32.mrf.mxu0  ;;  %v2898_v38 = vadd.f32 %v2897_v15, %v2827_v12 }
 0x5c3   : > { %3069 = vadd.xlane.f32.xlu2 %v5529_v57  ;;  %v3100_v36 = vmul.f32 %v5529_v57, %v5529_v57  ;;  %v2830_v6 = vadd.f32 %v2829_v59, %v5483_v23 }
 0x5c8   : > { %v3021_v4 = vpop.f32.mrf.mxu2 }
 0x5c9   : > { %v5533_v30 = vadd.f32 %v3021_v4, %v2951_v53  ;;  %v2953_v0 = vpop.f32.mrf.mxu1 }
 0x5ca   : > { %v2954_v27 = vadd.f32 %v2953_v0, %v2883_v42  ;;  %v2832_v53 = vpop.f32.mrf.mxu3  ;;  %v2903_v0 = vpop.f32.mrf.mxu0  ;;  %v2901_v42 = vadd.f32 %v2900_v54, %v2830_v6 }
 0x5cb   : > { %3123 = vadd.xlane.f32.xlu2 %v3100_v36  ;;  %3071 = vadd.xlane.f32.xlu0 %v5533_v30  ;;  %v3101_v13 = vmul.f32 %v5533_v30, %v5533_v30 }
 0x5d0   : > { %v3024_v39 = vpop.f32.mrf.mxu2 }
 0x5d1   : > { %v5539_v52 = vadd.f32 %v3024_v39, %v2954_v27  ;;  %v2956_v25 = vpop.f32.mrf.mxu1  ;;  %v2833_v39 = vadd.f32 %v2832_v53, %v5486_v37 }
 0x5d2   : > { %v2957_v45 = vadd.f32 %v2956_v25, %v2886_v18  ;;  %v2906_v18 = vpop.f32.mrf.mxu0 }
 0x5d3   : > { %3073 = vadd.xlane.f32.xlu1 %v5539_v52  ;;  %3125 = vadd.xlane.f32.xlu0 %v3101_v13  ;;  %v3102_v44 = vmul.f32 %v5539_v52, %v5539_v52  ;;  %v2835_v13 = vpop.f32.mrf.mxu3  ;;  %v2904_v21 = vadd.f32 %v2903_v0, %v2833_v39 }
 0x5d4   : > { %v2836_v55 = vadd.f32 %v2835_v13, %v5489_v8 }
 0x5d8   : > { %v3027_v1 = vpop.f32.mrf.mxu2 }
 0x5d9   : > { %v5545_v31 = vadd.f32 %v3027_v1, %v2957_v45  ;;  %v2959_v63 = vpop.f32.mrf.mxu1 }
 0x5da   : > { %v2960_v29 = vadd.f32 %v2959_v63, %v2889_v48  ;;  %v2907_v48 = vadd.f32 %v2906_v18, %v2836_v55  ;;  %v2909_v56 = vpop.f32.mrf.mxu0 }
 0x5db   : > { %3075 = vadd.xlane.f32.xlu2 %v5545_v31  ;;  %3127 = vadd.xlane.f32.xlu1 %v3102_v44  ;;  %v3103_v2 = vmul.f32 %v5545_v31, %v5545_v31  ;;  %v2838_v63 = vpop.f32.mrf.mxu3 }
 0x5e0   : > { %v3030_v10 = vpop.f32.mrf.mxu2 }
 0x5e1   : > { %v5551_v5 = vadd.f32 %v3030_v10, %v2960_v29  ;;  %v2962_v35 = vpop.f32.mrf.mxu1 }
 0x5e2   : > { %v2963_v49 = vadd.f32 %v2962_v35, %v2892_v14  ;;  %v2839_v35 = vadd.f32 %v2838_v63, %v5492_v60  ;;  %v2912_v54 = vpop.f32.mrf.mxu0 }
 0x5e3   : > { %3129 = vadd.xlane.f32.xlu2 %v3103_v2  ;;  %3077 = vadd.xlane.f32.xlu0 %v5551_v5  ;;  %v3104_v17 = vmul.f32 %v5551_v5, %v5551_v5  ;;  %v2841_v46 = vpop.f32.mrf.mxu3 }
 0x5e4   : > { %v2910_v15 = vadd.f32 %v2909_v56, %v2839_v35 }
 0x5e8   : > { %v3033_v62 = vpop.f32.mrf.mxu2 }
 0x5e9   : > { %v5557_v28 = vadd.f32 %v3033_v62, %v2963_v49  ;;  %v2965_v7 = vpop.f32.mrf.mxu1 }
 0x5ea   : > { %v2966_v61 = vadd.f32 %v2965_v7, %v2895_v16 }
 0x5eb   : > { %3079 = vadd.xlane.f32.xlu1 %v5557_v28  ;;  %3131 = vadd.xlane.f32.xlu0 %v3104_v17  ;;  %v3105_v50 = vmul.f32 %v5557_v28, %v5557_v28 }
 0x5f0   : > { %v3036_v9 = vpop.f32.mrf.mxu2 }
 0x5f1   : > { %v5563_v19 = vadd.f32 %v3036_v9, %v2966_v61  ;;  %v2968_v34 = vpop.f32.mrf.mxu1  ;;  %v2842_v61 = vadd.f32 %v2841_v46, %v5496_v20 }
 0x5f2   : > { %v2969_v24 = vadd.f32 %v2968_v34, %v2898_v38 }
 0x5f3   : > { %3081 = vadd.xlane.f32.xlu2 %v5563_v19  ;;  %3133 = vadd.xlane.f32.xlu1 %v3105_v50  ;;  %v3106_v22 = vmul.f32 %v5563_v19, %v5563_v19 }
 0x5f8   : > { %v3039_v4 = vpop.f32.mrf.mxu2 }
 0x5f9   : > { %v5569_v36 = vadd.f32 %v3039_v4, %v2969_v24  ;;  %v2971_v47 = vpop.f32.mrf.mxu1  ;;  %v2913_v24 = vadd.f32 %v2912_v54, %v2842_v61 }
 0x5fa   : > { %v2972_v27 = vadd.f32 %v2971_v47, %v2901_v42 }
 0x5fb   : > { %3135 = vadd.xlane.f32.xlu2 %v3106_v22  ;;  %3083 = vadd.xlane.f32.xlu0 %v5569_v36  ;;  %v3107_v23 = vmul.f32 %v5569_v36, %v5569_v36 }
 0x600   : > { %v3042_v41 = vpop.f32.mrf.mxu2 }
 0x601   : > { %v5575_v26 = vadd.f32 %v3042_v41, %v2972_v27  ;;  %v2974_v25 = vpop.f32.mrf.mxu1 }
 0x602   : > { %v2975_v45 = vadd.f32 %v2974_v25, %v2904_v21 }
 0x603   : > { %3085 = vadd.xlane.f32.xlu1 %v5575_v26  ;;  %3137 = vadd.xlane.f32.xlu0 %v3107_v23  ;;  %v3108_v37 = vmul.f32 %v5575_v26, %v5575_v26 }
 0x608   : > { %v3045_v1 = vpop.f32.mrf.mxu2 }
 0x609   : > { %v5581_v44 = vadd.f32 %v3045_v1, %v2975_v45  ;;  %v2977_v51 = vpop.f32.mrf.mxu1 }
 0x60a   : > { %v2978_v29 = vadd.f32 %v2977_v51, %v2907_v48 }
 0x60b   : > { %3087 = vadd.xlane.f32.xlu2 %v5581_v44  ;;  %3139 = vadd.xlane.f32.xlu1 %v3108_v37  ;;  %v3109_v58 = vmul.f32 %v5581_v44, %v5581_v44 }
 0x60e   : > { %v3060_v11 = vpop.xlane.xlu0 %3059 }
 0x60f   : > { %v5586_v10 = vmul.f32 0.25, %v3060_v11 }
 0x610   : > { %v3048_v2 = vpop.f32.mrf.mxu2 }
 0x611   : > { %v5589_v8 = vadd.f32 %v3048_v2, %v2978_v29  ;;  %v3167_v14 = vmul.f32 4.0, %v5586_v10  ;;  %v2980_v49 = vpop.f32.mrf.mxu1 }
 0x612   : > { %v2981_v7 = vadd.f32 %v2980_v49, %v2910_v15  ;;  %v5625_v49 = vld [vmem:[%s5841_s7] ss:$0 sm:$0xff] }
 0x613   : > { %3141 = vadd.xlane.f32.xlu2 %v3109_v58  ;;  %3089 = vadd.xlane.f32.xlu0 %v5589_v8  ;;  %v3185_v62 = vmul.f32 %v3167_v14, %v5586_v10  ;;  %v3110_v50 = vmul.f32 %v5589_v8, %v5589_v8  ;;  %v3239_v14 = vsub.f32 %v5499_v32, %v5586_v10 }
 0x616   : > { %v3114_v17 = vpop.xlane.xlu0 %3113 }
 0x617   : > { %v3203_v16 = vsub.f32 %v3114_v17, %v3185_v62  ;;  %v5631_v17 = vld [vmem:[%s5842_s8] ss:$0 sm:$0xff] }
 0x618   : > { %v3051_v59 = vpop.f32.mrf.mxu2  ;;  %v3116_v60 = vpop.xlane.xlu1 %3115 }
 0x619   : > { %v3221_v9 = vmul.f32 0.33333334, %v3203_v16  ;;  %v5597_v12 = vadd.f32 %v3051_v59, %v2981_v7  ;;  %v2983_v38 = vpop.f32.mrf.mxu1 }
 0x61a   : > { %v2984_v4 = vadd.f32 %v2983_v38, %v2913_v24 }
 0x61b   : > { %v3257_v34 = vadd.f32 0.001, %v3221_v9  ;;  %3091 = vadd.xlane.f32.xlu1 %v5597_v12  ;;  %3143 = vadd.xlane.f32.xlu0 %v3110_v50  ;;  %v3111_v42 = vmul.f32 %v5597_v12, %v5597_v12  ;;  %v3515_v9 = vld [vmem:[#allocation2 + $0x2d] sm:$0xff] }
 0x61d   : > { %3900 = vrsqrt.f32 %v3257_v34  ;;  %vm3281_vm7 = vweird.f32 %v3257_v34 }
 0x61e   : > { %v3062_v53 = vpop.xlane.xlu0 %3061 }
 0x61f   : > { %v5602_v6 = vmul.f32 0.25, %v3062_v53 }
 0x620   : > { %v3054_v22 = vpop.f32.mrf.mxu2  ;;  %v3064_v0 = vpop.xlane.xlu1 %3063 }
 0x621   : > { %v3168_v20 = vmul.f32 4.0, %v5602_v6  ;;  %v5605_v47 = vadd.f32 %v3054_v22, %v2984_v4  ;;  %v5609_v27 = vmul.f32 0.25, %v3064_v0  ;;  %v3118_v18 = vpop.xlane.xlu2 %3117 }
 0x623   : > { %v3901_v41 = vpop.eup %3900  ;;  %v3186_v39 = vmul.f32 %v3168_v20, %v5602_v6  ;;  %3093 = vadd.xlane.f32.xlu2 %v5605_v47  ;;  %3145 = vadd.xlane.f32.xlu1 %v3111_v42  ;;  %v3169_v13 = vmul.f32 4.0, %v5609_v27  ;;  %v3112_v48 = vmul.f32 %v5605_v47, %v5605_v47 }
 0x624   : > { %v3276_v23 = vmul.f32 %v3901_v41, %v3257_v34  ;;  %vm3282_vm6 = vweird.f32 %v3901_v41 }
 0x625   : > { %v3204_v25 = vsub.f32 %v3116_v60, %v3186_v39  ;;  %v3187_v45 = vmul.f32 %v3169_v13, %v5609_v27  ;;  %vm3283_vm8 = vmor %vm3281_vm7, %vm3282_vm6 }
 0x626   : > { %v3277_v21 = vmul.f32 %v3901_v41, %v3276_v23 }
 0x627   : > { %v3222_v1 = vmul.f32 0.33333334, %v3204_v25  ;;  %v3205_v37 = vsub.f32 %v3118_v18, %v3187_v45 }
 0x628   : > { %v3278_v55 = vmul.f32 0.5, %v3277_v21  ;;  %v3066_v63 = vpop.xlane.xlu1 %3065  ;;  %v3120_v16 = vpop.xlane.xlu0 %3119 }
 0x629   : > { %v3258_v51 = vadd.f32 0.001, %v3222_v1  ;;  %v3223_v29 = vmul.f32 0.33333334, %v3205_v37  ;;  %v5617_v56 = vmul.f32 0.25, %v3066_v63  ;;  %v3240_v37 = vsub.f32 %v5503_v40, %v5602_v6 }
 0x62a   : > { %v3279_v11 = vsub.f32 1.5, %v3278_v55 }
 0x62b   : > { %3902 = vrsqrt.f32 %v3258_v51  ;;  %3147 = vadd.xlane.f32.xlu2 %v3112_v48  ;;  %v3259_v35 = vadd.f32 0.001, %v3223_v29  ;;  %v3170_v58 = vmul.f32 4.0, %v5617_v56  ;;  %vm3291_vm10 = vweird.f32 %v3258_v51 }
 0x62c   : > { %v3280_v2 = vmul.f32 %v3901_v41, %v3279_v11 }
 0x62d   : > { %3904 = vrsqrt.f32 %v3259_v35  ;;  %v3188_v62 = vmul.f32 %v3170_v58, %v5617_v56  ;;  %vm3301_vm13 = vweird.f32 %v3259_v35 }
 0x62e   : > { %v3284_v15 = vsel %vm3283_vm8, %v3901_v41, %v3280_v2  ;;  %v3068_v46 = vpop.xlane.xlu2 %3067 }
 0x62f   : > { %v3455_v7 = vmul.f32 %v3284_v15, %v3239_v14  ;;  %v5633_v59 = vmul.f32 0.25, %v3068_v46  ;;  %v3206_v32 = vsub.f32 %v3120_v16, %v3188_v62  ;;  %v3516_v16 = vld [vmem:[#allocation2 + $0x35] sm:$0xff] }
 0x630   : > { %v3122_v22 = vpop.xlane.xlu1 %3121 }
 0x631   : > { %v3903_v10 = vpop.eup %3902  ;;  %v3476_v60 = vmul.f32 %v5625_v49, %v3455_v7  ;;  %v3171_v61 = vmul.f32 4.0, %v5633_v59  ;;  %v3224_v54 = vmul.f32 0.33333334, %v3206_v32 }
 0x632   : > { %v3286_v50 = vmul.f32 %v3903_v10, %v3258_v51  ;;  %vm3292_vm9 = vweird.f32 %v3903_v10  ;;  %v3241_v51 = vsub.f32 %v5510_v33, %v5609_v27 }
 0x633   : > { %v3497_v34 = vadd.f32 %v5631_v17, %v3476_v60  ;;  %v3189_v38 = vmul.f32 %v3171_v61, %v5633_v59  ;;  %v3905_v24 = vpop.eup %3904  ;;  %v5639_v4 = vadd.f32 0.001, %v3224_v54  ;;  %vm3293_vm11 = vmor %vm3291_vm10, %vm3292_vm9  ;;  %v3517_v54 = vld [vmem:[#allocation2 + $0x3d] sm:$0xff] }
 0x634   : > { %v3287_v53 = vmul.f32 %v3903_v10, %v3286_v50  ;;  %v3296_v0 = vmul.f32 %v3905_v24, %v3259_v35  ;;  %vm3302_vm12 = vweird.f32 %v3905_v24 }
 0x635   : > { %v3533_v20 = vadd.f32 %v3515_v9, %v3497_v34  ;;  %v3207_v42 = vsub.f32 %v3122_v22, %v3189_v38  ;;  %3906 = vrsqrt.f32 %v5639_v4  ;;  %vm3303_vm14 = vmor %vm3301_vm13, %vm3302_vm12  ;;  %vm3311_vm0 = vweird.f32 %v5639_v4 }
 0x636   : > { %v3288_v41 = vmul.f32 0.5, %v3287_v53  ;;  %v3070_v39 = vpop.xlane.xlu2 %3069  ;;  %v3297_v23 = vmul.f32 %v3905_v24, %v3296_v0 }
 0x637   : > { %3551 = vst [vmem:[%s4297_s15] sm:$0xff] %v3533_v20  ;;  %v3225_v13 = vmul.f32 0.33333334, %v3207_v42  ;;  %v5643_v25 = vmul.f32 0.25, %v3070_v39 }
 0x638   : > { %v3289_v21 = vsub.f32 1.5, %v3288_v41  ;;  %v3298_v18 = vmul.f32 0.5, %v3297_v23  ;;  %v3242_v41 = vsub.f32 %v5517_v3, %v5617_v56  ;;  %v3518_v56 = vld [vmem:[#allocation2 + $0x45] sm:$0xff] }
 0x639   : > { %v5645_v45 = vadd.f32 0.001, %v3225_v13  ;;  %v3172_v1 = vmul.f32 4.0, %v5643_v25 }
 0x63a   : > { %v3290_v55 = vmul.f32 %v3903_v10, %v3289_v21  ;;  %v3299_v63 = vsub.f32 1.5, %v3298_v18 }
 0x63b   : > { %3908 = vrsqrt.f32 %v5645_v45  ;;  %v3907_v48 = vpop.eup %3906  ;;  %v3190_v14 = vmul.f32 %v3172_v1, %v5643_v25  ;;  %vm3321_vm3 = vweird.f32 %v5645_v45 }
 0x63c   : > { %v3294_v11 = vsel %vm3293_vm11, %v3903_v10, %v3290_v55  ;;  %v3300_v2 = vmul.f32 %v3905_v24, %v3299_v63  ;;  %v3306_v58 = vmul.f32 %v3907_v48, %v5639_v4  ;;  %vm3312_vm15 = vweird.f32 %v3907_v48 }
 0x63d   : > { %v3456_v29 = vmul.f32 %v3294_v11, %v3240_v37  ;;  %vm3313_vm1 = vmor %vm3311_vm0, %vm3312_vm15 }
 0x63e   : > { %v3124_v15 = vpop.xlane.xlu2 %3123  ;;  %v3072_v40 = vpop.xlane.xlu0 %3071  ;;  %v3304_v62 = vsel %vm3303_vm14, %v3905_v24, %v3300_v2  ;;  %v3307_v46 = vmul.f32 %v3907_v48, %v3306_v58 }
 0x63f   : > { %v3477_v6 = vmul.f32 %v5625_v49, %v3456_v29  ;;  %v3208_v7 = vsub.f32 %v3124_v15, %v3190_v14  ;;  %v3457_v32 = vmul.f32 %v3304_v62, %v3241_v51  ;;  %v5656_v35 = vmul.f32 0.25, %v3072_v40 }
 0x640   : > { %v3308_v61 = vmul.f32 0.5, %v3307_v46 }
 0x641   : > { %v3909_v10 = vpop.eup %3908  ;;  %v3498_v60 = vadd.f32 %v5631_v17, %v3477_v6  ;;  %v3226_v9 = vmul.f32 0.33333334, %v3208_v7  ;;  %v3478_v33 = vmul.f32 %v5625_v49, %v3457_v32  ;;  %v3173_v24 = vmul.f32 4.0, %v5656_v35 }
 0x642   : > { %v3316_v27 = vmul.f32 %v3909_v10, %v5645_v45  ;;  %v3309_v34 = vsub.f32 1.5, %v3308_v61  ;;  %vm3322_vm2 = vweird.f32 %v3909_v10 }
 0x643   : > { %v3534_v50 = vadd.f32 %v3516_v16, %v3498_v60  ;;  %v3262_v38 = vadd.f32 0.001, %v3226_v9  ;;  %v3499_v53 = vadd.f32 %v5631_v17, %v3478_v33  ;;  %v3191_v0 = vmul.f32 %v3173_v24, %v5656_v35  ;;  %vm3323_vm4 = vmor %vm3321_vm3, %vm3322_vm2 }
 0x644   : > { %v3317_v22 = vmul.f32 %v3909_v10, %v3316_v27  ;;  %v3310_v20 = vmul.f32 %v3907_v48, %v3309_v34  ;;  %v3244_v24 = vsub.f32 %v5529_v57, %v5643_v25 }
 0x645   : > { %3552 = vst [vmem:[%s4297_s15 + $0x8] sm:$0xff] %v3534_v50  ;;  %3910 = vrsqrt.f32 %v3262_v38  ;;  %v3535_v42 = vadd.f32 %v3517_v54, %v3499_v53  ;;  %vm3331_vm6 = vweird.f32 %v3262_v38 }
 0x646   : > { %v3318_v39 = vmul.f32 0.5, %v3317_v22  ;;  %v3074_v23 = vpop.xlane.xlu1 %3073  ;;  %v3126_v13 = vpop.xlane.xlu0 %3125  ;;  %v3314_v21 = vsel %vm3313_vm1, %v3907_v48, %v3310_v20  ;;  %v3243_v48 = vsub.f32 %v5523_v43, %v5633_v59  ;;  %v3519_v59 = vld [vmem:[#allocation2 + $0x4d] sm:$0xff] }
 0x647   : > { %v5669_v18 = vmul.f32 0.25, %v3074_v23  ;;  %v3209_v1 = vsub.f32 %v3126_v13, %v3191_v0  ;;  %3553 = vst [vmem:[%s4297_s15 + $0x10] sm:$0xff] %v3535_v42  ;;  %v3458_v55 = vmul.f32 %v3314_v21, %v3242_v41 }
 0x648   : > { %v3319_v37 = vsub.f32 1.5, %v3318_v39 }
 0x649   : > { %v3227_v4 = vmul.f32 0.33333334, %v3209_v1  ;;  %v3174_v63 = vmul.f32 4.0, %v5669_v18  ;;  %v3479_v11 = vmul.f32 %v5625_v49, %v3458_v55  ;;  %v3520_v55 = vld [vmem:[#allocation2 + $0x55] sm:$0xff] }
 0x64a   : > { %v3320_v29 = vmul.f32 %v3909_v10, %v3319_v37 }
 0x64b   : > { %v3911_v3 = vpop.eup %3910  ;;  %v3263_v2 = vadd.f32 0.001, %v3227_v4  ;;  %v3500_v58 = vadd.f32 %v5631_v17, %v3479_v11  ;;  %v3192_v40 = vmul.f32 %v3174_v63, %v5669_v18 }
 0x64c   : > { %v3324_v14 = vsel %vm3323_vm4, %v3909_v10, %v3320_v29  ;;  %v3326_v51 = vmul.f32 %v3911_v3, %v3262_v38  ;;  %vm3332_vm5 = vweird.f32 %v3911_v3 }
 0x64d   : > { %v3459_v15 = vmul.f32 %v3324_v14, %v3243_v48  ;;  %3912 = vrsqrt.f32 %v3263_v2  ;;  %v3536_v6 = vadd.f32 %v3518_v56, %v3500_v58  ;;  %vm3333_vm7 = vmor %vm3331_vm6, %vm3332_vm5  ;;  %vm3341_vm9 = vweird.f32 %v3263_v2 }
 0x64e   : > { %v3327_v62 = vmul.f32 %v3911_v3, %v3326_v51  ;;  %v3076_v46 = vpop.xlane.xlu2 %3075  ;;  %v3128_v45 = vpop.xlane.xlu1 %3127 }
 0x64f   : > { %v3480_v7 = vmul.f32 %v5625_v49, %v3459_v15  ;;  %v5680_v16 = vmul.f32 0.25, %v3076_v46  ;;  %v3210_v43 = vsub.f32 %v3128_v45, %v3192_v40  ;;  %3554 = vst [vmem:[%s4297_s15 + $0x18] sm:$0xff] %v3536_v6 }
 0x650   : > { %v3328_v32 = vmul.f32 0.5, %v3327_v62 }
 0x651   : > { %v3501_v10 = vadd.f32 %v5631_v17, %v3480_v7  ;;  %v3228_v60 = vmul.f32 0.33333334, %v3210_v43  ;;  %v3175_v61 = vmul.f32 4.0, %v5680_v16 }
 0x652   : > { %v3329_v9 = vsub.f32 1.5, %v3328_v32 }
 0x653   : > { %v3913_v33 = vpop.eup %3912  ;;  %v3537_v27 = vadd.f32 %v3519_v59, %v3501_v10  ;;  %v3264_v50 = vadd.f32 0.001, %v3228_v60  ;;  %v3193_v53 = vmul.f32 %v3175_v61, %v5680_v16  ;;  %v3246_v60 = vsub.f32 %v5539_v52, %v5669_v18  ;;  %v3522_v18 = vld [vmem:[#allocation2 + $0x65] sm:$0xff] }
 0x654   : > { %v3330_v54 = vmul.f32 %v3911_v3, %v3329_v9  ;;  %v3336_v34 = vmul.f32 %v3913_v33, %v3263_v2  ;;  %vm3342_vm8 = vweird.f32 %v3913_v33 }
 0x655   : > { %3555 = vst [vmem:[%s4297_s15 + $0x20] sm:$0xff] %v3537_v27  ;;  %3914 = vrsqrt.f32 %v3264_v50  ;;  %vm3343_vm10 = vmor %vm3341_vm9, %vm3342_vm8  ;;  %vm3351_vm12 = vweird.f32 %v3264_v50 }
 0x656   : > { %v3334_v22 = vsel %vm3333_vm7, %v3911_v3, %v3330_v54  ;;  %v3337_v20 = vmul.f32 %v3913_v33, %v3336_v34  ;;  %v3130_v0 = vpop.xlane.xlu2 %3129  ;;  %v3078_v42 = vpop.xlane.xlu0 %3077  ;;  %v3245_v3 = vsub.f32 %v5533_v30, %v5656_v35  ;;  %v3521_v30 = vld [vmem:[#allocation2 + $0x5d] sm:$0xff] }
 0x657   : > { %v3460_v41 = vmul.f32 %v3334_v22, %v3244_v24  ;;  %v3211_v39 = vsub.f32 %v3130_v0, %v3193_v53  ;;  %v5689_v23 = vmul.f32 0.25, %v3078_v42 }
 0x658   : > { %v3338_v13 = vmul.f32 0.5, %v3337_v20 }
 0x659   : > { %v3481_v38 = vmul.f32 %v5625_v49, %v3460_v41  ;;  %v3229_v21 = vmul.f32 0.33333334, %v3211_v39  ;;  %v3176_v1 = vmul.f32 4.0, %v5689_v23 }
 0x65a   : > { %v3339_v57 = vsub.f32 1.5, %v3338_v13 }
 0x65b   : > { %v3915_v25 = vpop.eup %3914  ;;  %v3502_v37 = vadd.f32 %v5631_v17, %v3481_v38  ;;  %v3265_v4 = vadd.f32 0.001, %v3229_v21  ;;  %v3194_v56 = vmul.f32 %v3176_v1, %v5689_v23  ;;  %v3247_v1 = vsub.f32 %v5545_v31, %v5680_v16  ;;  %v3523_v16 = vld [vmem:[#allocation2 + $0x6d] sm:$0xff] }
 0x65c   : > { %v3340_v63 = vmul.f32 %v3913_v33, %v3339_v57  ;;  %v3346_v11 = vmul.f32 %v3915_v25, %v3264_v50  ;;  %vm3352_vm11 = vweird.f32 %v3915_v25 }
 0x65d   : > { %v3538_v29 = vadd.f32 %v3520_v55, %v3502_v37  ;;  %3916 = vrsqrt.f32 %v3265_v4  ;;  %vm3353_vm13 = vmor %vm3351_vm12, %vm3352_vm11  ;;  %vm3361_vm15 = vweird.f32 %v3265_v4 }
 0x65e   : > { %v3344_v48 = vsel %vm3343_vm10, %v3913_v33, %v3340_v63  ;;  %v3347_v58 = vmul.f32 %v3915_v25, %v3346_v11  ;;  %v3080_v14 = vpop.xlane.xlu1 %3079  ;;  %v3132_v51 = vpop.xlane.xlu0 %3131 }
 0x65f   : > { %3556 = vst [vmem:[%s4297_s15 + $0x28] sm:$0xff] %v3538_v29  ;;  %v3461_v15 = vmul.f32 %v3344_v48, %v3245_v3  ;;  %v5698_v40 = vmul.f32 0.25, %v3080_v14  ;;  %v3212_v6 = vsub.f32 %v3132_v51, %v3194_v56 }
 0x660   : > { %v3348_v62 = vmul.f32 0.5, %v3347_v58 }
 0x661   : > { %v3482_v2 = vmul.f32 %v5625_v49, %v3461_v15  ;;  %v3230_v46 = vmul.f32 0.33333334, %v3212_v6  ;;  %v3177_v45 = vmul.f32 4.0, %v5698_v40 }
 0x662   : > { %v3349_v35 = vsub.f32 1.5, %v3348_v62 }
 0x663   : > { %v3917_v7 = vpop.eup %3916  ;;  %v3503_v43 = vadd.f32 %v5631_v17, %v3482_v2  ;;  %v3266_v59 = vadd.f32 0.001, %v3230_v46  ;;  %v3195_v9 = vmul.f32 %v3177_v45, %v5698_v40  ;;  %v3248_v45 = vsub.f32 %v5551_v5, %v5689_v23  ;;  %v3524_v5 = vld [vmem:[#allocation2 + $0x75] sm:$0xff] }
 0x664   : > { %v3350_v32 = vmul.f32 %v3915_v25, %v3349_v35  ;;  %v3356_v10 = vmul.f32 %v3917_v7, %v3265_v4  ;;  %vm3362_vm14 = vweird.f32 %v3917_v7 }
 0x665   : > { %v3539_v61 = vadd.f32 %v3521_v30, %v3503_v43  ;;  %3918 = vrsqrt.f32 %v3266_v59  ;;  %vm3363_vm0 = vmor %vm3361_vm15, %vm3362_vm14  ;;  %vm3371_vm2 = vweird.f32 %v3266_v59 }
 0x666   : > { %v3354_v33 = vsel %vm3353_vm13, %v3915_v25, %v3350_v32  ;;  %v3357_v27 = vmul.f32 %v3917_v7, %v3356_v10  ;;  %v3082_v54 = vpop.xlane.xlu2 %3081  ;;  %v3134_v34 = vpop.xlane.xlu1 %3133 }
 0x667   : > { %3557 = vst [vmem:[%s4297_s15 + $0x30] sm:$0xff] %v3539_v61  ;;  %v3462_v24 = vmul.f32 %v3354_v33, %v3246_v60  ;;  %v5707_v53 = vmul.f32 0.25, %v3082_v54  ;;  %v3213_v22 = vsub.f32 %v3134_v34, %v3195_v9 }
 0x668   : > { %v3358_v20 = vmul.f32 0.5, %v3357_v27 }
 0x669   : > { %v3483_v50 = vmul.f32 %v5625_v49, %v3462_v24  ;;  %v3231_v0 = vmul.f32 0.33333334, %v3213_v22  ;;  %v3178_v52 = vmul.f32 4.0, %v5707_v53 }
 0x66a   : > { %v3359_v42 = vsub.f32 1.5, %v3358_v20 }
 0x66b   : > { %v3919_v41 = vpop.eup %3918  ;;  %v3504_v39 = vadd.f32 %v5631_v17, %v3483_v50  ;;  %v3267_v13 = vadd.f32 0.001, %v3231_v0  ;;  %v3196_v57 = vmul.f32 %v3178_v52, %v5707_v53  ;;  %v3249_v50 = vsub.f32 %v5557_v28, %v5698_v40  ;;  %v3525_v40 = vld [vmem:[#allocation2 + $0x7d] sm:$0xff] }
 0x66c   : > { %v3360_v38 = vmul.f32 %v3917_v7, %v3359_v42  ;;  %v3366_v21 = vmul.f32 %v3919_v41, %v3266_v59  ;;  %vm3372_vm1 = vweird.f32 %v3919_v41 }
 0x66d   : > { %v3540_v55 = vadd.f32 %v3522_v18, %v3504_v39  ;;  %3920 = vrsqrt.f32 %v3267_v13  ;;  %vm3373_vm3 = vmor %vm3371_vm2, %vm3372_vm1  ;;  %vm3381_vm5 = vweird.f32 %v3267_v13 }
 0x66e   : > { %v3364_v25 = vsel %vm3363_vm0, %v3917_v7, %v3360_v38  ;;  %v3367_v37 = vmul.f32 %v3919_v41, %v3366_v21  ;;  %v3136_v63 = vpop.xlane.xlu2 %3135  ;;  %v3084_v11 = vpop.xlane.xlu0 %3083 }
 0x66f   : > { %3558 = vst [vmem:[%s4297_s15 + $0x38] sm:$0xff] %v3540_v55  ;;  %v3463_v29 = vmul.f32 %v3364_v25, %v3247_v1  ;;  %v3214_v3 = vsub.f32 %v3136_v63, %v3196_v57  ;;  %v5716_v56 = vmul.f32 0.25, %v3084_v11 }
 0x670   : > { %v3368_v48 = vmul.f32 0.5, %v3367_v37 }
 0x671   : > { %v3484_v4 = vmul.f32 %v5625_v49, %v3463_v29  ;;  %v3232_v58 = vmul.f32 0.33333334, %v3214_v3  ;;  %v3179_v31 = vmul.f32 4.0, %v5716_v56 }
 0x672   : > { %v3369_v14 = vsub.f32 1.5, %v3368_v48  ;;  %v3250_v48 = vsub.f32 %v5563_v19, %v5707_v53  ;;  %v3526_v53 = vld [vmem:[#allocation2 + $0x85] sm:$0xff] }
 0x673   : > { %v3921_v51 = vpop.eup %3920  ;;  %v3505_v15 = vadd.f32 %v5631_v17, %v3484_v4  ;;  %v3268_v6 = vadd.f32 0.001, %v3232_v58  ;;  %v3197_v30 = vmul.f32 %v3179_v31, %v5716_v56 }
 0x674   : > { %v3370_v62 = vmul.f32 %v3919_v41, %v3369_v14  ;;  %v3376_v2 = vmul.f32 %v3921_v51, %v3267_v13  ;;  %vm3382_vm4 = vweird.f32 %v3921_v51 }
 0x675   : > { %v3541_v46 = vadd.f32 %v3523_v16, %v3505_v15  ;;  %3922 = vrsqrt.f32 %v3268_v6  ;;  %vm3383_vm6 = vmor %vm3381_vm5, %vm3382_vm4  ;;  %vm3391_vm8 = vweird.f32 %v3268_v6 }
 0x676   : > { %v3374_v35 = vsel %vm3373_vm3, %v3919_v41, %v3370_v62  ;;  %v3377_v7 = vmul.f32 %v3921_v51, %v3376_v2  ;;  %v3086_v43 = vpop.xlane.xlu1 %3085  ;;  %v3138_v32 = vpop.xlane.xlu0 %3137 }
 0x677   : > { %3559 = vst [vmem:[%s4297_s15 + $0x40] sm:$0xff] %v3541_v46  ;;  %v3464_v10 = vmul.f32 %v3374_v35, %v3248_v45  ;;  %v5725_v60 = vmul.f32 0.25, %v3086_v43  ;;  %v3215_v61 = vsub.f32 %v3138_v32, %v3197_v30 }
 0x678   : > { %v3378_v9 = vmul.f32 0.5, %v3377_v7 }
 0x679   : > { %v3485_v59 = vmul.f32 %v5625_v49, %v3464_v10  ;;  %v3233_v33 = vmul.f32 0.33333334, %v3215_v61  ;;  %v3180_v27 = vmul.f32 4.0, %v5725_v60 }
 0x67a   : > { %v3379_v23 = vsub.f32 1.5, %v3378_v9  ;;  %v3251_v9 = vsub.f32 %v5569_v36, %v5716_v56  ;;  %v3527_v36 = vld [vmem:[#allocation2 + $0x8d] sm:$0xff] }
 0x67b   : > { %v3923_v54 = vpop.eup %3922  ;;  %v3506_v34 = vadd.f32 %v5631_v17, %v3485_v59  ;;  %v3269_v24 = vadd.f32 0.001, %v3233_v33  ;;  %v3198_v52 = vmul.f32 %v3180_v27, %v5725_v60 }
 0x67c   : > { %v3380_v22 = vmul.f32 %v3921_v51, %v3379_v23  ;;  %v3386_v20 = vmul.f32 %v3923_v54, %v3268_v6  ;;  %vm3392_vm7 = vweird.f32 %v3923_v54 }
 0x67d   : > { %v3542_v0 = vadd.f32 %v3524_v5, %v3506_v34  ;;  %3924 = vrsqrt.f32 %v3269_v24  ;;  %vm3393_vm9 = vmor %vm3391_vm8, %vm3392_vm7  ;;  %vm3401_vm11 = vweird.f32 %v3269_v24 }
 0x67e   : > { %v3384_v18 = vsel %vm3383_vm6, %v3921_v51, %v3380_v22  ;;  %v3387_v42 = vmul.f32 %v3923_v54, %v3386_v20  ;;  %v3088_v41 = vpop.xlane.xlu2 %3087  ;;  %v3140_v39 = vpop.xlane.xlu1 %3139 }
 0x67f   : > { %3560 = vst [vmem:[%s4297_s15 + $0x48] sm:$0xff] %v3542_v0  ;;  %v3465_v38 = vmul.f32 %v3384_v18, %v3249_v50  ;;  %v5734_v21 = vmul.f32 0.25, %v3088_v41  ;;  %v3216_v1 = vsub.f32 %v3140_v39, %v3198_v52 }
 0x680   : > { %v3388_v55 = vmul.f32 0.5, %v3387_v42 }
 0x681   : > { %v3486_v13 = vmul.f32 %v5625_v49, %v3465_v38  ;;  %v3234_v57 = vmul.f32 0.33333334, %v3216_v1  ;;  %v3181_v28 = vmul.f32 4.0, %v5734_v21  ;;  %v3252_v38 = vsub.f32 %v5575_v26, %v5725_v60  ;;  %v3528_v60 = vld [vmem:[#allocation2 + $0x95] sm:$0xff] }
 0x682   : > { %v3389_v25 = vsub.f32 1.5, %v3388_v55 }
 0x683   : > { %v3925_v37 = vpop.eup %3924  ;;  %v3507_v63 = vadd.f32 %v5631_v17, %v3486_v13  ;;  %v3270_v11 = vadd.f32 0.001, %v3234_v57  ;;  %v3199_v58 = vmul.f32 %v3181_v28, %v5734_v21 }
 0x684   : > { %v3390_v29 = vmul.f32 %v3923_v54, %v3389_v25  ;;  %v3396_v3 = vmul.f32 %v3925_v37, %v3269_v24  ;;  %vm3402_vm10 = vweird.f32 %v3925_v37 }
 0x685   : > { %v3543_v4 = vadd.f32 %v3525_v40, %v3507_v63  ;;  %3926 = vrsqrt.f32 %v3270_v11  ;;  %vm3403_vm12 = vmor %vm3401_vm11, %vm3402_vm10  ;;  %vm3411_vm14 = vweird.f32 %v3270_v11 }
 0x686   : > { %v3394_v31 = vsel %vm3393_vm9, %v3923_v54, %v3390_v29  ;;  %v3397_v16 = vmul.f32 %v3925_v37, %v3396_v3  ;;  %v3142_v14 = vpop.xlane.xlu2 %3141  ;;  %v3090_v51 = vpop.xlane.xlu0 %3089 }
 0x687   : > { %3561 = vst [vmem:[%s4297_s15 + $0x50] sm:$0xff] %v3543_v4  ;;  %v3466_v15 = vmul.f32 %v3394_v31, %v3250_v48  ;;  %v3217_v62 = vsub.f32 %v3142_v14, %v3199_v58  ;;  %v5743_v2 = vmul.f32 0.25, %v3090_v51  ;;  %v3253_v51 = vsub.f32 %v5581_v44, %v5734_v21 }
 0x688   : > { %v3398_v46 = vmul.f32 0.5, %v3397_v16 }
 0x689   : > { %v3487_v6 = vmul.f32 %v5625_v49, %v3466_v15  ;;  %v3235_v45 = vmul.f32 0.33333334, %v3217_v62  ;;  %v3182_v19 = vmul.f32 4.0, %v5743_v2 }
 0x68a   : > { %v3399_v30 = vsub.f32 1.5, %v3398_v46 }
 0x68b   : > { %v3927_v35 = vpop.eup %3926  ;;  %v3508_v7 = vadd.f32 %v5631_v17, %v3487_v6  ;;  %v3271_v43 = vadd.f32 0.001, %v3235_v45  ;;  %v3200_v59 = vmul.f32 %v3182_v19, %v5743_v2 }
 0x68c   : > { %v3400_v32 = vmul.f32 %v3925_v37, %v3399_v30  ;;  %v3406_v10 = vmul.f32 %v3927_v35, %v3270_v11  ;;  %vm3412_vm13 = vweird.f32 %v3927_v35 }
 0x68d   : > { %v3544_v61 = vadd.f32 %v3526_v53, %v3508_v7  ;;  %3928 = vrsqrt.f32 %v3271_v43  ;;  %vm3413_vm15 = vmor %vm3411_vm14, %vm3412_vm13  ;;  %vm3421_vm1 = vweird.f32 %v3271_v43 }
 0x68e   : > { %v3404_v33 = vsel %vm3403_vm12, %v3925_v37, %v3400_v32  ;;  %v3407_v27 = vmul.f32 %v3927_v35, %v3406_v10  ;;  %v3092_v5 = vpop.xlane.xlu1 %3091  ;;  %v3144_v23 = vpop.xlane.xlu0 %3143 }
 0x68f   : > { %3562 = vst [vmem:[%s4297_s15 + $0x58] sm:$0xff] %v3544_v61  ;;  %v3467_v54 = vmul.f32 %v3404_v33, %v3251_v9  ;;  %v5752_v34 = vmul.f32 0.25, %v3092_v5  ;;  %v3218_v22 = vsub.f32 %v3144_v23, %v3200_v59  ;;  %v3254_v33 = vsub.f32 %v5589_v8, %v5743_v2 }
 0x690   : > { %v3408_v20 = vmul.f32 0.5, %v3407_v27 }
 0x691   : > { %v3488_v24 = vmul.f32 %v5625_v49, %v3467_v54  ;;  %v3236_v50 = vmul.f32 0.33333334, %v3218_v22  ;;  %v3183_v0 = vmul.f32 4.0, %v5752_v34  ;;  %v3255_v2 = vsub.f32 %v5597_v12, %v5752_v34 }
 0x692   : > { %v3409_v56 = vsub.f32 1.5, %v3408_v20  ;;  %v3530_v20 = vld [vmem:[#allocation2 + $0xa5] sm:$0xff] }
 0x693   : > { %v3929_v52 = vpop.eup %3928  ;;  %v3509_v18 = vadd.f32 %v5631_v17, %v3488_v24  ;;  %v3272_v42 = vadd.f32 0.001, %v3236_v50  ;;  %v3201_v55 = vmul.f32 %v3183_v0, %v5752_v34 }
 0x694   : > { %v3410_v41 = vmul.f32 %v3927_v35, %v3409_v56  ;;  %v3416_v39 = vmul.f32 %v3929_v52, %v3271_v43  ;;  %vm3422_vm0 = vweird.f32 %v3929_v52  ;;  %v3529_v43 = vld [vmem:[#allocation2 + $0x9d] sm:$0xff] }
 0x695   : > { %v3545_v1 = vadd.f32 %v3527_v36, %v3509_v18  ;;  %3930 = vrsqrt.f32 %v3272_v42  ;;  %vm3423_vm2 = vmor %vm3421_vm1, %vm3422_vm0  ;;  %vm3431_vm4 = vweird.f32 %v3272_v42 }
 0x696   : > { %v3414_v13 = vsel %vm3413_vm15, %v3927_v35, %v3410_v41  ;;  %v3417_v57 = vmul.f32 %v3929_v52, %v3416_v39  ;;  %v3094_v28 = vpop.xlane.xlu2 %3093  ;;  %v3146_v40 = vpop.xlane.xlu1 %3145 }
 0x697   : > { %3563 = vst [vmem:[%s4297_s15 + $0x60] sm:$0xff] %v3545_v1  ;;  %v3468_v25 = vmul.f32 %v3414_v13, %v3252_v38  ;;  %v5761_v37 = vmul.f32 0.25, %v3094_v28  ;;  %v3219_v63 = vsub.f32 %v3146_v40, %v3201_v55  ;;  %v3531_v38 = vld [vmem:[#allocation2 + $0xad] sm:$0xff] }
 0x698   : > { %v3418_v29 = vmul.f32 0.5, %v3417_v57 }
 0x699   : > { %v3489_v11 = vmul.f32 %v5625_v49, %v3468_v25  ;;  %v3237_v3 = vmul.f32 0.33333334, %v3219_v63  ;;  %v3184_v26 = vmul.f32 4.0, %v5761_v37  ;;  %v3256_v12 = vsub.f32 %v5605_v47, %v5761_v37  ;;  %v3532_v25 = vld [vmem:[#allocation2 + $0xb5] sm:$0xff] }
 0x69a   : > { %v3419_v48 = vsub.f32 1.5, %v3418_v29 }
 0x69b   : > { %v3931_v4 = vpop.eup %3930  ;;  %v3510_v58 = vadd.f32 %v5631_v17, %v3489_v11  ;;  %v3273_v31 = vadd.f32 0.001, %v3237_v3  ;;  %v3202_v62 = vmul.f32 %v3184_v26, %v5761_v37 }
 0x69c   : > { %v3420_v16 = vmul.f32 %v3929_v52, %v3419_v48  ;;  %v3426_v14 = vmul.f32 %v3931_v4, %v3272_v42  ;;  %vm3432_vm3 = vweird.f32 %v3931_v4 }
 0x69d   : > { %v3546_v15 = vadd.f32 %v3528_v60, %v3510_v58  ;;  %3932 = vrsqrt.f32 %v3273_v31  ;;  %vm3433_vm5 = vmor %vm3431_vm4, %vm3432_vm3  ;;  %vm3441_vm7 = vweird.f32 %v3273_v31 }
 0x69e   : > { %v3424_v46 = vsel %vm3423_vm2, %v3929_v52, %v3420_v16  ;;  %v3427_v6 = vmul.f32 %v3931_v4, %v3426_v14  ;;  %v3148_v45 = vpop.xlane.xlu2 %3147 }
 0x69f   : > { %3564 = vst [vmem:[%s4297_s15 + $0x68] sm:$0xff] %v3546_v15  ;;  %v3469_v19 = vmul.f32 %v3424_v46, %v3253_v51  ;;  %v3220_v53 = vsub.f32 %v3148_v45, %v3202_v62 }
 0x6a0   : > { %v3428_v30 = vmul.f32 0.5, %v3427_v6 }
 0x6a1   : > { %v3490_v35 = vmul.f32 %v5625_v49, %v3469_v19  ;;  %v3238_v7 = vmul.f32 0.33333334, %v3220_v53 }
 0x6a2   : > { %v3429_v32 = vsub.f32 1.5, %v3428_v30 }
 0x6a3   : > { %v3933_v44 = vpop.eup %3932  ;;  %v3511_v21 = vadd.f32 %v5631_v17, %v3490_v35  ;;  %v3274_v10 = vadd.f32 0.001, %v3238_v7 }
 0x6a4   : > { %v3430_v61 = vmul.f32 %v3931_v4, %v3429_v32  ;;  %v3436_v9 = vmul.f32 %v3933_v44, %v3273_v31  ;;  %vm3442_vm6 = vweird.f32 %v3933_v44 }
 0x6a5   : > { %v3547_v59 = vadd.f32 %v3529_v43, %v3511_v21  ;;  %3934 = vrsqrt.f32 %v3274_v10  ;;  %vm3443_vm8 = vmor %vm3441_vm7, %vm3442_vm6  ;;  %vm3451_vm10 = vweird.f32 %v3274_v10 }
 0x6a6   : > { %v3434_v27 = vsel %vm3433_vm5, %v3931_v4, %v3430_v61  ;;  %v3437_v5 = vmul.f32 %v3933_v44, %v3436_v9 }
 0x6a7   : > { %3565 = vst [vmem:[%s4297_s15 + $0x70] sm:$0xff] %v3547_v59  ;;  %v3470_v23 = vmul.f32 %v3434_v27, %v3254_v33 }
 0x6a8   : > { %v3438_v54 = vmul.f32 0.5, %v3437_v5 }
 0x6a9   : > { %v3491_v22 = vmul.f32 %v5625_v49, %v3470_v23 }
 0x6aa   : > { %v3439_v24 = vsub.f32 1.5, %v3438_v54 }
 0x6ab   : > { %v3935_v50 = vpop.eup %3934  ;;  %v3512_v0 = vadd.f32 %v5631_v17, %v3491_v22 }
 0x6ac   : > { %v3440_v36 = vmul.f32 %v3933_v44, %v3439_v24  ;;  %v3446_v8 = vmul.f32 %v3935_v50, %v3274_v10  ;;  %vm3452_vm9 = vweird.f32 %v3935_v50 }
 0x6ad   : > { %v3548_v56 = vadd.f32 %v3530_v20, %v3512_v0  ;;  %vm3453_vm11 = vmor %vm3451_vm10, %vm3452_vm9 }
 0x6ae   : > { %v3444_v52 = vsel %vm3443_vm8, %v3933_v44, %v3440_v36  ;;  %v3447_v18 = vmul.f32 %v3935_v50, %v3446_v8 }
 0x6af   : > { %3566 = vst [vmem:[%s4297_s15 + $0x78] sm:$0xff] %v3548_v56  ;;  %v3471_v42 = vmul.f32 %v3444_v52, %v3255_v2 }
 0x6b0   : > { %v3448_v41 = vmul.f32 0.5, %v3447_v18 }
 0x6b1   : > { %v3492_v39 = vmul.f32 %v5625_v49, %v3471_v42 }
 0x6b2   : > { %v3449_v1 = vsub.f32 1.5, %v3448_v41 }
 0x6b3   : > { %v3513_v55 = vadd.f32 %v5631_v17, %v3492_v39 }
 0x6b4   : > { %v3450_v13 = vmul.f32 %v3935_v50, %v3449_v1 }
 0x6b5   : > { %v3549_v34 = vadd.f32 %v3531_v38, %v3513_v55 }
 0x6b6   : > { %v3454_v57 = vsel %vm3453_vm11, %v3935_v50, %v3450_v13 }
 0x6b7   : > { %3567 = vst [vmem:[%s4297_s15 + $0x80] sm:$0xff] %v3549_v34  ;;  %v3472_v28 = vmul.f32 %v3454_v57, %v3256_v12 }
 0x6b9   : > { %v3493_v40 = vmul.f32 %v5625_v49, %v3472_v28 }
 0x6bb   : > { %v3514_v63 = vadd.f32 %v5631_v17, %v3493_v40 }
 0x6bd   : > { %v3550_v47 = vadd.f32 %v3532_v25, %v3514_v63 }
 0x6bf   : > { %3568 = vst [vmem:[%s4297_s15 + $0x88] sm:$0xff] %v3550_v47 }
 0x6c0   : > { %4047 = shalt.err (!%p4044_p2)
}
 0x6c1   : > { %s4132_s15 = smov 128   ;;  %s4133_s1 = smov 8  }
 0x6c2   : > { %3756 = dma.vmem_to_hbm [thread:$0]  (%p4236_p3), %s3585_s20, 2304, %s3587_s21, %s3570_s27, %s4132_s15, %s4132_s15, %s4133_s1  }
 0x6c3 PF: > { %s6009_s5 = sld [smem:[#allocation22_spill]] }
 0x6c4   : > { %s6010_s30 = sld [smem:[#allocation19_spill]] }
 0x6c9   : > { %p3773_p4 = scmp.ge.s32.totalorder %s6009_s5, 2 }
 0x6ca   : > { %s3601_s13 = sand.u32 1, %s6010_s30  }
 0x6cb   : > { %p3766_p5 = pnand %p3773_p4, %p4245_p8  ;;  %s3602_s16 = scalar_lea.sflag [#allocation7], %s3601_s13 }
 0x6cd   : > { %p3767_p6 = pneg %p3766_p5 }
 0x6cf   : > { %4091 = dma.done.wait (%p3767_p6), %s3602_s16, 2304  }
 0x6d0   : > { %4093 = vsyncadd (%p3767_p6), %s3602_s16, 4294964992  ;;  %s24_s16 = sadd.s32 1, %s6009_s5   ;;  %s6012_s12 = sld [smem:[#allocation20_spill]] }
 0x6d1   : > { %p21_p7 = scmp.ge.s32.totalorder %s24_s16, 6   ;;  %s6013_s13 = sld [smem:[#allocation21_spill]] }
 0x6d2   : > { %s6014_s23 = sld [smem:[#allocation23_spill]]  ;;  %s6016_s30 = smov %s4100_s10 }
 0x6d3   : > { %s6015_s15 = sld [smem:[#allocation24_spill]]  ;;  %s6017_s10 = smov %s4104_s11 }
 0x6d4   : > { %s6018_s11 = smov %s4266_s14  ;;  %23 = sbr.rel (!%p21_p7) target bundleno = 10 (0xa), region = 107 }
 0x6d8   : > { %s6019_s14 = smov %s6014_s23 }
 0x6d9   :  { %3608 = vsyncpa [#allocation6], 1 }
 0x6da   :  { %3610 = vsyncpa [#allocation6 + $0x1], 1 }
 0x6db   :  { %3611 = vsyncpa [#allocation9], 1 }
 0x6dc   :  { %3612 = vsyncpa [#allocation7], 1 }
 0x6dd   :  { %3614 = vsyncpa [#allocation7 + $0x1], 1 }
 0x6de   :  { %3615 = vsyncmov [#allocation4] }
 0x6e1   :  { %s3616_s19 = vpop.sfrf %3615 }
 0x6e2   :  { %p3696_p3 = scmp.ne.s32.totalorder %s3616_s19, 0 }
 0x6e4   :  { %3620 = shalt.err (%p3696_p3)  }

</bundles_post_ra>
